<compile_context>
chip_gen: v5e
topology: v5e:2x2
jax: 0.10.0
libtpu: 0.0.40
codegen_flags: <defaults>
</compile_context>

<pallas_src>
import functools
import numpy as np

import jax
import jax.numpy as jnp
from jax.experimental import pallas as pl
from jax.experimental.pallas import tpu as pltpu


def _round_up(x, m):
    return ((x + m - 1) // m) * m


def _vmem_limit():
    # ~48 MiB on v7x (64 MiB physical VMEM), ~100 MiB on v5e/v6e (128 MiB physical).
    try:
        cap = pltpu.get_tpu_info().vmem_capacity_bytes
    except Exception:
        cap = 64 * 1024 * 1024
    return int(min(cap - 16 * 1024 * 1024, 100 * 1024 * 1024))


VMEM_LIMIT = _vmem_limit()


# ----------------------------------------------------------------------------
# Fused [LayerNorm] -> Linear(bf16 MXU) -> [bias] -> [GELU] -> [residual] kernel
# ----------------------------------------------------------------------------


@functools.lru_cache(maxsize=None)
def _make_linear_kernel(has_bias, has_ln, activation, has_res):
    def kernel(*refs):
        i = 0
        x_ref = refs[i]; i += 1
        w_ref = refs[i]; i += 1
        b_ref = g_ref = bb_ref = r_ref = None
        if has_bias:
            b_ref = refs[i]; i += 1
        if has_ln:
            g_ref, bb_ref = refs[i], refs[i + 1]; i += 2
        if has_res:
            r_ref = refs[i]; i += 1
        o_ref = refs[i]

        x = x_ref[...]
        if has_ln:
            x = x.astype(jnp.float32)
            mu = jnp.mean(x, axis=-1, keepdims=True)
            var = jnp.mean(jnp.square(x - mu), axis=-1, keepdims=True)
            x = (x - mu) * jax.lax.rsqrt(var + 1e-5)          # PyTorch LayerNorm eps
            x = x * g_ref[...] + bb_ref[...]
        # bf16 operands on the MXU, fp32 accumulation
        y = jnp.dot(x.astype(jnp.bfloat16), w_ref[...],
                    preferred_element_type=jnp.float32)
        if has_bias:
            y = y + b_ref[...]
        if activation == "gelu":
            # exact GELU (erf form) — matches PyTorch nn.GELU default
            y = 0.5 * y * (1.0 + jax.lax.erf(y * 0.7071067811865476))
        if has_res:
            y = y + r_ref[...].astype(jnp.float32)
        o_ref[...] = y.astype(o_ref.dtype)

    return kernel


def fused_linear(x, lin, n_out, *, ln=None, activation="none", residual=None,
                 out_dtype=jnp.float32, tm=256, tn=1024):
    """y = [LN(x)] @ W (+b) (+GELU) (+residual).

    lin["w"]: (K, Np) bf16, pre-transposed & pre-padded to a 128-multiple of lanes.
    lin["b"]: (1, Np) fp32 (pre-padded) or None.  n_out is the true output width.
    """
    w = lin["w"]
    b = lin["b"]
    K, Np = w.shape
    *lead, Kx = x.shape
    M = int(np.prod(lead)) if lead else 1
    x2 = x.reshape(M, K)

    # Row tiling: use the full M as one block when it fits (no per-call pad).
    if M <= tm:
        TM, Mp = M, M
    else:
        TM = tm
        Mp = _round_up(M, TM)
        x2 = jnp.pad(x2, ((0, Mp - M), (0, 0)))

    # Lane tiling: Np is a 128-multiple; pick the largest 128-multiple divisor <= tn.
    if Np <= tn:
        TN = Np
    else:
        TN = 128
        for cand in range(tn, 127, -128):
            if Np % cand == 0:
                TN = cand
                break

    inputs = [x2, w]
    in_specs = [
        pl.BlockSpec((TM, K), lambda i, j: (i, 0)),
        pl.BlockSpec((K, TN), lambda i, j: (0, j)),
    ]

    has_bias = b is not None
    if has_bias:
        inputs.append(b)
        in_specs.append(pl.BlockSpec((1, TN), lambda i, j: (0, j)))

    has_ln = ln is not None
    if has_ln:
        g, bb = ln                                   # stored as (1, K) fp32
        inputs += [g, bb]
        in_specs += [pl.BlockSpec((1, K), lambda i, j: (0, 0)),
                     pl.BlockSpec((1, K), lambda i, j: (0, 0))]

    has_res = residual is not None
    if has_res:
        r2 = residual.reshape(M, n_out)
        if Mp != M or Np != n_out:
            r2 = jnp.pad(r2, ((0, Mp - M), (0, Np - n_out)))
        inputs.append(r2)
        in_specs.append(pl.BlockSpec((TM, TN), lambda i, j: (i, j)))

    out = pl.pallas_call(
        _make_linear_kernel(has_bias, has_ln, activation, has_res),
        out_shape=jax.ShapeDtypeStruct((Mp, Np), out_dtype),
        grid=(Mp // TM, Np // TN),
        in_specs=in_specs,
        out_specs=pl.BlockSpec((TM, TN), lambda i, j: (i, j)),
        compiler_params=pltpu.CompilerParams(
            dimension_semantics=("parallel", "parallel"),
            vmem_limit_bytes=VMEM_LIMIT),
    )(*inputs)
    if Mp != M or Np != n_out:
        out = out[:M, :n_out]
    return out.reshape(*lead, n_out)


# ----------------------------------------------------------------------------
# Attention kernels — grid over batch, all heads processed in-kernel,
# qkv consumed straight from the (B, N, 3C) projection, output written as (B, N, C).
# ----------------------------------------------------------------------------


def _mhsa_kernel(qkv_ref, o_ref, *, num_heads):
    three_c = qkv_ref.shape[-1]
    C = three_c // 3
    Dh = C // num_heads
    qkv = qkv_ref[...]                               # (N, 3C) bf16, q already scaled
    outs = []
    for h in range(num_heads):
        q = qkv[:, h * Dh:(h + 1) * Dh]
        k = qkv[:, C + h * Dh:C + (h + 1) * Dh]
        v = qkv[:, 2 * C + h * Dh:2 * C + (h + 1) * Dh]
        s = jax.lax.dot_general(q, k, (((1,), (1,)), ((), ())),
                                preferred_element_type=jnp.float32)
        s = s - jnp.max(s, axis=-1, keepdims=True)
        p = jnp.exp(s)
        p = p * pl.reciprocal(jnp.sum(p, axis=-1, keepdims=True), approx=True)
        outs.append(jnp.dot(p.astype(jnp.bfloat16), v,
                            preferred_element_type=jnp.float32))
    o_ref[...] = jnp.concatenate(outs, axis=-1).astype(o_ref.dtype)


def _gpsa_kernel(qkv_ref, pos_ref, gate_ref, o_ref, *, num_heads):
    three_c = qkv_ref.shape[-1]
    C = three_c // 3
    Dh = C // num_heads
    qkv = qkv_ref[...]                               # (N, 3C) bf16
    outs = []
    for h in range(num_heads):
        q = qkv[:, h * Dh:(h + 1) * Dh]
        k = qkv[:, C + h * Dh:C + (h + 1) * Dh]
        v = qkv[:, 2 * C + h * Dh:2 * C + (h + 1) * Dh]
        s = jax.lax.dot_general(q, k, (((1,), (1,)), ((), ())),
                                preferred_element_type=jnp.float32)
        s = s - jnp.max(s, axis=-1, keepdims=True)
        patch = jnp.exp(s)
        patch = patch * pl.reciprocal(jnp.sum(patch, axis=-1, keepdims=True),
                                      approx=True)
        g = gate_ref[h]                              # sigmoid(gating_param[h]) from SMEM
        attn = (1.0 - g) * patch + g * pos_ref[h]
        attn = attn * pl.reciprocal(jnp.sum(attn, axis=-1, keepdims=True),
                                    approx=True)
        outs.append(jnp.dot(attn.astype(jnp.bfloat16), v,
                            preferred_element_type=jnp.float32))
    o_ref[...] = jnp.concatenate(outs, axis=-1).astype(o_ref.dtype)


def mhsa_attention(qkv, num_heads, out_dtype=jnp.bfloat16):
    B, N, three_c = qkv.shape
    C = three_c // 3
    return pl.pallas_call(
        functools.partial(_mhsa_kernel, num_heads=num_heads),
        out_shape=jax.ShapeDtypeStruct((B, N, C), out_dtype),
        grid=(B,),
        in_specs=[pl.BlockSpec((None, N, three_c), lambda b: (b, 0, 0))],
        out_specs=pl.BlockSpec((None, N, C), lambda b: (b, 0, 0)),
        compiler_params=pltpu.CompilerParams(
            dimension_semantics=("parallel",),
            vmem_limit_bytes=VMEM_LIMIT),
    )(qkv)


def gpsa_attention(qkv, pos_sm, gate_sig, num_heads, out_dtype=jnp.bfloat16):
    B, N, three_c = qkv.shape
    C = three_c // 3
    H = num_heads
    return pl.pallas_call(
        functools.partial(_gpsa_kernel, num_heads=num_heads),
        out_shape=jax.ShapeDtypeStruct((B, N, C), out_dtype),
        grid=(B,),
        in_specs=[
            pl.BlockSpec((None, N, three_c), lambda b: (b, 0, 0)),
            pl.BlockSpec((H, N, N), lambda b: (0, 0, 0)),     # batch-invariant: fetched once
            pl.BlockSpec(memory_space=pltpu.MemorySpace.SMEM),  # (H,) gate scalars
        ],
        out_specs=pl.BlockSpec((None, N, C), lambda b: (b, 0, 0)),
        compiler_params=pltpu.CompilerParams(
            dimension_semantics=("parallel",),
            vmem_limit_bytes=VMEM_LIMIT),
    )(qkv, pos_sm, gate_sig)


# ----------------------------------------------------------------------------
# Model glue (plain JAX under jit: patchify reshape, pos-embed add, cls concat)
# ----------------------------------------------------------------------------


def block_forward(x, bp, num_heads, hidden, use_gpsa):
    B, N, C = x.shape
    # norm1 fused into the qkv projection (qkv_bias=False -> no bias); q pre-scaled.
    qkv = fused_linear(x, bp["qkv"], 3 * C, ln=(bp["n1_g"], bp["n1_b"]),
                       out_dtype=jnp.bfloat16)
    if use_gpsa:
        o = gpsa_attention(qkv, bp["pos_sm"], bp["gate"], num_heads)
    else:
        o = mhsa_attention(qkv, num_heads)
    # proj with fused residual add (drop_path = Identity)
    x = fused_linear(o, bp["proj"], C, residual=x)
    # MLP: LN+fc1+GELU fused, then fc2 with fused residual
    h = fused_linear(x, bp["fc1"], hidden, ln=(bp["n2_g"], bp["n2_b"]),
                     activation="gelu", out_dtype=jnp.bfloat16)
    x = fused_linear(h, bp["fc2"], C, residual=x)
    return x


def vit_forward(x, params, cfg):
    """x: NCHW float32 image batch."""
    B, C_in, Himg, Wimg = x.shape
    p = cfg["patch_size"]
    D = cfg["embed_dim"]
    nH, nW = Himg // p, Wimg // p
    hidden = int(D * cfg["mlp_ratio"])

    # PatchEmbed conv (kernel=stride=patch) == linear over flattened (C, p, p) patches
    patches = (
        x.reshape(B, C_in, nH, p, nW, p)
        .transpose(0, 2, 4, 1, 3, 5)
        .reshape(B, nH * nW, C_in * p * p)
    )
    tok = fused_linear(patches, params["patch"], D)                 # (B, N, D)
    tok = tok + params["pos_embed"]                                 # use_pos_embed=True

    cls = jnp.broadcast_to(params["cls_token"], (B, 1, D))
    for u, bp in enumerate(params["blocks"]):
        if u == cfg["local_up_to_layer"]:
            tok = jnp.concatenate([cls, tok], axis=1)
        tok = block_forward(tok, bp, cfg["num_heads"], hidden,
                            use_gpsa=(u < cfg["local_up_to_layer"]))

    # final LayerNorm is per-token, so LN(tok)[:, 0] == LN(tok[:, 0]): fuse into head
    cls_tok = tok[:, 0]                                             # (B, D)
    return fused_linear(cls_tok, params["head"], cfg["num_classes"],
                        ln=(params["norm_g"], params["norm_b"]))    # (B, num_classes)


# ----------------------------------------------------------------------------
# Deterministic parameter construction.
# All weights are transposed / lane-padded / cast to bf16 once here; the GPSA
# positional softmax and sigmoid gating (parameter-only) are also precomputed here.
# ----------------------------------------------------------------------------


def get_rel_indices(num_patches):
    """Exact replica of GPSA.get_rel_indices, returns (N, N, 3) float32 numpy."""
    img_size = int(num_patches ** 0.5)
    ind = np.arange(img_size)[None, :] - np.arange(img_size)[:, None]
    indx = np.tile(ind, (img_size, img_size))
    indy = np.repeat(np.repeat(ind, img_size, axis=0), img_size, axis=1)
    indd = indx ** 2 + indy ** 2
    rel = np.zeros((num_patches, num_patches, 3), np.float32)
    rel[:, :, 2] = indd
    rel[:, :, 1] = indy
    rel[:, :, 0] = indx
    return rel


def _prep_linear(w, b):
    """w: (out, in) torch layout -> {'w': (K, Np) bf16 padded, 'b': (1, Np) fp32 or None}."""
    w = np.asarray(w, np.float32)
    n_out, k = w.shape
    n_pad = _round_up(n_out, 128)
    w_t = np.zeros((k, n_pad), np.float32)
    w_t[:, :n_out] = w.T
    out = {"w": jnp.asarray(w_t, jnp.bfloat16)}
    if b is not None:
        b2 = np.zeros((1, n_pad), np.float32)
        b2[0, :n_out] = np.asarray(b, np.float32)
        out["b"] = jnp.asarray(b2)
    else:
        out["b"] = None
    return out


def init_params(key, cfg):
    D = cfg["embed_dim"]
    H = cfg["num_heads"]
    depth = cfg["depth"]
    hidden = int(D * cfg["mlp_ratio"])
    patch_dim = cfg["in_chans"] * cfg["patch_size"] ** 2
    Dh = D // H
    scale = Dh ** (-0.5)
    N = cfg["num_patches"]
    keys = iter(jax.random.split(key, 64 + 16 * depth))

    def tn(shape):  # trunc_normal(std=0.02) surrogate; writable numpy
        return np.array(0.02 * jax.random.normal(next(keys), shape), dtype=np.float32)

    params = {
        "patch": _prep_linear(tn((D, patch_dim)), np.zeros(D, np.float32)),
        "cls_token": jnp.asarray(tn((1, 1, D))),
        "pos_embed": jnp.asarray(tn((1, N, D))),
        "norm_g": jnp.ones((1, D), jnp.float32),
        "norm_b": jnp.zeros((1, D), jnp.float32),
        "head": _prep_linear(tn((cfg["num_classes"], D)),
                             np.zeros(cfg["num_classes"], np.float32)),
    }

    # GPSA.local_init geometry for pos_proj (locality_strength scaling applied below)
    ks = int(H ** 0.5)
    center = (ks - 1) / 2 if ks % 2 == 0 else ks // 2
    rel = get_rel_indices(N).reshape(N * N, 3)

    blocks = []
    for i in range(depth):
        bp = {
            "n1_g": jnp.ones((1, D), jnp.float32),
            "n1_b": jnp.zeros((1, D), jnp.float32),
            "n2_g": jnp.ones((1, D), jnp.float32),
            "n2_b": jnp.zeros((1, D), jnp.float32),
            "proj": _prep_linear(tn((D, D)), np.zeros(D, np.float32)),
            "fc1": _prep_linear(tn((hidden, D)), np.zeros(hidden, np.float32)),
            "fc2": _prep_linear(tn((D, hidden)), np.zeros(D, np.float32)),
        }
        if i < cfg["local_up_to_layer"]:
            # GPSA: merged qk + v projection (qkv_bias=False). local_init: v.weight = I.
            qk_w = tn((2 * D, D))
            qk_w[:D] *= scale                      # fold attention scale into q rows
            v_w = np.eye(D, dtype=np.float32)
            bp["qkv"] = _prep_linear(np.concatenate([qk_w, v_w], axis=0), None)

            # positional pathway (parameter-only) precomputed once: Linear(3->H) + softmax
            pos_w = tn((H, 3))
            for h1 in range(ks):
                for h2 in range(ks):
                    position = h1 + ks * h2
                    pos_w[position, 2] = -1.0
                    pos_w[position, 1] = 2.0 * (h1 - center)
                    pos_w[position, 0] = 2.0 * (h2 - center)
            pos_w = pos_w * cfg["locality_strength"]
            pos_logits = (rel @ pos_w.T).reshape(N, N, H).transpose(2, 0, 1)  # (H, N, N)
            pos_logits = pos_logits - pos_logits.max(axis=-1, keepdims=True)
            e = np.exp(pos_logits)
            bp["pos_sm"] = jnp.asarray(e / e.sum(axis=-1, keepdims=True), jnp.float32)
            gating = np.ones((H,), np.float32)
            bp["gate"] = jnp.asarray(1.0 / (1.0 + np.exp(-gating)), jnp.float32)
        else:
            qkv_w = tn((3 * D, D))
            qkv_w[:D] *= scale                     # fold attention scale into q rows
            bp["qkv"] = _prep_linear(qkv_w, None)
        blocks.append(bp)
    params["blocks"] = blocks
    return params


# ----------------------------------------------------------------------------


if __name__ == "__main__":
    cfg = dict(
        img_size=16,
        patch_size=4,
        in_chans=3,
        num_classes=10,
        embed_dim=32,
        depth=4,
        num_heads=4,
        mlp_ratio=4.0,
        local_up_to_layer=2,
        locality_strength=1.0,
    )
    cfg["num_patches"] = (cfg["img_size"] // cfg["patch_size"]) ** 2

    key = jax.random.PRNGKey(0)
    k_x, k_p = jax.random.split(key)
    x = jax.random.normal(
        k_x, (2, cfg["in_chans"], cfg["img_size"], cfg["img_size"]), dtype=jnp.float32)
    params = init_params(k_p, cfg)

    fwd = jax.jit(functools.partial(vit_forward, cfg=cfg))
    logits = jax.block_until_ready(fwd(x, params))
    assert logits.shape == (2, cfg["num_classes"])
    assert bool(jnp.all(jnp.isfinite(logits)))
    print("KERNEL_OK")
</pallas_src>

<mosaic_0001>
module attributes {stable_mosaic.version = 11 : i64} {
  func.func @kernel(%arg0: i32, %arg1: i32, %arg2: memref<32x48xf32, #tpu.memory_space<vmem>>, %arg3: memref<48x128xbf16, #tpu.memory_space<vmem>>, %arg4: memref<1x128xf32, #tpu.memory_space<vmem>>, %arg5: memref<32x128xf32, #tpu.memory_space<vmem>>) attributes {dimension_semantics = [#tpu.dimension_semantics<parallel>, #tpu.dimension_semantics<parallel>], iteration_bounds = array<i64: 1, 1>, scalar_prefetch = 0 : i64, scratch_operands = 0 : i64, tpu.core_type = #tpu.core_type<tc>, window_params = [{transform_indices = @transform_0, window_bounds = array<i64: 32, 48>}, {transform_indices = @transform_1, window_bounds = array<i64: 48, 128>}, {transform_indices = @transform_2, window_bounds = array<i64: 1, 128>}, {transform_indices = @transform_3, window_bounds = array<i64: 32, 128>}]} {
    %c0 = arith.constant 0 : index
    %c0_0 = arith.constant 0 : index
    %0 = vector.load %arg2[%c0, %c0_0] : memref<32x48xf32, #tpu.memory_space<vmem>>, vector<32x48xf32>
    %1 = arith.truncf %0 : vector<32x48xf32> to vector<32x48xbf16>
    %c0_1 = arith.constant 0 : index
    %c0_2 = arith.constant 0 : index
    %2 = vector.load %arg3[%c0_1, %c0_2] : memref<48x128xbf16, #tpu.memory_space<vmem>>, vector<48x128xbf16>
    %cst = arith.constant dense<0.000000e+00> : vector<32x128xf32>
    %3 = tpu.matmul %1, %2, %cst {dimension_numbers = #tpu.dot_dimension_numbers<[1], [0], [0], [1], [0, 0, 1, 1], [], []>} : vector<32x48xbf16>, vector<48x128xbf16>, vector<32x128xf32> -> vector<32x128xf32>
    %c0_3 = arith.constant 0 : index
    %c0_4 = arith.constant 0 : index
    %4 = vector.load %arg4[%c0_3, %c0_4] : memref<1x128xf32, #tpu.memory_space<vmem>>, vector<1x128xf32>
    %5 = vector.broadcast %4 : vector<1x128xf32> to vector<32x128xf32>
    %6 = arith.addf %3, %5 : vector<32x128xf32>
    %c0_5 = arith.constant 0 : index
    %c0_6 = arith.constant 0 : index
    %7 = vector.load %arg5[%c0_5, %c0_6] : memref<32x128xf32, #tpu.memory_space<vmem>>, vector<32x128xf32>
    tpu.vector_store %arg5[%c0_5, %c0_6], %6 {strides = array<i32>} : memref<32x128xf32, #tpu.memory_space<vmem>>, vector<32x128xf32>,
    return
  }
  func.func @transform_0(%arg0: i32, %arg1: i32) -> (i32, i32) {
    %c0_i32 = arith.constant 0 : i32
    %c0_i32_0 = arith.constant 0 : i32
    return %arg0, %c0_i32 : i32, i32
  }
  func.func @transform_1(%arg0: i32, %arg1: i32) -> (i32, i32) {
    %c0_i32 = arith.constant 0 : i32
    %c0_i32_0 = arith.constant 0 : i32
    return %c0_i32, %arg1 : i32, i32
  }
  func.func @transform_2(%arg0: i32, %arg1: i32) -> (i32, i32) {
    %c0_i32 = arith.constant 0 : i32
    %c0_i32_0 = arith.constant 0 : i32
    return %c0_i32, %arg1 : i32, i32
  }
  func.func @transform_3(%arg0: i32, %arg1: i32) -> (i32, i32) {
    %c0_i32 = arith.constant 0 : i32
    return %arg0, %arg1 : i32, i32
  }
}

module attributes {stable_mosaic.version = 11 : i64} {
  func.func @_gpsa_kernel(%arg0: i32, %arg1: memref<1x16x96xbf16, #tpu.memory_space<vmem>>, %arg2: memref<4x16x16xf32, #tpu.memory_space<vmem>>, %arg3: memref<4xf32, #tpu.memory_space<smem>>, %arg4: memref<1x16x32xbf16, #tpu.memory_space<vmem>>) attributes {dimension_semantics = [#tpu.dimension_semantics<parallel>], iteration_bounds = array<i64: 2>, scalar_prefetch = 0 : i64, scratch_operands = 0 : i64, tpu.core_type = #tpu.core_type<tc>, window_params = [{transform_indices = @transform_0, window_bounds = array<i64: 1, 16, 96>}, {pipeline_mode = #tpu.pipeline_mode<synchronous>, transform_indices = @transform_1, window_bounds = array<i64: 4, 16, 16>}, {transform_indices = @transform_2, window_bounds = array<i64: 4>}, {transform_indices = @transform_3, window_bounds = array<i64: 1, 16, 32>}]} {
    %c0 = arith.constant 0 : index
    %c0_0 = arith.constant 0 : index
    %c0_1 = arith.constant 0 : index
    %0 = vector.load %arg1[%c0, %c0_0, %c0_1] : memref<1x16x96xbf16, #tpu.memory_space<vmem>>, vector<1x16x96xbf16>
    %1 = vector.shape_cast %0 : vector<1x16x96xbf16> to vector<16x96xbf16>
    %2 = vector.extract_strided_slice %1 {offsets = [0, 0], sizes = [16, 8], strides = [1, 1]} : vector<16x96xbf16> to vector<16x8xbf16>
    %3 = vector.extract_strided_slice %1 {offsets = [0, 32], sizes = [16, 8], strides = [1, 1]} : vector<16x96xbf16> to vector<16x8xbf16>
    %4 = vector.extract_strided_slice %1 {offsets = [0, 64], sizes = [16, 8], strides = [1, 1]} : vector<16x96xbf16> to vector<16x8xbf16>
    %cst = arith.constant dense<0.000000e+00> : vector<16x16xf32>
    %5 = tpu.matmul %2, %3, %cst {dimension_numbers = #tpu.dot_dimension_numbers<[1], [1], [0], [0], [0, 0, 1, 0], [], []>} : vector<16x8xbf16>, vector<16x8xbf16>, vector<16x16xf32> -> vector<16x16xf32>
    %cst_2 = arith.constant dense<0xFF800000> : vector<16xf32>
    %6 = vector.multi_reduction <maximumf>, %5, %cst_2 [1] : vector<16x16xf32> to vector<16xf32>
    %7 = vector.shape_cast %6 : vector<16xf32> to vector<16x1xf32>
    %8 = vector.broadcast %7 : vector<16x1xf32> to vector<16x16xf32>
    %9 = arith.subf %5, %8 : vector<16x16xf32>
    %10 = math.exp %9 : vector<16x16xf32>
    %cst_3 = arith.constant dense<0.000000e+00> : vector<16xf32>
    %11 = vector.multi_reduction <add>, %10, %cst_3 [1] : vector<16x16xf32> to vector<16xf32>
    %12 = vector.shape_cast %11 : vector<16xf32> to vector<16x1xf32>
    %13 = tpu.reciprocal %12 {approx = true} : vector<16x1xf32> -> vector<16x1xf32>
    %14 = vector.broadcast %13 : vector<16x1xf32> to vector<16x16xf32>
    %15 = arith.mulf %10, %14 : vector<16x16xf32>
    %c0_4 = arith.constant 0 : index
    %16 = memref.load %arg3[%c0_4] : memref<4xf32, #tpu.memory_space<smem>>
    %cst_5 = arith.constant 1.000000e+00 : f32
    %17 = arith.subf %cst_5, %16 : f32
    %18 = vector.broadcast %17 : f32 to vector<16x16xf32>
    %19 = arith.mulf %18, %15 : vector<16x16xf32>
    %c0_6 = arith.constant 0 : index
    %c0_7 = arith.constant 0 : index
    %c0_8 = arith.constant 0 : index
    %20 = vector.load %arg2[%c0_6, %c0_7, %c0_8] : memref<4x16x16xf32, #tpu.memory_space<vmem>>, vector<1x16x16xf32>
    %21 = vector.shape_cast %20 : vector<1x16x16xf32> to vector<16x16xf32>
    %22 = vector.broadcast %16 : f32 to vector<16x16xf32>
    %23 = arith.mulf %22, %21 : vector<16x16xf32>
    %24 = arith.addf %19, %23 : vector<16x16xf32>
    %cst_9 = arith.constant dense<0.000000e+00> : vector<16xf32>
    %25 = vector.multi_reduction <add>, %24, %cst_9 [1] : vector<16x16xf32> to vector<16xf32>
    %26 = vector.shape_cast %25 : vector<16xf32> to vector<16x1xf32>
    %27 = tpu.reciprocal %26 {approx = true} : vector<16x1xf32> -> vector<16x1xf32>
    %28 = vector.broadcast %27 : vector<16x1xf32> to vector<16x16xf32>
    %29 = arith.mulf %24, %28 : vector<16x16xf32>
    %30 = arith.truncf %29 : vector<16x16xf32> to vector<16x16xbf16>
    %cst_10 = arith.constant dense<0.000000e+00> : vector<16x8xf32>
    %31 = tpu.matmul %30, %4, %cst_10 {dimension_numbers = #tpu.dot_dimension_numbers<[1], [0], [0], [1], [0, 0, 1, 1], [], []>} : vector<16x16xbf16>, vector<16x8xbf16>, vector<16x8xf32> -> vector<16x8xf32>
    %32 = vector.extract_strided_slice %1 {offsets = [0, 8], sizes = [16, 8], strides = [1, 1]} : vector<16x96xbf16> to vector<16x8xbf16>
    %33 = vector.extract_strided_slice %1 {offsets = [0, 40], sizes = [16, 8], strides = [1, 1]} : vector<16x96xbf16> to vector<16x8xbf16>
    %34 = vector.extract_strided_slice %1 {offsets = [0, 72], sizes = [16, 8], strides = [1, 1]} : vector<16x96xbf16> to vector<16x8xbf16>
    %cst_11 = arith.constant dense<0.000000e+00> : vector<16x16xf32>
    %35 = tpu.matmul %32, %33, %cst_11 {dimension_numbers = #tpu.dot_dimension_numbers<[1], [1], [0], [0], [0, 0, 1, 0], [], []>} : vector<16x8xbf16>, vector<16x8xbf16>, vector<16x16xf32> -> vector<16x16xf32>
    %cst_12 = arith.constant dense<0xFF800000> : vector<16xf32>
    %36 = vector.multi_reduction <maximumf>, %35, %cst_12 [1] : vector<16x16xf32> to vector<16xf32>
    %37 = vector.shape_cast %36 : vector<16xf32> to vector<16x1xf32>
    %38 = vector.broadcast %37 : vector<16x1xf32> to vector<16x16xf32>
    %39 = arith.subf %35, %38 : vector<16x16xf32>
    %40 = math.exp %39 : vector<16x16xf32>
    %cst_13 = arith.constant dense<0.000000e+00> : vector<16xf32>
    %41 = vector.multi_reduction <add>, %40, %cst_13 [1] : vector<16x16xf32> to vector<16xf32>
    %42 = vector.shape_cast %41 : vector<16xf32> to vector<16x1xf32>
    %43 = tpu.reciprocal %42 {approx = true} : vector<16x1xf32> -> vector<16x1xf32>
    %44 = vector.broadcast %43 : vector<16x1xf32> to vector<16x16xf32>
    %45 = arith.mulf %40, %44 : vector<16x16xf32>
    %c1 = arith.constant 1 : index
    %46 = memref.load %arg3[%c1] : memref<4xf32, #tpu.memory_space<smem>>
    %cst_14 = arith.constant 1.000000e+00 : f32
    %47 = arith.subf %cst_14, %46 : f32
    %48 = vector.broadcast %47 : f32 to vector<16x16xf32>
    %49 = arith.mulf %48, %45 : vector<16x16xf32>
    %c1_15 = arith.constant 1 : index
    %c0_16 = arith.constant 0 : index
    %c0_17 = arith.constant 0 : index
    %50 = vector.load %arg2[%c1_15, %c0_16, %c0_17] : memref<4x16x16xf32, #tpu.memory_space<vmem>>, vector<1x16x16xf32>
    %51 = vector.shape_cast %50 : vector<1x16x16xf32> to vector<16x16xf32>
    %52 = vector.broadcast %46 : f32 to vector<16x16xf32>
    %53 = arith.mulf %52, %51 : vector<16x16xf32>
    %54 = arith.addf %49, %53 : vector<16x16xf32>
    %cst_18 = arith.constant dense<0.000000e+00> : vector<16xf32>
    %55 = vector.multi_reduction <add>, %54, %cst_18 [1] : vector<16x16xf32> to vector<16xf32>
    %56 = vector.shape_cast %55 : vector<16xf32> to vector<16x1xf32>
    %57 = tpu.reciprocal %56 {approx = true} : vector<16x1xf32> -> vector<16x1xf32>
    %58 = vector.broadcast %57 : vector<16x1xf32> to vector<16x16xf32>
    %59 = arith.mulf %54, %58 : vector<16x16xf32>
    %60 = arith.truncf %59 : vector<16x16xf32> to vector<16x16xbf16>
    %cst_19 = arith.constant dense<0.000000e+00> : vector<16x8xf32>
    %61 = tpu.matmul %60, %34, %cst_19 {dimension_numbers = #tpu.dot_dimension_numbers<[1], [0], [0], [1], [0, 0, 1, 1], [], []>} : vector<16x16xbf16>, vector<16x8xbf16>, vector<16x8xf32> -> vector<16x8xf32>
    %62 = vector.extract_strided_slice %1 {offsets = [0, 16], sizes = [16, 8], strides = [1, 1]} : vector<16x96xbf16> to vector<16x8xbf16>
    %63 = vector.extract_strided_slice %1 {offsets = [0, 48], sizes = [16, 8], strides = [1, 1]} : vector<16x96xbf16> to vector<16x8xbf16>
    %64 = vector.extract_strided_slice %1 {offsets = [0, 80], sizes = [16, 8], strides = [1, 1]} : vector<16x96xbf16> to vector<16x8xbf16>
    %cst_20 = arith.constant dense<0.000000e+00> : vector<16x16xf32>
    %65 = tpu.matmul %62, %63, %cst_20 {dimension_numbers = #tpu.dot_dimension_numbers<[1], [1], [0], [0], [0, 0, 1, 0], [], []>} : vector<16x8xbf16>, vector<16x8xbf16>, vector<16x16xf32> -> vector<16x16xf32>
    %cst_21 = arith.constant dense<0xFF800000> : vector<16xf32>
    %66 = vector.multi_reduction <maximumf>, %65, %cst_21 [1] : vector<16x16xf32> to vector<16xf32>
    %67 = vector.shape_cast %66 : vector<16xf32> to vector<16x1xf32>
    %68 = vector.broadcast %67 : vector<16x1xf32> to vector<16x16xf32>
    %69 = arith.subf %65, %68 : vector<16x16xf32>
    %70 = math.exp %69 : vector<16x16xf32>
    %cst_22 = arith.constant dense<0.000000e+00> : vector<16xf32>
    %71 = vector.multi_reduction <add>, %70, %cst_22 [1] : vector<16x16xf32> to vector<16xf32>
    %72 = vector.shape_cast %71 : vector<16xf32> to vector<16x1xf32>
    %73 = tpu.reciprocal %72 {approx = true} : vector<16x1xf32> -> vector<16x1xf32>
    %74 = vector.broadcast %73 : vector<16x1xf32> to vector<16x16xf32>
    %75 = arith.mulf %70, %74 : vector<16x16xf32>
    %c2 = arith.constant 2 : index
    %76 = memref.load %arg3[%c2] : memref<4xf32, #tpu.memory_space<smem>>
    %cst_23 = arith.constant 1.000000e+00 : f32
    %77 = arith.subf %cst_23, %76 : f32
    %78 = vector.broadcast %77 : f32 to vector<16x16xf32>
    %79 = arith.mulf %78, %75 : vector<16x16xf32>
    %c2_24 = arith.constant 2 : index
    %c0_25 = arith.constant 0 : index
    %c0_26 = arith.constant 0 : index
    %80 = vector.load %arg2[%c2_24, %c0_25, %c0_26] : memref<4x16x16xf32, #tpu.memory_space<vmem>>, vector<1x16x16xf32>
    %81 = vector.shape_cast %80 : vector<1x16x16xf32> to vector<16x16xf32>
    %82 = vector.broadcast %76 : f32 to vector<16x16xf32>
    %83 = arith.mulf %82, %81 : vector<16x16xf32>
    %84 = arith.addf %79, %83 : vector<16x16xf32>
    %cst_27 = arith.constant dense<0.000000e+00> : vector<16xf32>
    %85 = vector.multi_reduction <add>, %84, %cst_27 [1] : vector<16x16xf32> to vector<16xf32>
    %86 = vector.shape_cast %85 : vector<16xf32> to vector<16x1xf32>
    %87 = tpu.reciprocal %86 {approx = true} : vector<16x1xf32> -> vector<16x1xf32>
    %88 = vector.broadcast %87 : vector<16x1xf32> to vector<16x16xf32>
    %89 = arith.mulf %84, %88 : vector<16x16xf32>
    %90 = arith.truncf %89 : vector<16x16xf32> to vector<16x16xbf16>
    %cst_28 = arith.constant dense<0.000000e+00> : vector<16x8xf32>
    %91 = tpu.matmul %90, %64, %cst_28 {dimension_numbers = #tpu.dot_dimension_numbers<[1], [0], [0], [1], [0, 0, 1, 1], [], []>} : vector<16x16xbf16>, vector<16x8xbf16>, vector<16x8xf32> -> vector<16x8xf32>
    %92 = vector.extract_strided_slice %1 {offsets = [0, 24], sizes = [16, 8], strides = [1, 1]} : vector<16x96xbf16> to vector<16x8xbf16>
    %93 = vector.extract_strided_slice %1 {offsets = [0, 56], sizes = [16, 8], strides = [1, 1]} : vector<16x96xbf16> to vector<16x8xbf16>
    %94 = vector.extract_strided_slice %1 {offsets = [0, 88], sizes = [16, 8], strides = [1, 1]} : vector<16x96xbf16> to vector<16x8xbf16>
    %cst_29 = arith.constant dense<0.000000e+00> : vector<16x16xf32>
    %95 = tpu.matmul %92, %93, %cst_29 {dimension_numbers = #tpu.dot_dimension_numbers<[1], [1], [0], [0], [0, 0, 1, 0], [], []>} : vector<16x8xbf16>, vector<16x8xbf16>, vector<16x16xf32> -> vector<16x16xf32>
    %cst_30 = arith.constant dense<0xFF800000> : vector<16xf32>
    %96 = vector.multi_reduction <maximumf>, %95, %cst_30 [1] : vector<16x16xf32> to vector<16xf32>
    %97 = vector.shape_cast %96 : vector<16xf32> to vector<16x1xf32>
    %98 = vector.broadcast %97 : vector<16x1xf32> to vector<16x16xf32>
    %99 = arith.subf %95, %98 : vector<16x16xf32>
    %100 = math.exp %99 : vector<16x16xf32>
    %cst_31 = arith.constant dense<0.000000e+00> : vector<16xf32>
    %101 = vector.multi_reduction <add>, %100, %cst_31 [1] : vector<16x16xf32> to vector<16xf32>
    %102 = vector.shape_cast %101 : vector<16xf32> to vector<16x1xf32>
    %103 = tpu.reciprocal %102 {approx = true} : vector<16x1xf32> -> vector<16x1xf32>
    %104 = vector.broadcast %103 : vector<16x1xf32> to vector<16x16xf32>
    %105 = arith.mulf %100, %104 : vector<16x16xf32>
    %c3 = arith.constant 3 : index
    %106 = memref.load %arg3[%c3] : memref<4xf32, #tpu.memory_space<smem>>
    %cst_32 = arith.constant 1.000000e+00 : f32
    %107 = arith.subf %cst_32, %106 : f32
    %108 = vector.broadcast %107 : f32 to vector<16x16xf32>
    %109 = arith.mulf %108, %105 : vector<16x16xf32>
    %c3_33 = arith.constant 3 : index
    %c0_34 = arith.constant 0 : index
    %c0_35 = arith.constant 0 : index
    %110 = vector.load %arg2[%c3_33, %c0_34, %c0_35] : memref<4x16x16xf32, #tpu.memory_space<vmem>>, vector<1x16x16xf32>
    %111 = vector.shape_cast %110 : vector<1x16x16xf32> to vector<16x16xf32>
    %112 = vector.broadcast %106 : f32 to vector<16x16xf32>
    %113 = arith.mulf %112, %111 : vector<16x16xf32>
    %114 = arith.addf %109, %113 : vector<16x16xf32>
    %cst_36 = arith.constant dense<0.000000e+00> : vector<16xf32>
    %115 = vector.multi_reduction <add>, %114, %cst_36 [1] : vector<16x16xf32> to vector<16xf32>
    %116 = vector.shape_cast %115 : vector<16xf32> to vector<16x1xf32>
    %117 = tpu.reciprocal %116 {approx = true} : vector<16x1xf32> -> vector<16x1xf32>
    %118 = vector.broadcast %117 : vector<16x1xf32> to vector<16x16xf32>
    %119 = arith.mulf %114, %118 : vector<16x16xf32>
    %120 = arith.truncf %119 : vector<16x16xf32> to vector<16x16xbf16>
    %cst_37 = arith.constant dense<0.000000e+00> : vector<16x8xf32>
    %121 = tpu.matmul %120, %94, %cst_37 {dimension_numbers = #tpu.dot_dimension_numbers<[1], [0], [0], [1], [0, 0, 1, 1], [], []>} : vector<16x16xbf16>, vector<16x8xbf16>, vector<16x8xf32> -> vector<16x8xf32>
    %122 = tpu.concatenate %31, %61, %91, %121 in 1 : vector<16x8xf32>, vector<16x8xf32>, vector<16x8xf32>, vector<16x8xf32> -> vector<16x32xf32>
    %123 = arith.truncf %122 : vector<16x32xf32> to vector<16x32xbf16>
    %c0_38 = arith.constant 0 : index
    %c0_39 = arith.constant 0 : index
    %c0_40 = arith.constant 0 : index
    %124 = vector.load %arg4[%c0_38, %c0_39, %c0_40] : memref<1x16x32xbf16, #tpu.memory_space<vmem>>, vector<1x16x32xbf16>
    %125 = vector.shape_cast %124 : vector<1x16x32xbf16> to vector<16x32xbf16>
    %126 = vector.shape_cast %123 : vector<16x32xbf16> to vector<1x16x32xbf16>
    tpu.vector_store %arg4[%c0_38, %c0_39, %c0_40], %126 {strides = array<i32>} : memref<1x16x32xbf16, #tpu.memory_space<vmem>>, vector<1x16x32xbf16>,
    return
  }
  func.func @transform_0(%arg0: i32) -> (i32, i32, i32) {
    %c0_i32 = arith.constant 0 : i32
    %c0_i32_0 = arith.constant 0 : i32
    %c0_i32_1 = arith.constant 0 : i32
    return %arg0, %c0_i32, %c0_i32_0 : i32, i32, i32
  }
  func.func @transform_1(%arg0: i32) -> (i32, i32, i32) {
    %c0_i32 = arith.constant 0 : i32
    %c0_i32_0 = arith.constant 0 : i32
    %c0_i32_1 = arith.constant 0 : i32
    %c0_i32_2 = arith.constant 0 : i32
    return %c0_i32, %c0_i32_0, %c0_i32_1 : i32, i32, i32
  }
  func.func @transform_2(%arg0: i32) -> i32 {
    %c0_i32 = arith.constant 0 : i32
    %c0_i32_0 = arith.constant 0 : i32
    return %c0_i32 : i32
  }
  func.func @transform_3(%arg0: i32) -> (i32, i32, i32) {
    %c0_i32 = arith.constant 0 : i32
    %c0_i32_0 = arith.constant 0 : i32
    %c0_i32_1 = arith.constant 0 : i32
    return %arg0, %c0_i32, %c0_i32_0 : i32, i32, i32
  }
}

module attributes {stable_mosaic.version = 11 : i64} {
  func.func @kernel(%arg0: i32, %arg1: i32, %arg2: memref<32x32xf32, #tpu.memory_space<vmem>>, %arg3: memref<32x128xbf16, #tpu.memory_space<vmem>>, %arg4: memref<1x32xf32, #tpu.memory_space<vmem>>, %arg5: memref<1x32xf32, #tpu.memory_space<vmem>>, %arg6: memref<32x128xbf16, #tpu.memory_space<vmem>>) attributes {dimension_semantics = [#tpu.dimension_semantics<parallel>, #tpu.dimension_semantics<parallel>], iteration_bounds = array<i64: 1, 1>, scalar_prefetch = 0 : i64, scratch_operands = 0 : i64, tpu.core_type = #tpu.core_type<tc>, window_params = [{transform_indices = @transform_0, window_bounds = array<i64: 32, 32>}, {transform_indices = @transform_1, window_bounds = array<i64: 32, 128>}, {pipeline_mode = #tpu.pipeline_mode<synchronous>, transform_indices = @transform_2, window_bounds = array<i64: 1, 32>}, {pipeline_mode = #tpu.pipeline_mode<synchronous>, transform_indices = @transform_3, window_bounds = array<i64: 1, 32>}, {transform_indices = @transform_4, window_bounds = array<i64: 32, 128>}]} {
    %c0 = arith.constant 0 : index
    %c0_0 = arith.constant 0 : index
    %0 = vector.load %arg2[%c0, %c0_0] : memref<32x32xf32, #tpu.memory_space<vmem>>, vector<32x32xf32>
    %cst = arith.constant dense<0.000000e+00> : vector<32xf32>
    %1 = vector.multi_reduction <add>, %0, %cst [1] : vector<32x32xf32> to vector<32xf32>
    %2 = vector.shape_cast %1 : vector<32xf32> to vector<32x1xf32>
    %cst_1 = arith.constant 3.200000e+01 : f32
    %3 = vector.broadcast %cst_1 : f32 to vector<32x1xf32>
    %4 = arith.divf %2, %3 : vector<32x1xf32>
    %5 = vector.broadcast %4 : vector<32x1xf32> to vector<32x32xf32>
    %6 = arith.subf %0, %5 : vector<32x32xf32>
    %7 = arith.mulf %6, %6 : vector<32x32xf32>
    %cst_2 = arith.constant dense<0.000000e+00> : vector<32xf32>
    %8 = vector.multi_reduction <add>, %7, %cst_2 [1] : vector<32x32xf32> to vector<32xf32>
    %9 = vector.shape_cast %8 : vector<32xf32> to vector<32x1xf32>
    %cst_3 = arith.constant 3.200000e+01 : f32
    %10 = vector.broadcast %cst_3 : f32 to vector<32x1xf32>
    %11 = arith.divf %9, %10 : vector<32x1xf32>
    %12 = vector.broadcast %4 : vector<32x1xf32> to vector<32x32xf32>
    %13 = arith.subf %0, %12 : vector<32x32xf32>
    %cst_4 = arith.constant 9.99999974E-6 : f32
    %14 = vector.broadcast %cst_4 : f32 to vector<32x1xf32>
    %15 = arith.addf %11, %14 : vector<32x1xf32>
    %16 = math.rsqrt %15 : vector<32x1xf32>
    %17 = vector.broadcast %16 : vector<32x1xf32> to vector<32x32xf32>
    %18 = arith.mulf %13, %17 : vector<32x32xf32>
    %c0_5 = arith.constant 0 : index
    %c0_6 = arith.constant 0 : index
    %19 = vector.load %arg4[%c0_5, %c0_6] : memref<1x32xf32, #tpu.memory_space<vmem>>, vector<1x32xf32>
    %20 = vector.broadcast %19 : vector<1x32xf32> to vector<32x32xf32>
    %21 = arith.mulf %18, %20 : vector<32x32xf32>
    %c0_7 = arith.constant 0 : index
    %c0_8 = arith.constant 0 : index
    %22 = vector.load %arg5[%c0_7, %c0_8] : memref<1x32xf32, #tpu.memory_space<vmem>>, vector<1x32xf32>
    %23 = vector.broadcast %22 : vector<1x32xf32> to vector<32x32xf32>
    %24 = arith.addf %21, %23 : vector<32x32xf32>
    %25 = arith.truncf %24 : vector<32x32xf32> to vector<32x32xbf16>
    %c0_9 = arith.constant 0 : index
    %c0_10 = arith.constant 0 : index
    %26 = vector.load %arg3[%c0_9, %c0_10] : memref<32x128xbf16, #tpu.memory_space<vmem>>, vector<32x128xbf16>
    %cst_11 = arith.constant dense<0.000000e+00> : vector<32x128xf32>
    %27 = tpu.matmul %25, %26, %cst_11 {dimension_numbers = #tpu.dot_dimension_numbers<[1], [0], [0], [1], [0, 0, 1, 1], [], []>} : vector<32x32xbf16>, vector<32x128xbf16>, vector<32x128xf32> -> vector<32x128xf32>
    %28 = arith.truncf %27 : vector<32x128xf32> to vector<32x128xbf16>
    %c0_12 = arith.constant 0 : index
    %c0_13 = arith.constant 0 : index
    %29 = vector.load %arg6[%c0_12, %c0_13] : memref<32x128xbf16, #tpu.memory_space<vmem>>, vector<32x128xbf16>
    tpu.vector_store %arg6[%c0_12, %c0_13], %28 {strides = array<i32>} : memref<32x128xbf16, #tpu.memory_space<vmem>>, vector<32x128xbf16>,
    return
  }
  func.func @transform_0(%arg0: i32, %arg1: i32) -> (i32, i32) {
    %c0_i32 = arith.constant 0 : i32
    %c0_i32_0 = arith.constant 0 : i32
    return %arg0, %c0_i32 : i32, i32
  }
  func.func @transform_1(%arg0: i32, %arg1: i32) -> (i32, i32) {
    %c0_i32 = arith.constant 0 : i32
    %c0_i32_0 = arith.constant 0 : i32
    return %c0_i32, %arg1 : i32, i32
  }
  func.func @transform_2(%arg0: i32, %arg1: i32) -> (i32, i32) {
    %c0_i32 = arith.constant 0 : i32
    %c0_i32_0 = arith.constant 0 : i32
    %c0_i32_1 = arith.constant 0 : i32
    return %c0_i32, %c0_i32_0 : i32, i32
  }
  func.func @transform_3(%arg0: i32, %arg1: i32) -> (i32, i32) {
    %c0_i32 = arith.constant 0 : i32
    %c0_i32_0 = arith.constant 0 : i32
    %c0_i32_1 = arith.constant 0 : i32
    return %c0_i32, %c0_i32_0 : i32, i32
  }
  func.func @transform_4(%arg0: i32, %arg1: i32) -> (i32, i32) {
    %c0_i32 = arith.constant 0 : i32
    return %arg0, %arg1 : i32, i32
  }
}

module attributes {stable_mosaic.version = 11 : i64} {
  func.func @kernel(%arg0: i32, %arg1: i32, %arg2: memref<32x32xbf16, #tpu.memory_space<vmem>>, %arg3: memref<32x128xbf16, #tpu.memory_space<vmem>>, %arg4: memref<1x128xf32, #tpu.memory_space<vmem>>, %arg5: memref<32x128xf32, #tpu.memory_space<vmem>>, %arg6: memref<32x128xf32, #tpu.memory_space<vmem>>) attributes {dimension_semantics = [#tpu.dimension_semantics<parallel>, #tpu.dimension_semantics<parallel>], iteration_bounds = array<i64: 1, 1>, scalar_prefetch = 0 : i64, scratch_operands = 0 : i64, tpu.core_type = #tpu.core_type<tc>, window_params = [{transform_indices = @transform_0, window_bounds = array<i64: 32, 32>}, {transform_indices = @transform_1, window_bounds = array<i64: 32, 128>}, {transform_indices = @transform_2, window_bounds = array<i64: 1, 128>}, {transform_indices = @transform_3, window_bounds = array<i64: 32, 128>}, {transform_indices = @transform_4, window_bounds = array<i64: 32, 128>}]} {
    %c0 = arith.constant 0 : index
    %c0_0 = arith.constant 0 : index
    %0 = vector.load %arg2[%c0, %c0_0] : memref<32x32xbf16, #tpu.memory_space<vmem>>, vector<32x32xbf16>
    %c0_1 = arith.constant 0 : index
    %c0_2 = arith.constant 0 : index
    %1 = vector.load %arg3[%c0_1, %c0_2] : memref<32x128xbf16, #tpu.memory_space<vmem>>, vector<32x128xbf16>
    %cst = arith.constant dense<0.000000e+00> : vector<32x128xf32>
    %2 = tpu.matmul %0, %1, %cst {dimension_numbers = #tpu.dot_dimension_numbers<[1], [0], [0], [1], [0, 0, 1, 1], [], []>} : vector<32x32xbf16>, vector<32x128xbf16>, vector<32x128xf32> -> vector<32x128xf32>
    %c0_3 = arith.constant 0 : index
    %c0_4 = arith.constant 0 : index
    %3 = vector.load %arg4[%c0_3, %c0_4] : memref<1x128xf32, #tpu.memory_space<vmem>>, vector<1x128xf32>
    %4 = vector.broadcast %3 : vector<1x128xf32> to vector<32x128xf32>
    %5 = arith.addf %2, %4 : vector<32x128xf32>
    %c0_5 = arith.constant 0 : index
    %c0_6 = arith.constant 0 : index
    %6 = vector.load %arg5[%c0_5, %c0_6] : memref<32x128xf32, #tpu.memory_space<vmem>>, vector<32x128xf32>
    %7 = arith.addf %5, %6 : vector<32x128xf32>
    %c0_7 = arith.constant 0 : index
    %c0_8 = arith.constant 0 : index
    %8 = vector.load %arg6[%c0_7, %c0_8] : memref<32x128xf32, #tpu.memory_space<vmem>>, vector<32x128xf32>
    tpu.vector_store %arg6[%c0_7, %c0_8], %7 {strides = array<i32>} : memref<32x128xf32, #tpu.memory_space<vmem>>, vector<32x128xf32>,
    return
  }
  func.func @transform_0(%arg0: i32, %arg1: i32) -> (i32, i32) {
    %c0_i32 = arith.constant 0 : i32
    %c0_i32_0 = arith.constant 0 : i32
    return %arg0, %c0_i32 : i32, i32
  }
  func.func @transform_1(%arg0: i32, %arg1: i32) -> (i32, i32) {
    %c0_i32 = arith.constant 0 : i32
    %c0_i32_0 = arith.constant 0 : i32
    return %c0_i32, %arg1 : i32, i32
  }
  func.func @transform_2(%arg0: i32, %arg1: i32) -> (i32, i32) {
    %c0_i32 = arith.constant 0 : i32
    %c0_i32_0 = arith.constant 0 : i32
    return %c0_i32, %arg1 : i32, i32
  }
  func.func @transform_3(%arg0: i32, %arg1: i32) -> (i32, i32) {
    %c0_i32 = arith.constant 0 : i32
    return %arg0, %arg1 : i32, i32
  }
  func.func @transform_4(%arg0: i32, %arg1: i32) -> (i32, i32) {
    %c0_i32 = arith.constant 0 : i32
    return %arg0, %arg1 : i32, i32
  }
}

module attributes {stable_mosaic.version = 11 : i64} {
  func.func @kernel(%arg0: i32, %arg1: i32, %arg2: memref<32x128xbf16, #tpu.memory_space<vmem>>, %arg3: memref<128x128xbf16, #tpu.memory_space<vmem>>, %arg4: memref<1x128xf32, #tpu.memory_space<vmem>>, %arg5: memref<32x128xf32, #tpu.memory_space<vmem>>, %arg6: memref<32x128xf32, #tpu.memory_space<vmem>>) attributes {dimension_semantics = [#tpu.dimension_semantics<parallel>, #tpu.dimension_semantics<parallel>], iteration_bounds = array<i64: 1, 1>, scalar_prefetch = 0 : i64, scratch_operands = 0 : i64, tpu.core_type = #tpu.core_type<tc>, window_params = [{transform_indices = @transform_0, window_bounds = array<i64: 32, 128>}, {transform_indices = @transform_1, window_bounds = array<i64: 128, 128>}, {transform_indices = @transform_2, window_bounds = array<i64: 1, 128>}, {transform_indices = @transform_3, window_bounds = array<i64: 32, 128>}, {transform_indices = @transform_4, window_bounds = array<i64: 32, 128>}]} {
    %c0 = arith.constant 0 : index
    %c0_0 = arith.constant 0 : index
    %0 = vector.load %arg2[%c0, %c0_0] : memref<32x128xbf16, #tpu.memory_space<vmem>>, vector<32x128xbf16>
    %c0_1 = arith.constant 0 : index
    %c0_2 = arith.constant 0 : index
    %1 = vector.load %arg3[%c0_1, %c0_2] : memref<128x128xbf16, #tpu.memory_space<vmem>>, vector<128x128xbf16>
    %cst = arith.constant dense<0.000000e+00> : vector<32x128xf32>
    %2 = tpu.matmul %0, %1, %cst {dimension_numbers = #tpu.dot_dimension_numbers<[1], [0], [0], [1], [0, 0, 1, 1], [], []>} : vector<32x128xbf16>, vector<128x128xbf16>, vector<32x128xf32> -> vector<32x128xf32>
    %c0_3 = arith.constant 0 : index
    %c0_4 = arith.constant 0 : index
    %3 = vector.load %arg4[%c0_3, %c0_4] : memref<1x128xf32, #tpu.memory_space<vmem>>, vector<1x128xf32>
    %4 = vector.broadcast %3 : vector<1x128xf32> to vector<32x128xf32>
    %5 = arith.addf %2, %4 : vector<32x128xf32>
    %c0_5 = arith.constant 0 : index
    %c0_6 = arith.constant 0 : index
    %6 = vector.load %arg5[%c0_5, %c0_6] : memref<32x128xf32, #tpu.memory_space<vmem>>, vector<32x128xf32>
    %7 = arith.addf %5, %6 : vector<32x128xf32>
    %c0_7 = arith.constant 0 : index
    %c0_8 = arith.constant 0 : index
    %8 = vector.load %arg6[%c0_7, %c0_8] : memref<32x128xf32, #tpu.memory_space<vmem>>, vector<32x128xf32>
    tpu.vector_store %arg6[%c0_7, %c0_8], %7 {strides = array<i32>} : memref<32x128xf32, #tpu.memory_space<vmem>>, vector<32x128xf32>,
    return
  }
  func.func @transform_0(%arg0: i32, %arg1: i32) -> (i32, i32) {
    %c0_i32 = arith.constant 0 : i32
    %c0_i32_0 = arith.constant 0 : i32
    return %arg0, %c0_i32 : i32, i32
  }
  func.func @transform_1(%arg0: i32, %arg1: i32) -> (i32, i32) {
    %c0_i32 = arith.constant 0 : i32
    %c0_i32_0 = arith.constant 0 : i32
    return %c0_i32, %arg1 : i32, i32
  }
  func.func @transform_2(%arg0: i32, %arg1: i32) -> (i32, i32) {
    %c0_i32 = arith.constant 0 : i32
    %c0_i32_0 = arith.constant 0 : i32
    return %c0_i32, %arg1 : i32, i32
  }
  func.func @transform_3(%arg0: i32, %arg1: i32) -> (i32, i32) {
    %c0_i32 = arith.constant 0 : i32
    return %arg0, %arg1 : i32, i32
  }
  func.func @transform_4(%arg0: i32, %arg1: i32) -> (i32, i32) {
    %c0_i32 = arith.constant 0 : i32
    return %arg0, %arg1 : i32, i32
  }
}

module attributes {stable_mosaic.version = 11 : i64} {
  func.func @kernel(%arg0: i32, %arg1: i32, %arg2: memref<32x32xf32, #tpu.memory_space<vmem>>, %arg3: memref<32x128xbf16, #tpu.memory_space<vmem>>, %arg4: memref<1x128xf32, #tpu.memory_space<vmem>>, %arg5: memref<1x32xf32, #tpu.memory_space<vmem>>, %arg6: memref<1x32xf32, #tpu.memory_space<vmem>>, %arg7: memref<32x128xbf16, #tpu.memory_space<vmem>>) attributes {dimension_semantics = [#tpu.dimension_semantics<parallel>, #tpu.dimension_semantics<parallel>], iteration_bounds = array<i64: 1, 1>, scalar_prefetch = 0 : i64, scratch_operands = 0 : i64, tpu.core_type = #tpu.core_type<tc>, window_params = [{transform_indices = @transform_0, window_bounds = array<i64: 32, 32>}, {transform_indices = @transform_1, window_bounds = array<i64: 32, 128>}, {transform_indices = @transform_2, window_bounds = array<i64: 1, 128>}, {pipeline_mode = #tpu.pipeline_mode<synchronous>, transform_indices = @transform_3, window_bounds = array<i64: 1, 32>}, {pipeline_mode = #tpu.pipeline_mode<synchronous>, transform_indices = @transform_4, window_bounds = array<i64: 1, 32>}, {transform_indices = @transform_5, window_bounds = array<i64: 32, 128>}]} {
    %c0 = arith.constant 0 : index
    %c0_0 = arith.constant 0 : index
    %0 = vector.load %arg2[%c0, %c0_0] : memref<32x32xf32, #tpu.memory_space<vmem>>, vector<32x32xf32>
    %cst = arith.constant dense<0.000000e+00> : vector<32xf32>
    %1 = vector.multi_reduction <add>, %0, %cst [1] : vector<32x32xf32> to vector<32xf32>
    %2 = vector.shape_cast %1 : vector<32xf32> to vector<32x1xf32>
    %cst_1 = arith.constant 3.200000e+01 : f32
    %3 = vector.broadcast %cst_1 : f32 to vector<32x1xf32>
    %4 = arith.divf %2, %3 : vector<32x1xf32>
    %5 = vector.broadcast %4 : vector<32x1xf32> to vector<32x32xf32>
    %6 = arith.subf %0, %5 : vector<32x32xf32>
    %7 = arith.mulf %6, %6 : vector<32x32xf32>
    %cst_2 = arith.constant dense<0.000000e+00> : vector<32xf32>
    %8 = vector.multi_reduction <add>, %7, %cst_2 [1] : vector<32x32xf32> to vector<32xf32>
    %9 = vector.shape_cast %8 : vector<32xf32> to vector<32x1xf32>
    %cst_3 = arith.constant 3.200000e+01 : f32
    %10 = vector.broadcast %cst_3 : f32 to vector<32x1xf32>
    %11 = arith.divf %9, %10 : vector<32x1xf32>
    %12 = vector.broadcast %4 : vector<32x1xf32> to vector<32x32xf32>
    %13 = arith.subf %0, %12 : vector<32x32xf32>
    %cst_4 = arith.constant 9.99999974E-6 : f32
    %14 = vector.broadcast %cst_4 : f32 to vector<32x1xf32>
    %15 = arith.addf %11, %14 : vector<32x1xf32>
    %16 = math.rsqrt %15 : vector<32x1xf32>
    %17 = vector.broadcast %16 : vector<32x1xf32> to vector<32x32xf32>
    %18 = arith.mulf %13, %17 : vector<32x32xf32>
    %c0_5 = arith.constant 0 : index
    %c0_6 = arith.constant 0 : index
    %19 = vector.load %arg5[%c0_5, %c0_6] : memref<1x32xf32, #tpu.memory_space<vmem>>, vector<1x32xf32>
    %20 = vector.broadcast %19 : vector<1x32xf32> to vector<32x32xf32>
    %21 = arith.mulf %18, %20 : vector<32x32xf32>
    %c0_7 = arith.constant 0 : index
    %c0_8 = arith.constant 0 : index
    %22 = vector.load %arg6[%c0_7, %c0_8] : memref<1x32xf32, #tpu.memory_space<vmem>>, vector<1x32xf32>
    %23 = vector.broadcast %22 : vector<1x32xf32> to vector<32x32xf32>
    %24 = arith.addf %21, %23 : vector<32x32xf32>
    %25 = arith.truncf %24 : vector<32x32xf32> to vector<32x32xbf16>
    %c0_9 = arith.constant 0 : index
    %c0_10 = arith.constant 0 : index
    %26 = vector.load %arg3[%c0_9, %c0_10] : memref<32x128xbf16, #tpu.memory_space<vmem>>, vector<32x128xbf16>
    %cst_11 = arith.constant dense<0.000000e+00> : vector<32x128xf32>
    %27 = tpu.matmul %25, %26, %cst_11 {dimension_numbers = #tpu.dot_dimension_numbers<[1], [0], [0], [1], [0, 0, 1, 1], [], []>} : vector<32x32xbf16>, vector<32x128xbf16>, vector<32x128xf32> -> vector<32x128xf32>
    %c0_12 = arith.constant 0 : index
    %c0_13 = arith.constant 0 : index
    %28 = vector.load %arg4[%c0_12, %c0_13] : memref<1x128xf32, #tpu.memory_space<vmem>>, vector<1x128xf32>
    %29 = vector.broadcast %28 : vector<1x128xf32> to vector<32x128xf32>
    %30 = arith.addf %27, %29 : vector<32x128xf32>
    %cst_14 = arith.constant 5.000000e-01 : f32
    %31 = vector.broadcast %cst_14 : f32 to vector<32x128xf32>
    %32 = arith.mulf %31, %30 : vector<32x128xf32>
    %cst_15 = arith.constant 0.707106769 : f32
    %33 = vector.broadcast %cst_15 : f32 to vector<32x128xf32>
    %34 = arith.mulf %30, %33 : vector<32x128xf32>
    %35 = math.erf %34 : vector<32x128xf32>
    %cst_16 = arith.constant 1.000000e+00 : f32
    %36 = vector.broadcast %cst_16 : f32 to vector<32x128xf32>
    %37 = arith.addf %36, %35 : vector<32x128xf32>
    %38 = arith.mulf %32, %37 : vector<32x128xf32>
    %39 = arith.truncf %38 : vector<32x128xf32> to vector<32x128xbf16>
    %c0_17 = arith.constant 0 : index
    %c0_18 = arith.constant 0 : index
    %40 = vector.load %arg7[%c0_17, %c0_18] : memref<32x128xbf16, #tpu.memory_space<vmem>>, vector<32x128xbf16>
    tpu.vector_store %arg7[%c0_17, %c0_18], %39 {strides = array<i32>} : memref<32x128xbf16, #tpu.memory_space<vmem>>, vector<32x128xbf16>,
    return
  }
  func.func @transform_0(%arg0: i32, %arg1: i32) -> (i32, i32) {
    %c0_i32 = arith.constant 0 : i32
    %c0_i32_0 = arith.constant 0 : i32
    return %arg0, %c0_i32 : i32, i32
  }
  func.func @transform_1(%arg0: i32, %arg1: i32) -> (i32, i32) {
    %c0_i32 = arith.constant 0 : i32
    %c0_i32_0 = arith.constant 0 : i32
    return %c0_i32, %arg1 : i32, i32
  }
  func.func @transform_2(%arg0: i32, %arg1: i32) -> (i32, i32) {
    %c0_i32 = arith.constant 0 : i32
    %c0_i32_0 = arith.constant 0 : i32
    return %c0_i32, %arg1 : i32, i32
  }
  func.func @transform_3(%arg0: i32, %arg1: i32) -> (i32, i32) {
    %c0_i32 = arith.constant 0 : i32
    %c0_i32_0 = arith.constant 0 : i32
    %c0_i32_1 = arith.constant 0 : i32
    return %c0_i32, %c0_i32_0 : i32, i32
  }
  func.func @transform_4(%arg0: i32, %arg1: i32) -> (i32, i32) {
    %c0_i32 = arith.constant 0 : i32
    %c0_i32_0 = arith.constant 0 : i32
    %c0_i32_1 = arith.constant 0 : i32
    return %c0_i32, %c0_i32_0 : i32, i32
  }
  func.func @transform_5(%arg0: i32, %arg1: i32) -> (i32, i32) {
    %c0_i32 = arith.constant 0 : i32
    return %arg0, %arg1 : i32, i32
  }
}

module attributes {stable_mosaic.version = 11 : i64} {
  func.func @kernel(%arg0: i32, %arg1: i32, %arg2: memref<34x32xf32, #tpu.memory_space<vmem>>, %arg3: memref<32x128xbf16, #tpu.memory_space<vmem>>, %arg4: memref<1x32xf32, #tpu.memory_space<vmem>>, %arg5: memref<1x32xf32, #tpu.memory_space<vmem>>, %arg6: memref<34x128xbf16, #tpu.memory_space<vmem>>) attributes {dimension_semantics = [#tpu.dimension_semantics<parallel>, #tpu.dimension_semantics<parallel>], iteration_bounds = array<i64: 1, 1>, scalar_prefetch = 0 : i64, scratch_operands = 0 : i64, tpu.core_type = #tpu.core_type<tc>, window_params = [{transform_indices = @transform_0, window_bounds = array<i64: 34, 32>}, {transform_indices = @transform_1, window_bounds = array<i64: 32, 128>}, {pipeline_mode = #tpu.pipeline_mode<synchronous>, transform_indices = @transform_2, window_bounds = array<i64: 1, 32>}, {pipeline_mode = #tpu.pipeline_mode<synchronous>, transform_indices = @transform_3, window_bounds = array<i64: 1, 32>}, {transform_indices = @transform_4, window_bounds = array<i64: 34, 128>}]} {
    %c0 = arith.constant 0 : index
    %c0_0 = arith.constant 0 : index
    %0 = vector.load %arg2[%c0, %c0_0] : memref<34x32xf32, #tpu.memory_space<vmem>>, vector<34x32xf32>
    %cst = arith.constant dense<0.000000e+00> : vector<34xf32>
    %1 = vector.multi_reduction <add>, %0, %cst [1] : vector<34x32xf32> to vector<34xf32>
    %2 = vector.shape_cast %1 : vector<34xf32> to vector<34x1xf32>
    %cst_1 = arith.constant 3.200000e+01 : f32
    %3 = vector.broadcast %cst_1 : f32 to vector<34x1xf32>
    %4 = arith.divf %2, %3 : vector<34x1xf32>
    %5 = vector.broadcast %4 : vector<34x1xf32> to vector<34x32xf32>
    %6 = arith.subf %0, %5 : vector<34x32xf32>
    %7 = arith.mulf %6, %6 : vector<34x32xf32>
    %cst_2 = arith.constant dense<0.000000e+00> : vector<34xf32>
    %8 = vector.multi_reduction <add>, %7, %cst_2 [1] : vector<34x32xf32> to vector<34xf32>
    %9 = vector.shape_cast %8 : vector<34xf32> to vector<34x1xf32>
    %cst_3 = arith.constant 3.200000e+01 : f32
    %10 = vector.broadcast %cst_3 : f32 to vector<34x1xf32>
    %11 = arith.divf %9, %10 : vector<34x1xf32>
    %12 = vector.broadcast %4 : vector<34x1xf32> to vector<34x32xf32>
    %13 = arith.subf %0, %12 : vector<34x32xf32>
    %cst_4 = arith.constant 9.99999974E-6 : f32
    %14 = vector.broadcast %cst_4 : f32 to vector<34x1xf32>
    %15 = arith.addf %11, %14 : vector<34x1xf32>
    %16 = math.rsqrt %15 : vector<34x1xf32>
    %17 = vector.broadcast %16 : vector<34x1xf32> to vector<34x32xf32>
    %18 = arith.mulf %13, %17 : vector<34x32xf32>
    %c0_5 = arith.constant 0 : index
    %c0_6 = arith.constant 0 : index
    %19 = vector.load %arg4[%c0_5, %c0_6] : memref<1x32xf32, #tpu.memory_space<vmem>>, vector<1x32xf32>
    %20 = vector.broadcast %19 : vector<1x32xf32> to vector<34x32xf32>
    %21 = arith.mulf %18, %20 : vector<34x32xf32>
    %c0_7 = arith.constant 0 : index
    %c0_8 = arith.constant 0 : index
    %22 = vector.load %arg5[%c0_7, %c0_8] : memref<1x32xf32, #tpu.memory_space<vmem>>, vector<1x32xf32>
    %23 = vector.broadcast %22 : vector<1x32xf32> to vector<34x32xf32>
    %24 = arith.addf %21, %23 : vector<34x32xf32>
    %25 = arith.truncf %24 : vector<34x32xf32> to vector<34x32xbf16>
    %c0_9 = arith.constant 0 : index
    %c0_10 = arith.constant 0 : index
    %26 = vector.load %arg3[%c0_9, %c0_10] : memref<32x128xbf16, #tpu.memory_space<vmem>>, vector<32x128xbf16>
    %cst_11 = arith.constant dense<0.000000e+00> : vector<34x128xf32>
    %27 = tpu.matmul %25, %26, %cst_11 {dimension_numbers = #tpu.dot_dimension_numbers<[1], [0], [0], [1], [0, 0, 1, 1], [], []>} : vector<34x32xbf16>, vector<32x128xbf16>, vector<34x128xf32> -> vector<34x128xf32>
    %28 = arith.truncf %27 : vector<34x128xf32> to vector<34x128xbf16>
    %c0_12 = arith.constant 0 : index
    %c0_13 = arith.constant 0 : index
    %29 = vector.load %arg6[%c0_12, %c0_13] : memref<34x128xbf16, #tpu.memory_space<vmem>>, vector<34x128xbf16>
    tpu.vector_store %arg6[%c0_12, %c0_13], %28 {strides = array<i32>} : memref<34x128xbf16, #tpu.memory_space<vmem>>, vector<34x128xbf16>,
    return
  }
  func.func @transform_0(%arg0: i32, %arg1: i32) -> (i32, i32) {
    %c0_i32 = arith.constant 0 : i32
    %c0_i32_0 = arith.constant 0 : i32
    return %arg0, %c0_i32 : i32, i32
  }
  func.func @transform_1(%arg0: i32, %arg1: i32) -> (i32, i32) {
    %c0_i32 = arith.constant 0 : i32
    %c0_i32_0 = arith.constant 0 : i32
    return %c0_i32, %arg1 : i32, i32
  }
  func.func @transform_2(%arg0: i32, %arg1: i32) -> (i32, i32) {
    %c0_i32 = arith.constant 0 : i32
    %c0_i32_0 = arith.constant 0 : i32
    %c0_i32_1 = arith.constant 0 : i32
    return %c0_i32, %c0_i32_0 : i32, i32
  }
  func.func @transform_3(%arg0: i32, %arg1: i32) -> (i32, i32) {
    %c0_i32 = arith.constant 0 : i32
    %c0_i32_0 = arith.constant 0 : i32
    %c0_i32_1 = arith.constant 0 : i32
    return %c0_i32, %c0_i32_0 : i32, i32
  }
  func.func @transform_4(%arg0: i32, %arg1: i32) -> (i32, i32) {
    %c0_i32 = arith.constant 0 : i32
    return %arg0, %arg1 : i32, i32
  }
}

module attributes {stable_mosaic.version = 11 : i64} {
  func.func @_mhsa_kernel(%arg0: i32, %arg1: memref<1x17x96xbf16, #tpu.memory_space<vmem>>, %arg2: memref<1x17x32xbf16, #tpu.memory_space<vmem>>) attributes {dimension_semantics = [#tpu.dimension_semantics<parallel>], iteration_bounds = array<i64: 2>, scalar_prefetch = 0 : i64, scratch_operands = 0 : i64, tpu.core_type = #tpu.core_type<tc>, window_params = [{transform_indices = @transform_0, window_bounds = array<i64: 1, 17, 96>}, {transform_indices = @transform_1, window_bounds = array<i64: 1, 17, 32>}]} {
    %c0 = arith.constant 0 : index
    %c0_0 = arith.constant 0 : index
    %c0_1 = arith.constant 0 : index
    %0 = vector.load %arg1[%c0, %c0_0, %c0_1] : memref<1x17x96xbf16, #tpu.memory_space<vmem>>, vector<1x17x96xbf16>
    %1 = vector.shape_cast %0 : vector<1x17x96xbf16> to vector<17x96xbf16>
    %2 = vector.extract_strided_slice %1 {offsets = [0, 0], sizes = [17, 8], strides = [1, 1]} : vector<17x96xbf16> to vector<17x8xbf16>
    %3 = vector.extract_strided_slice %1 {offsets = [0, 32], sizes = [17, 8], strides = [1, 1]} : vector<17x96xbf16> to vector<17x8xbf16>
    %4 = vector.extract_strided_slice %1 {offsets = [0, 64], sizes = [17, 8], strides = [1, 1]} : vector<17x96xbf16> to vector<17x8xbf16>
    %cst = arith.constant dense<0.000000e+00> : vector<17x17xf32>
    %5 = tpu.matmul %2, %3, %cst {dimension_numbers = #tpu.dot_dimension_numbers<[1], [1], [0], [0], [0, 0, 1, 0], [], []>} : vector<17x8xbf16>, vector<17x8xbf16>, vector<17x17xf32> -> vector<17x17xf32>
    %cst_2 = arith.constant dense<0xFF800000> : vector<17xf32>
    %6 = vector.multi_reduction <maximumf>, %5, %cst_2 [1] : vector<17x17xf32> to vector<17xf32>
    %7 = vector.shape_cast %6 : vector<17xf32> to vector<17x1xf32>
    %8 = vector.broadcast %7 : vector<17x1xf32> to vector<17x17xf32>
    %9 = arith.subf %5, %8 : vector<17x17xf32>
    %10 = math.exp %9 : vector<17x17xf32>
    %cst_3 = arith.constant dense<0.000000e+00> : vector<17xf32>
    %11 = vector.multi_reduction <add>, %10, %cst_3 [1] : vector<17x17xf32> to vector<17xf32>
    %12 = vector.shape_cast %11 : vector<17xf32> to vector<17x1xf32>
    %13 = tpu.reciprocal %12 {approx = true} : vector<17x1xf32> -> vector<17x1xf32>
    %14 = vector.broadcast %13 : vector<17x1xf32> to vector<17x17xf32>
    %15 = arith.mulf %10, %14 : vector<17x17xf32>
    %16 = arith.truncf %15 : vector<17x17xf32> to vector<17x17xbf16>
    %cst_4 = arith.constant dense<0.000000e+00> : vector<17x8xf32>
    %17 = tpu.matmul %16, %4, %cst_4 {dimension_numbers = #tpu.dot_dimension_numbers<[1], [0], [0], [1], [0, 0, 1, 1], [], []>} : vector<17x17xbf16>, vector<17x8xbf16>, vector<17x8xf32> -> vector<17x8xf32>
    %18 = vector.extract_strided_slice %1 {offsets = [0, 8], sizes = [17, 8], strides = [1, 1]} : vector<17x96xbf16> to vector<17x8xbf16>
    %19 = vector.extract_strided_slice %1 {offsets = [0, 40], sizes = [17, 8], strides = [1, 1]} : vector<17x96xbf16> to vector<17x8xbf16>
    %20 = vector.extract_strided_slice %1 {offsets = [0, 72], sizes = [17, 8], strides = [1, 1]} : vector<17x96xbf16> to vector<17x8xbf16>
    %cst_5 = arith.constant dense<0.000000e+00> : vector<17x17xf32>
    %21 = tpu.matmul %18, %19, %cst_5 {dimension_numbers = #tpu.dot_dimension_numbers<[1], [1], [0], [0], [0, 0, 1, 0], [], []>} : vector<17x8xbf16>, vector<17x8xbf16>, vector<17x17xf32> -> vector<17x17xf32>
    %cst_6 = arith.constant dense<0xFF800000> : vector<17xf32>
    %22 = vector.multi_reduction <maximumf>, %21, %cst_6 [1] : vector<17x17xf32> to vector<17xf32>
    %23 = vector.shape_cast %22 : vector<17xf32> to vector<17x1xf32>
    %24 = vector.broadcast %23 : vector<17x1xf32> to vector<17x17xf32>
    %25 = arith.subf %21, %24 : vector<17x17xf32>
    %26 = math.exp %25 : vector<17x17xf32>
    %cst_7 = arith.constant dense<0.000000e+00> : vector<17xf32>
    %27 = vector.multi_reduction <add>, %26, %cst_7 [1] : vector<17x17xf32> to vector<17xf32>
    %28 = vector.shape_cast %27 : vector<17xf32> to vector<17x1xf32>
    %29 = tpu.reciprocal %28 {approx = true} : vector<17x1xf32> -> vector<17x1xf32>
    %30 = vector.broadcast %29 : vector<17x1xf32> to vector<17x17xf32>
    %31 = arith.mulf %26, %30 : vector<17x17xf32>
    %32 = arith.truncf %31 : vector<17x17xf32> to vector<17x17xbf16>
    %cst_8 = arith.constant dense<0.000000e+00> : vector<17x8xf32>
    %33 = tpu.matmul %32, %20, %cst_8 {dimension_numbers = #tpu.dot_dimension_numbers<[1], [0], [0], [1], [0, 0, 1, 1], [], []>} : vector<17x17xbf16>, vector<17x8xbf16>, vector<17x8xf32> -> vector<17x8xf32>
    %34 = vector.extract_strided_slice %1 {offsets = [0, 16], sizes = [17, 8], strides = [1, 1]} : vector<17x96xbf16> to vector<17x8xbf16>
    %35 = vector.extract_strided_slice %1 {offsets = [0, 48], sizes = [17, 8], strides = [1, 1]} : vector<17x96xbf16> to vector<17x8xbf16>
    %36 = vector.extract_strided_slice %1 {offsets = [0, 80], sizes = [17, 8], strides = [1, 1]} : vector<17x96xbf16> to vector<17x8xbf16>
    %cst_9 = arith.constant dense<0.000000e+00> : vector<17x17xf32>
    %37 = tpu.matmul %34, %35, %cst_9 {dimension_numbers = #tpu.dot_dimension_numbers<[1], [1], [0], [0], [0, 0, 1, 0], [], []>} : vector<17x8xbf16>, vector<17x8xbf16>, vector<17x17xf32> -> vector<17x17xf32>
    %cst_10 = arith.constant dense<0xFF800000> : vector<17xf32>
    %38 = vector.multi_reduction <maximumf>, %37, %cst_10 [1] : vector<17x17xf32> to vector<17xf32>
    %39 = vector.shape_cast %38 : vector<17xf32> to vector<17x1xf32>
    %40 = vector.broadcast %39 : vector<17x1xf32> to vector<17x17xf32>
    %41 = arith.subf %37, %40 : vector<17x17xf32>
    %42 = math.exp %41 : vector<17x17xf32>
    %cst_11 = arith.constant dense<0.000000e+00> : vector<17xf32>
    %43 = vector.multi_reduction <add>, %42, %cst_11 [1] : vector<17x17xf32> to vector<17xf32>
    %44 = vector.shape_cast %43 : vector<17xf32> to vector<17x1xf32>
    %45 = tpu.reciprocal %44 {approx = true} : vector<17x1xf32> -> vector<17x1xf32>
    %46 = vector.broadcast %45 : vector<17x1xf32> to vector<17x17xf32>
    %47 = arith.mulf %42, %46 : vector<17x17xf32>
    %48 = arith.truncf %47 : vector<17x17xf32> to vector<17x17xbf16>
    %cst_12 = arith.constant dense<0.000000e+00> : vector<17x8xf32>
    %49 = tpu.matmul %48, %36, %cst_12 {dimension_numbers = #tpu.dot_dimension_numbers<[1], [0], [0], [1], [0, 0, 1, 1], [], []>} : vector<17x17xbf16>, vector<17x8xbf16>, vector<17x8xf32> -> vector<17x8xf32>
    %50 = vector.extract_strided_slice %1 {offsets = [0, 24], sizes = [17, 8], strides = [1, 1]} : vector<17x96xbf16> to vector<17x8xbf16>
    %51 = vector.extract_strided_slice %1 {offsets = [0, 56], sizes = [17, 8], strides = [1, 1]} : vector<17x96xbf16> to vector<17x8xbf16>
    %52 = vector.extract_strided_slice %1 {offsets = [0, 88], sizes = [17, 8], strides = [1, 1]} : vector<17x96xbf16> to vector<17x8xbf16>
    %cst_13 = arith.constant dense<0.000000e+00> : vector<17x17xf32>
    %53 = tpu.matmul %50, %51, %cst_13 {dimension_numbers = #tpu.dot_dimension_numbers<[1], [1], [0], [0], [0, 0, 1, 0], [], []>} : vector<17x8xbf16>, vector<17x8xbf16>, vector<17x17xf32> -> vector<17x17xf32>
    %cst_14 = arith.constant dense<0xFF800000> : vector<17xf32>
    %54 = vector.multi_reduction <maximumf>, %53, %cst_14 [1] : vector<17x17xf32> to vector<17xf32>
    %55 = vector.shape_cast %54 : vector<17xf32> to vector<17x1xf32>
    %56 = vector.broadcast %55 : vector<17x1xf32> to vector<17x17xf32>
    %57 = arith.subf %53, %56 : vector<17x17xf32>
    %58 = math.exp %57 : vector<17x17xf32>
    %cst_15 = arith.constant dense<0.000000e+00> : vector<17xf32>
    %59 = vector.multi_reduction <add>, %58, %cst_15 [1] : vector<17x17xf32> to vector<17xf32>
    %60 = vector.shape_cast %59 : vector<17xf32> to vector<17x1xf32>
    %61 = tpu.reciprocal %60 {approx = true} : vector<17x1xf32> -> vector<17x1xf32>
    %62 = vector.broadcast %61 : vector<17x1xf32> to vector<17x17xf32>
    %63 = arith.mulf %58, %62 : vector<17x17xf32>
    %64 = arith.truncf %63 : vector<17x17xf32> to vector<17x17xbf16>
    %cst_16 = arith.constant dense<0.000000e+00> : vector<17x8xf32>
    %65 = tpu.matmul %64, %52, %cst_16 {dimension_numbers = #tpu.dot_dimension_numbers<[1], [0], [0], [1], [0, 0, 1, 1], [], []>} : vector<17x17xbf16>, vector<17x8xbf16>, vector<17x8xf32> -> vector<17x8xf32>
    %66 = tpu.concatenate %17, %33, %49, %65 in 1 : vector<17x8xf32>, vector<17x8xf32>, vector<17x8xf32>, vector<17x8xf32> -> vector<17x32xf32>
    %67 = arith.truncf %66 : vector<17x32xf32> to vector<17x32xbf16>
    %c0_17 = arith.constant 0 : index
    %c0_18 = arith.constant 0 : index
    %c0_19 = arith.constant 0 : index
    %68 = vector.load %arg2[%c0_17, %c0_18, %c0_19] : memref<1x17x32xbf16, #tpu.memory_space<vmem>>, vector<1x17x32xbf16>
    %69 = vector.shape_cast %68 : vector<1x17x32xbf16> to vector<17x32xbf16>
    %70 = vector.shape_cast %67 : vector<17x32xbf16> to vector<1x17x32xbf16>
    tpu.vector_store %arg2[%c0_17, %c0_18, %c0_19], %70 {strides = array<i32>} : memref<1x17x32xbf16, #tpu.memory_space<vmem>>, vector<1x17x32xbf16>,
    return
  }
  func.func @transform_0(%arg0: i32) -> (i32, i32, i32) {
    %c0_i32 = arith.constant 0 : i32
    %c0_i32_0 = arith.constant 0 : i32
    %c0_i32_1 = arith.constant 0 : i32
    return %arg0, %c0_i32, %c0_i32_0 : i32, i32, i32
  }
  func.func @transform_1(%arg0: i32) -> (i32, i32, i32) {
    %c0_i32 = arith.constant 0 : i32
    %c0_i32_0 = arith.constant 0 : i32
    %c0_i32_1 = arith.constant 0 : i32
    return %arg0, %c0_i32, %c0_i32_0 : i32, i32, i32
  }
}

module attributes {stable_mosaic.version = 11 : i64} {
  func.func @kernel(%arg0: i32, %arg1: i32, %arg2: memref<34x32xbf16, #tpu.memory_space<vmem>>, %arg3: memref<32x128xbf16, #tpu.memory_space<vmem>>, %arg4: memref<1x128xf32, #tpu.memory_space<vmem>>, %arg5: memref<34x128xf32, #tpu.memory_space<vmem>>, %arg6: memref<34x128xf32, #tpu.memory_space<vmem>>) attributes {dimension_semantics = [#tpu.dimension_semantics<parallel>, #tpu.dimension_semantics<parallel>], iteration_bounds = array<i64: 1, 1>, scalar_prefetch = 0 : i64, scratch_operands = 0 : i64, tpu.core_type = #tpu.core_type<tc>, window_params = [{transform_indices = @transform_0, window_bounds = array<i64: 34, 32>}, {transform_indices = @transform_1, window_bounds = array<i64: 32, 128>}, {transform_indices = @transform_2, window_bounds = array<i64: 1, 128>}, {transform_indices = @transform_3, window_bounds = array<i64: 34, 128>}, {transform_indices = @transform_4, window_bounds = array<i64: 34, 128>}]} {
    %c0 = arith.constant 0 : index
    %c0_0 = arith.constant 0 : index
    %0 = vector.load %arg2[%c0, %c0_0] : memref<34x32xbf16, #tpu.memory_space<vmem>>, vector<34x32xbf16>
    %c0_1 = arith.constant 0 : index
    %c0_2 = arith.constant 0 : index
    %1 = vector.load %arg3[%c0_1, %c0_2] : memref<32x128xbf16, #tpu.memory_space<vmem>>, vector<32x128xbf16>
    %cst = arith.constant dense<0.000000e+00> : vector<34x128xf32>
    %2 = tpu.matmul %0, %1, %cst {dimension_numbers = #tpu.dot_dimension_numbers<[1], [0], [0], [1], [0, 0, 1, 1], [], []>} : vector<34x32xbf16>, vector<32x128xbf16>, vector<34x128xf32> -> vector<34x128xf32>
    %c0_3 = arith.constant 0 : index
    %c0_4 = arith.constant 0 : index
    %3 = vector.load %arg4[%c0_3, %c0_4] : memref<1x128xf32, #tpu.memory_space<vmem>>, vector<1x128xf32>
    %4 = vector.broadcast %3 : vector<1x128xf32> to vector<34x128xf32>
    %5 = arith.addf %2, %4 : vector<34x128xf32>
    %c0_5 = arith.constant 0 : index
    %c0_6 = arith.constant 0 : index
    %6 = vector.load %arg5[%c0_5, %c0_6] : memref<34x128xf32, #tpu.memory_space<vmem>>, vector<34x128xf32>
    %7 = arith.addf %5, %6 : vector<34x128xf32>
    %c0_7 = arith.constant 0 : index
    %c0_8 = arith.constant 0 : index
    %8 = vector.load %arg6[%c0_7, %c0_8] : memref<34x128xf32, #tpu.memory_space<vmem>>, vector<34x128xf32>
    tpu.vector_store %arg6[%c0_7, %c0_8], %7 {strides = array<i32>} : memref<34x128xf32, #tpu.memory_space<vmem>>, vector<34x128xf32>,
    return
  }
  func.func @transform_0(%arg0: i32, %arg1: i32) -> (i32, i32) {
    %c0_i32 = arith.constant 0 : i32
    %c0_i32_0 = arith.constant 0 : i32
    return %arg0, %c0_i32 : i32, i32
  }
  func.func @transform_1(%arg0: i32, %arg1: i32) -> (i32, i32) {
    %c0_i32 = arith.constant 0 : i32
    %c0_i32_0 = arith.constant 0 : i32
    return %c0_i32, %arg1 : i32, i32
  }
  func.func @transform_2(%arg0: i32, %arg1: i32) -> (i32, i32) {
    %c0_i32 = arith.constant 0 : i32
    %c0_i32_0 = arith.constant 0 : i32
    return %c0_i32, %arg1 : i32, i32
  }
  func.func @transform_3(%arg0: i32, %arg1: i32) -> (i32, i32) {
    %c0_i32 = arith.constant 0 : i32
    return %arg0, %arg1 : i32, i32
  }
  func.func @transform_4(%arg0: i32, %arg1: i32) -> (i32, i32) {
    %c0_i32 = arith.constant 0 : i32
    return %arg0, %arg1 : i32, i32
  }
}

module attributes {stable_mosaic.version = 11 : i64} {
  func.func @kernel(%arg0: i32, %arg1: i32, %arg2: memref<34x32xf32, #tpu.memory_space<vmem>>, %arg3: memref<32x128xbf16, #tpu.memory_space<vmem>>, %arg4: memref<1x128xf32, #tpu.memory_space<vmem>>, %arg5: memref<1x32xf32, #tpu.memory_space<vmem>>, %arg6: memref<1x32xf32, #tpu.memory_space<vmem>>, %arg7: memref<34x128xbf16, #tpu.memory_space<vmem>>) attributes {dimension_semantics = [#tpu.dimension_semantics<parallel>, #tpu.dimension_semantics<parallel>], iteration_bounds = array<i64: 1, 1>, scalar_prefetch = 0 : i64, scratch_operands = 0 : i64, tpu.core_type = #tpu.core_type<tc>, window_params = [{transform_indices = @transform_0, window_bounds = array<i64: 34, 32>}, {transform_indices = @transform_1, window_bounds = array<i64: 32, 128>}, {transform_indices = @transform_2, window_bounds = array<i64: 1, 128>}, {pipeline_mode = #tpu.pipeline_mode<synchronous>, transform_indices = @transform_3, window_bounds = array<i64: 1, 32>}, {pipeline_mode = #tpu.pipeline_mode<synchronous>, transform_indices = @transform_4, window_bounds = array<i64: 1, 32>}, {transform_indices = @transform_5, window_bounds = array<i64: 34, 128>}]} {
    %c0 = arith.constant 0 : index
    %c0_0 = arith.constant 0 : index
    %0 = vector.load %arg2[%c0, %c0_0] : memref<34x32xf32, #tpu.memory_space<vmem>>, vector<34x32xf32>
    %cst = arith.constant dense<0.000000e+00> : vector<34xf32>
    %1 = vector.multi_reduction <add>, %0, %cst [1] : vector<34x32xf32> to vector<34xf32>
    %2 = vector.shape_cast %1 : vector<34xf32> to vector<34x1xf32>
    %cst_1 = arith.constant 3.200000e+01 : f32
    %3 = vector.broadcast %cst_1 : f32 to vector<34x1xf32>
    %4 = arith.divf %2, %3 : vector<34x1xf32>
    %5 = vector.broadcast %4 : vector<34x1xf32> to vector<34x32xf32>
    %6 = arith.subf %0, %5 : vector<34x32xf32>
    %7 = arith.mulf %6, %6 : vector<34x32xf32>
    %cst_2 = arith.constant dense<0.000000e+00> : vector<34xf32>
    %8 = vector.multi_reduction <add>, %7, %cst_2 [1] : vector<34x32xf32> to vector<34xf32>
    %9 = vector.shape_cast %8 : vector<34xf32> to vector<34x1xf32>
    %cst_3 = arith.constant 3.200000e+01 : f32
    %10 = vector.broadcast %cst_3 : f32 to vector<34x1xf32>
    %11 = arith.divf %9, %10 : vector<34x1xf32>
    %12 = vector.broadcast %4 : vector<34x1xf32> to vector<34x32xf32>
    %13 = arith.subf %0, %12 : vector<34x32xf32>
    %cst_4 = arith.constant 9.99999974E-6 : f32
    %14 = vector.broadcast %cst_4 : f32 to vector<34x1xf32>
    %15 = arith.addf %11, %14 : vector<34x1xf32>
    %16 = math.rsqrt %15 : vector<34x1xf32>
    %17 = vector.broadcast %16 : vector<34x1xf32> to vector<34x32xf32>
    %18 = arith.mulf %13, %17 : vector<34x32xf32>
    %c0_5 = arith.constant 0 : index
    %c0_6 = arith.constant 0 : index
    %19 = vector.load %arg5[%c0_5, %c0_6] : memref<1x32xf32, #tpu.memory_space<vmem>>, vector<1x32xf32>
    %20 = vector.broadcast %19 : vector<1x32xf32> to vector<34x32xf32>
    %21 = arith.mulf %18, %20 : vector<34x32xf32>
    %c0_7 = arith.constant 0 : index
    %c0_8 = arith.constant 0 : index
    %22 = vector.load %arg6[%c0_7, %c0_8] : memref<1x32xf32, #tpu.memory_space<vmem>>, vector<1x32xf32>
    %23 = vector.broadcast %22 : vector<1x32xf32> to vector<34x32xf32>
    %24 = arith.addf %21, %23 : vector<34x32xf32>
    %25 = arith.truncf %24 : vector<34x32xf32> to vector<34x32xbf16>
    %c0_9 = arith.constant 0 : index
    %c0_10 = arith.constant 0 : index
    %26 = vector.load %arg3[%c0_9, %c0_10] : memref<32x128xbf16, #tpu.memory_space<vmem>>, vector<32x128xbf16>
    %cst_11 = arith.constant dense<0.000000e+00> : vector<34x128xf32>
    %27 = tpu.matmul %25, %26, %cst_11 {dimension_numbers = #tpu.dot_dimension_numbers<[1], [0], [0], [1], [0, 0, 1, 1], [], []>} : vector<34x32xbf16>, vector<32x128xbf16>, vector<34x128xf32> -> vector<34x128xf32>
    %c0_12 = arith.constant 0 : index
    %c0_13 = arith.constant 0 : index
    %28 = vector.load %arg4[%c0_12, %c0_13] : memref<1x128xf32, #tpu.memory_space<vmem>>, vector<1x128xf32>
    %29 = vector.broadcast %28 : vector<1x128xf32> to vector<34x128xf32>
    %30 = arith.addf %27, %29 : vector<34x128xf32>
    %cst_14 = arith.constant 5.000000e-01 : f32
    %31 = vector.broadcast %cst_14 : f32 to vector<34x128xf32>
    %32 = arith.mulf %31, %30 : vector<34x128xf32>
    %cst_15 = arith.constant 0.707106769 : f32
    %33 = vector.broadcast %cst_15 : f32 to vector<34x128xf32>
    %34 = arith.mulf %30, %33 : vector<34x128xf32>
    %35 = math.erf %34 : vector<34x128xf32>
    %cst_16 = arith.constant 1.000000e+00 : f32
    %36 = vector.broadcast %cst_16 : f32 to vector<34x128xf32>
    %37 = arith.addf %36, %35 : vector<34x128xf32>
    %38 = arith.mulf %32, %37 : vector<34x128xf32>
    %39 = arith.truncf %38 : vector<34x128xf32> to vector<34x128xbf16>
    %c0_17 = arith.constant 0 : index
    %c0_18 = arith.constant 0 : index
    %40 = vector.load %arg7[%c0_17, %c0_18] : memref<34x128xbf16, #tpu.memory_space<vmem>>, vector<34x128xbf16>
    tpu.vector_store %arg7[%c0_17, %c0_18], %39 {strides = array<i32>} : memref<34x128xbf16, #tpu.memory_space<vmem>>, vector<34x128xbf16>,
    return
  }
  func.func @transform_0(%arg0: i32, %arg1: i32) -> (i32, i32) {
    %c0_i32 = arith.constant 0 : i32
    %c0_i32_0 = arith.constant 0 : i32
    return %arg0, %c0_i32 : i32, i32
  }
  func.func @transform_1(%arg0: i32, %arg1: i32) -> (i32, i32) {
    %c0_i32 = arith.constant 0 : i32
    %c0_i32_0 = arith.constant 0 : i32
    return %c0_i32, %arg1 : i32, i32
  }
  func.func @transform_2(%arg0: i32, %arg1: i32) -> (i32, i32) {
    %c0_i32 = arith.constant 0 : i32
    %c0_i32_0 = arith.constant 0 : i32
    return %c0_i32, %arg1 : i32, i32
  }
  func.func @transform_3(%arg0: i32, %arg1: i32) -> (i32, i32) {
    %c0_i32 = arith.constant 0 : i32
    %c0_i32_0 = arith.constant 0 : i32
    %c0_i32_1 = arith.constant 0 : i32
    return %c0_i32, %c0_i32_0 : i32, i32
  }
  func.func @transform_4(%arg0: i32, %arg1: i32) -> (i32, i32) {
    %c0_i32 = arith.constant 0 : i32
    %c0_i32_0 = arith.constant 0 : i32
    %c0_i32_1 = arith.constant 0 : i32
    return %c0_i32, %c0_i32_0 : i32, i32
  }
  func.func @transform_5(%arg0: i32, %arg1: i32) -> (i32, i32) {
    %c0_i32 = arith.constant 0 : i32
    return %arg0, %arg1 : i32, i32
  }
}

module attributes {stable_mosaic.version = 11 : i64} {
  func.func @kernel(%arg0: i32, %arg1: i32, %arg2: memref<34x128xbf16, #tpu.memory_space<vmem>>, %arg3: memref<128x128xbf16, #tpu.memory_space<vmem>>, %arg4: memref<1x128xf32, #tpu.memory_space<vmem>>, %arg5: memref<34x128xf32, #tpu.memory_space<vmem>>, %arg6: memref<34x128xf32, #tpu.memory_space<vmem>>) attributes {dimension_semantics = [#tpu.dimension_semantics<parallel>, #tpu.dimension_semantics<parallel>], iteration_bounds = array<i64: 1, 1>, scalar_prefetch = 0 : i64, scratch_operands = 0 : i64, tpu.core_type = #tpu.core_type<tc>, window_params = [{transform_indices = @transform_0, window_bounds = array<i64: 34, 128>}, {transform_indices = @transform_1, window_bounds = array<i64: 128, 128>}, {transform_indices = @transform_2, window_bounds = array<i64: 1, 128>}, {transform_indices = @transform_3, window_bounds = array<i64: 34, 128>}, {transform_indices = @transform_4, window_bounds = array<i64: 34, 128>}]} {
    %c0 = arith.constant 0 : index
    %c0_0 = arith.constant 0 : index
    %0 = vector.load %arg2[%c0, %c0_0] : memref<34x128xbf16, #tpu.memory_space<vmem>>, vector<34x128xbf16>
    %c0_1 = arith.constant 0 : index
    %c0_2 = arith.constant 0 : index
    %1 = vector.load %arg3[%c0_1, %c0_2] : memref<128x128xbf16, #tpu.memory_space<vmem>>, vector<128x128xbf16>
    %cst = arith.constant dense<0.000000e+00> : vector<34x128xf32>
    %2 = tpu.matmul %0, %1, %cst {dimension_numbers = #tpu.dot_dimension_numbers<[1], [0], [0], [1], [0, 0, 1, 1], [], []>} : vector<34x128xbf16>, vector<128x128xbf16>, vector<34x128xf32> -> vector<34x128xf32>
    %c0_3 = arith.constant 0 : index
    %c0_4 = arith.constant 0 : index
    %3 = vector.load %arg4[%c0_3, %c0_4] : memref<1x128xf32, #tpu.memory_space<vmem>>, vector<1x128xf32>
    %4 = vector.broadcast %3 : vector<1x128xf32> to vector<34x128xf32>
    %5 = arith.addf %2, %4 : vector<34x128xf32>
    %c0_5 = arith.constant 0 : index
    %c0_6 = arith.constant 0 : index
    %6 = vector.load %arg5[%c0_5, %c0_6] : memref<34x128xf32, #tpu.memory_space<vmem>>, vector<34x128xf32>
    %7 = arith.addf %5, %6 : vector<34x128xf32>
    %c0_7 = arith.constant 0 : index
    %c0_8 = arith.constant 0 : index
    %8 = vector.load %arg6[%c0_7, %c0_8] : memref<34x128xf32, #tpu.memory_space<vmem>>, vector<34x128xf32>
    tpu.vector_store %arg6[%c0_7, %c0_8], %7 {strides = array<i32>} : memref<34x128xf32, #tpu.memory_space<vmem>>, vector<34x128xf32>,
    return
  }
  func.func @transform_0(%arg0: i32, %arg1: i32) -> (i32, i32) {
    %c0_i32 = arith.constant 0 : i32
    %c0_i32_0 = arith.constant 0 : i32
    return %arg0, %c0_i32 : i32, i32
  }
  func.func @transform_1(%arg0: i32, %arg1: i32) -> (i32, i32) {
    %c0_i32 = arith.constant 0 : i32
    %c0_i32_0 = arith.constant 0 : i32
    return %c0_i32, %arg1 : i32, i32
  }
  func.func @transform_2(%arg0: i32, %arg1: i32) -> (i32, i32) {
    %c0_i32 = arith.constant 0 : i32
    %c0_i32_0 = arith.constant 0 : i32
    return %c0_i32, %arg1 : i32, i32
  }
  func.func @transform_3(%arg0: i32, %arg1: i32) -> (i32, i32) {
    %c0_i32 = arith.constant 0 : i32
    return %arg0, %arg1 : i32, i32
  }
  func.func @transform_4(%arg0: i32, %arg1: i32) -> (i32, i32) {
    %c0_i32 = arith.constant 0 : i32
    return %arg0, %arg1 : i32, i32
  }
}

module attributes {stable_mosaic.version = 11 : i64} {
  func.func @kernel(%arg0: i32, %arg1: i32, %arg2: memref<2x32xf32, #tpu.memory_space<vmem>>, %arg3: memref<32x128xbf16, #tpu.memory_space<vmem>>, %arg4: memref<1x128xf32, #tpu.memory_space<vmem>>, %arg5: memref<1x32xf32, #tpu.memory_space<vmem>>, %arg6: memref<1x32xf32, #tpu.memory_space<vmem>>, %arg7: memref<2x128xf32, #tpu.memory_space<vmem>>) attributes {dimension_semantics = [#tpu.dimension_semantics<parallel>, #tpu.dimension_semantics<parallel>], iteration_bounds = array<i64: 1, 1>, scalar_prefetch = 0 : i64, scratch_operands = 0 : i64, tpu.core_type = #tpu.core_type<tc>, window_params = [{transform_indices = @transform_0, window_bounds = array<i64: 2, 32>}, {transform_indices = @transform_1, window_bounds = array<i64: 32, 128>}, {transform_indices = @transform_2, window_bounds = array<i64: 1, 128>}, {pipeline_mode = #tpu.pipeline_mode<synchronous>, transform_indices = @transform_3, window_bounds = array<i64: 1, 32>}, {pipeline_mode = #tpu.pipeline_mode<synchronous>, transform_indices = @transform_4, window_bounds = array<i64: 1, 32>}, {transform_indices = @transform_5, window_bounds = array<i64: 2, 128>}]} {
    %c0 = arith.constant 0 : index
    %c0_0 = arith.constant 0 : index
    %0 = vector.load %arg2[%c0, %c0_0] : memref<2x32xf32, #tpu.memory_space<vmem>>, vector<2x32xf32>
    %cst = arith.constant dense<0.000000e+00> : vector<2xf32>
    %1 = vector.multi_reduction <add>, %0, %cst [1] : vector<2x32xf32> to vector<2xf32>
    %2 = vector.shape_cast %1 : vector<2xf32> to vector<2x1xf32>
    %cst_1 = arith.constant 3.200000e+01 : f32
    %3 = vector.broadcast %cst_1 : f32 to vector<2x1xf32>
    %4 = arith.divf %2, %3 : vector<2x1xf32>
    %5 = vector.broadcast %4 : vector<2x1xf32> to vector<2x32xf32>
    %6 = arith.subf %0, %5 : vector<2x32xf32>
    %7 = arith.mulf %6, %6 : vector<2x32xf32>
    %cst_2 = arith.constant dense<0.000000e+00> : vector<2xf32>
    %8 = vector.multi_reduction <add>, %7, %cst_2 [1] : vector<2x32xf32> to vector<2xf32>
    %9 = vector.shape_cast %8 : vector<2xf32> to vector<2x1xf32>
    %cst_3 = arith.constant 3.200000e+01 : f32
    %10 = vector.broadcast %cst_3 : f32 to vector<2x1xf32>
    %11 = arith.divf %9, %10 : vector<2x1xf32>
    %12 = vector.broadcast %4 : vector<2x1xf32> to vector<2x32xf32>
    %13 = arith.subf %0, %12 : vector<2x32xf32>
    %cst_4 = arith.constant 9.99999974E-6 : f32
    %14 = vector.broadcast %cst_4 : f32 to vector<2x1xf32>
    %15 = arith.addf %11, %14 : vector<2x1xf32>
    %16 = math.rsqrt %15 : vector<2x1xf32>
    %17 = vector.broadcast %16 : vector<2x1xf32> to vector<2x32xf32>
    %18 = arith.mulf %13, %17 : vector<2x32xf32>
    %c0_5 = arith.constant 0 : index
    %c0_6 = arith.constant 0 : index
    %19 = vector.load %arg5[%c0_5, %c0_6] : memref<1x32xf32, #tpu.memory_space<vmem>>, vector<1x32xf32>
    %20 = vector.broadcast %19 : vector<1x32xf32> to vector<2x32xf32>
    %21 = arith.mulf %18, %20 : vector<2x32xf32>
    %c0_7 = arith.constant 0 : index
    %c0_8 = arith.constant 0 : index
    %22 = vector.load %arg6[%c0_7, %c0_8] : memref<1x32xf32, #tpu.memory_space<vmem>>, vector<1x32xf32>
    %23 = vector.broadcast %22 : vector<1x32xf32> to vector<2x32xf32>
    %24 = arith.addf %21, %23 : vector<2x32xf32>
    %25 = arith.truncf %24 : vector<2x32xf32> to vector<2x32xbf16>
    %c0_9 = arith.constant 0 : index
    %c0_10 = arith.constant 0 : index
    %26 = vector.load %arg3[%c0_9, %c0_10] : memref<32x128xbf16, #tpu.memory_space<vmem>>, vector<32x128xbf16>
    %cst_11 = arith.constant dense<0.000000e+00> : vector<2x128xf32>
    %27 = tpu.matmul %25, %26, %cst_11 {dimension_numbers = #tpu.dot_dimension_numbers<[1], [0], [0], [1], [0, 0, 1, 1], [], []>} : vector<2x32xbf16>, vector<32x128xbf16>, vector<2x128xf32> -> vector<2x128xf32>
    %c0_12 = arith.constant 0 : index
    %c0_13 = arith.constant 0 : index
    %28 = vector.load %arg4[%c0_12, %c0_13] : memref<1x128xf32, #tpu.memory_space<vmem>>, vector<1x128xf32>
    %29 = vector.broadcast %28 : vector<1x128xf32> to vector<2x128xf32>
    %30 = arith.addf %27, %29 : vector<2x128xf32>
    %c0_14 = arith.constant 0 : index
    %c0_15 = arith.constant 0 : index
    %31 = vector.load %arg7[%c0_14, %c0_15] : memref<2x128xf32, #tpu.memory_space<vmem>>, vector<2x128xf32>
    tpu.vector_store %arg7[%c0_14, %c0_15], %30 {strides = array<i32>} : memref<2x128xf32, #tpu.memory_space<vmem>>, vector<2x128xf32>,
    return
  }
  func.func @transform_0(%arg0: i32, %arg1: i32) -> (i32, i32) {
    %c0_i32 = arith.constant 0 : i32
    %c0_i32_0 = arith.constant 0 : i32
    return %arg0, %c0_i32 : i32, i32
  }
  func.func @transform_1(%arg0: i32, %arg1: i32) -> (i32, i32) {
    %c0_i32 = arith.constant 0 : i32
    %c0_i32_0 = arith.constant 0 : i32
    return %c0_i32, %arg1 : i32, i32
  }
  func.func @transform_2(%arg0: i32, %arg1: i32) -> (i32, i32) {
    %c0_i32 = arith.constant 0 : i32
    %c0_i32_0 = arith.constant 0 : i32
    return %c0_i32, %arg1 : i32, i32
  }
  func.func @transform_3(%arg0: i32, %arg1: i32) -> (i32, i32) {
    %c0_i32 = arith.constant 0 : i32
    %c0_i32_0 = arith.constant 0 : i32
    %c0_i32_1 = arith.constant 0 : i32
    return %c0_i32, %c0_i32_0 : i32, i32
  }
  func.func @transform_4(%arg0: i32, %arg1: i32) -> (i32, i32) {
    %c0_i32 = arith.constant 0 : i32
    %c0_i32_0 = arith.constant 0 : i32
    %c0_i32_1 = arith.constant 0 : i32
    return %c0_i32, %c0_i32_0 : i32, i32
  }
  func.func @transform_5(%arg0: i32, %arg1: i32) -> (i32, i32) {
    %c0_i32 = arith.constant 0 : i32
    return %arg0, %arg1 : i32, i32
  }
}

</mosaic_0001>

<bundles_post_ra>
// kernel: vit_forward.22
= control target key start
LH: loop header
LB: loop body
LE: loop exit
PB: predicated region body
PF: predicated region fallthrough
CT: control target
= control target key end

     0   :  { %vm49_vm0 = vcmask 392192   ;;  %s160_s1 = inlined_call_operand.vmem [shape: bf16[48,128], index: 1, kind: input, shape index: {}]   ;;  %s161_s2 = inlined_call_operand.vmem [shape: f32[1,128], index: 2, kind: input, shape index: {}]   ;;  %s162_s0 = inlined_call_operand.vmem [shape: f32[32,48], index: 0, kind: input, shape index: {}]   ;;  %s163_s3 = inlined_call_operand.vmem [shape: f32[32,128], index: 3, kind: output, shape index: {}]  }
   0x1   :  { %v99_v0 = vld [vmem:[%s160_s1 + $0x10] sm:$0xff]  ;;  %v98_v1 = vld [vmem:[%s160_s1 + $0x8] sm:$0xff]  ;;  %v97_v2 = vld [vmem:[%s160_s1] sm:$0xff] }
   0x2   :  { %61 = vmatpush.bf16.msra.mxu0 %v99_v0  ;;  %100 = vmatpush.bf16.msra.mxu1 %v99_v0  ;;  %v15_v3 = vld [vmem:[%s162_s0] sm:$0xff]  ;;  %v16_v4 = vld [vmem:[%s162_s0 + $0x8] sm:$0xff]  ;;  %v17_v5 = vld [vmem:[%s162_s0 + $0x10] sm:$0xff] }
   0x3   :  { %v18_v6 = vld [vmem:[%s162_s0 + $0x18] sm:$0xff]  ;;  %v19_v7 = vpack.c.bf16 %v16_v4, %v15_v3  ;;  %v103_v9 = vld [vmem:[%s161_s2] ss:$0 sm:$0xff] }
   0x4   :  { %v20_v8 = vpack.c.bf16 %v18_v6, %v17_v5 }
   0x6   :  { %62 = vmatpush.bf16.msra.mxu0 %v98_v1  ;;  %101 = vmatpush.bf16.msra.mxu1 %v98_v1 }
   0xa   :  { %63 = vmatpush.bf16.msra.mxu0 %v97_v2  ;;  %102 = vmatpush.bf16.msra.mxu1 %v97_v2 }
   0xd   :  { %95 = vmatmul.msk.bf16.vlgmr.msra.gmra.mxu0 %vm49_vm0, %v19_v7  ;;  %96 = vmatmul.msk.bf16.vlgmr.msra.gmra.mxu1 %vm49_vm0, %v20_v8 }
  0x8a   :  { %v65_v10 = vpop.f32.mrf.mxu0  ;;  %v70_v11 = vpop.f32.mrf.mxu1 }
  0x8b   :  { %v66_v12 = vadd.f32 %v103_v9, %v65_v10  ;;  %v71_v13 = vadd.f32 %v103_v9, %v70_v11 }
  0x8d   :  { %75 = vst [vmem:[%s163_s3] sm:$0xff] %v66_v12 }
  0x8e   :  { %77 = vst [vmem:[%s163_s3 + $0x10] sm:$0xff] %v71_v13 }
  0x92   :  { %v67_v14 = vpop.f32.mrf.mxu0  ;;  %v72_v15 = vpop.f32.mrf.mxu1 }
  0x93   :  { %v68_v16 = vadd.f32 %v103_v9, %v67_v14  ;;  %v73_v17 = vadd.f32 %v103_v9, %v72_v15 }
  0x95   :  { %76 = vst [vmem:[%s163_s3 + $0x8] sm:$0xff] %v68_v16 }
  0x96   :  { %78 = vst [vmem:[%s163_s3 + $0x18] sm:$0xff] %v73_v17 }

// kernel: vit_forward.25
= control target key start
LH: loop header
LB: loop body
LE: loop exit
PB: predicated region body
PF: predicated region fallthrough
CT: control target
= control target key end

     0   :  { %vm52_vm0 = vcmask 261120   ;;  %s183_s1 = inlined_call_operand.vmem [shape: bf16[32,128], index: 1, kind: input, shape index: {}]   ;;  %s184_s2 = inlined_call_operand.vmem [shape: f32[1,128], index: 2, kind: input, shape index: {}]   ;;  %s185_s0 = inlined_call_operand.vmem [shape: bf16[32,32], index: 0, kind: input, shape index: {}]   ;;  %s186_s3 = inlined_call_operand.vmem [shape: f32[32,128], index: 3, kind: input, shape index: {}]   ;;  %s187_s4 = inlined_call_operand.vmem [shape: f32[32,128], index: 4, kind: output, shape index: {}]  }
   0x1   :  { %v115_v0 = vld [vmem:[%s183_s1 + $0x8] sm:$0xff]  ;;  %v114_v1 = vld [vmem:[%s183_s1] sm:$0xff]  ;;  %v80_v8 = vld [vmem:[%s186_s3 + $0x10] sm:$0xff] }
   0x2   :  { %65 = vmatpush.bf16.msra.mxu0 %v115_v0  ;;  %116 = vmatpush.bf16.msra.mxu1 %v115_v0  ;;  %v112_v2 = vld [vmem:[%s185_s0] sm:$0xff]  ;;  %v113_v3 = vld [vmem:[%s185_s0 + $0x8] sm:$0xff]  ;;  %v81_v16 = vld [vmem:[%s186_s3 + $0x18] sm:$0xff] }
   0x3   :  { %v118_v4 = vld [vmem:[%s184_s2] ss:$0 sm:$0xff]  ;;  %v79_v14 = vld [vmem:[%s186_s3 + $0x8] sm:$0xff] }
   0x4   :  { %v78_v6 = vld [vmem:[%s186_s3] sm:$0xff] }
   0x6   :  { %66 = vmatpush.bf16.msra.mxu0 %v114_v1  ;;  %117 = vmatpush.bf16.msra.mxu1 %v114_v1 }
   0x9   :  { %110 = vmatmul.msk.bf16.vlgmr.msra.gmra.mxu0 %vm52_vm0, %v112_v2  ;;  %111 = vmatmul.msk.bf16.vlgmr.msra.gmra.mxu1 %vm52_vm0, %v113_v3 }
  0x86   :  { %v68_v5 = vpop.f32.mrf.mxu0  ;;  %v73_v7 = vpop.f32.mrf.mxu1 }
  0x87   :  { %v69_v9 = vadd.f32 %v118_v4, %v68_v5  ;;  %v74_v10 = vadd.f32 %v118_v4, %v73_v7 }
  0x89   :  { %v82_v11 = vadd.f32 %v78_v6, %v69_v9  ;;  %v84_v12 = vadd.f32 %v80_v8, %v74_v10 }
  0x8b   :  { %86 = vst [vmem:[%s187_s4] sm:$0xff] %v82_v11 }
  0x8c   :  { %88 = vst [vmem:[%s187_s4 + $0x10] sm:$0xff] %v84_v12 }
  0x8e   :  { %v70_v13 = vpop.f32.mrf.mxu0  ;;  %v75_v15 = vpop.f32.mrf.mxu1 }
  0x8f   :  { %v71_v17 = vadd.f32 %v118_v4, %v70_v13  ;;  %v76_v18 = vadd.f32 %v118_v4, %v75_v15 }
  0x91   :  { %v83_v19 = vadd.f32 %v79_v14, %v71_v17  ;;  %v85_v20 = vadd.f32 %v81_v16, %v76_v18 }
  0x93   :  { %87 = vst [vmem:[%s187_s4 + $0x8] sm:$0xff] %v83_v19 }
  0x94   :  { %89 = vst [vmem:[%s187_s4 + $0x18] sm:$0xff] %v85_v20 }

// kernel: vit_forward.23
= control target key start
LH: loop header
LB: loop body
LE: loop exit
PB: predicated region body
PF: predicated region fallthrough
CT: control target
= control target key end

     0   :  { %vm22_vm0 = vcmask 261120   ;;  %v227_v8 = vmov 32.0   ;;  %s313_s0 = inlined_call_operand.vmem [shape: f32[32,32], index: 0, kind: input, shape index: {}]   ;;  %s314_s2 = inlined_call_operand.vmem [shape: f32[1,32], index: 2, kind: input, shape index: {}]   ;;  %s315_s3 = inlined_call_operand.vmem [shape: f32[1,32], index: 3, kind: input, shape index: {}]   ;;  %s316_s1 = inlined_call_operand.vmem [shape: bf16[32,128], index: 1, kind: input, shape index: {}]   ;;  %s317_s4 = inlined_call_operand.vmem [shape: bf16[32,128], index: 4, kind: output, shape index: {}]  }
   0x1   :  { %v20_v0 = vld [vmem:[%s313_s0 + $0x10] sm:$0xff]  ;;  %v18_v1 = vld [vmem:[%s313_s0] sm:$0xff]  ;;  %v21_v4 = vld [vmem:[%s313_s0 + $0x18] sm:$0xff]  ;;  %217 = vrcp.f32 %v227_v8 }
   0x2   :  { %v29_v2 = vsel %vm22_vm0, %v20_v0, 0.0  ;;  %v23_v3 = vsel %vm22_vm0, %v18_v1, 0.0  ;;  %v19_v5 = vld [vmem:[%s313_s0 + $0x8] sm:$0xff]  ;;  %v32_v6 = vsel %vm22_vm0, %v21_v4, 0.0  ;;  %v199_v40 = vld [vmem:[%s316_s1] sm:$0xff] }
   0x3   :  { %30 = vadd.xlane.f32.xlu1 %v29_v2  ;;  %24 = vadd.xlane.f32.xlu0 %v23_v3  ;;  %v26_v7 = vsel %vm22_vm0, %v19_v5, 0.0  ;;  %v200_v35 = vld [vmem:[%s316_s1 + $0x8] sm:$0xff] }
   0x4   :  { %164 = vmatpush.bf16.msra.mxu0 %v200_v35  ;;  %212 = vmatpush.bf16.msra.mxu1 %v200_v35 }
   0x7   :  { %v218_v9 = vpop.eup %217 }
   0x8   :  { %v36_v10 = vmul.f32 32.0, %v218_v9  ;;  %vm40_vm1 = vweird.f32 %v218_v9  ;;  %165 = vmatpush.bf16.msra.mxu0 %v199_v40  ;;  %213 = vmatpush.bf16.msra.mxu1 %v199_v40 }
   0xa   :  { %v37_v11 = vsub.f32 1.0, %v36_v10  ;;  %v215_v10 = vld [vmem:[%s314_s2] ss:$0 sm:$0xff] }
   0xb   :  { %33 = vadd.xlane.f32.xlu1 %v32_v6  ;;  %27 = vadd.xlane.f32.xlu0 %v26_v7 }
   0xc   :  { %v38_v12 = vmul.f32 %v218_v9, %v37_v11 }
   0xe   :  { %v39_v13 = vadd.f32 %v218_v9, %v38_v12 }
  0x10   :  { %v41_v14 = vsel %vm40_vm1, %v218_v9, %v39_v13 }
  0x76   :  { %v31_v15 = vpop.xlane.xlu1 %30  ;;  %v25_v16 = vpop.xlane.xlu0 %24 }
  0x77   :  { %v44_v17 = vmul.f32 %v41_v14, %v31_v15  ;;  %v42_v18 = vmul.f32 %v41_v14, %v25_v16 }
  0x79   :  { %v269_v19 = vsub.f32 %v20_v0, %v44_v17  ;;  %v271_v20 = vsub.f32 %v18_v1, %v42_v18  ;;  %v216_v17 = vld [vmem:[%s315_s3] ss:$0 sm:$0xff] }
  0x7b   :  { %v52_v21 = vmul.f32 %v269_v19, %v269_v19  ;;  %v50_v22 = vmul.f32 %v271_v20, %v271_v20 }
  0x7d   :  { %v60_v23 = vsel %vm22_vm0, %v52_v21, 0.0  ;;  %v54_v24 = vsel %vm22_vm0, %v50_v22, 0.0 }
  0x7e   :  { %v34_v25 = vpop.xlane.xlu1 %33  ;;  %61 = vadd.xlane.f32.xlu0 %v60_v23  ;;  %55 = vadd.xlane.f32.xlu2 %v54_v24  ;;  %v28_v26 = vpop.xlane.xlu0 %27 }
  0x7f   :  { %v45_v27 = vmul.f32 %v41_v14, %v34_v25  ;;  %v43_v28 = vmul.f32 %v41_v14, %v28_v26 }
  0x81   :  { %v279_v29 = vsub.f32 %v21_v4, %v45_v27  ;;  %v281_v30 = vsub.f32 %v19_v5, %v43_v28 }
  0x83   :  { %v53_v31 = vmul.f32 %v279_v29, %v279_v29  ;;  %v51_v32 = vmul.f32 %v281_v30, %v281_v30 }
  0x85   :  { %v63_v33 = vsel %vm22_vm0, %v53_v31, 0.0  ;;  %v57_v34 = vsel %vm22_vm0, %v51_v32, 0.0 }
  0x86   :  { %64 = vadd.xlane.f32.xlu1 %v63_v33  ;;  %58 = vadd.xlane.f32.xlu2 %v57_v34 }
  0xf1   :  { %v56_v36 = vpop.xlane.xlu2 %55  ;;  %v62_v37 = vpop.xlane.xlu0 %61 }
  0xf2   :  { %v66_v38 = vmul.f32 %v56_v36, %v41_v14  ;;  %v68_v39 = vmul.f32 %v62_v37, %v41_v14 }
  0xf4   :  { %v70_v41 = vadd.f32 1e-05, %v66_v38  ;;  %v72_v42 = vadd.f32 1e-05, %v68_v39 }
  0xf6   :  { %219 = vrsqrt.f32 %v70_v41  ;;  %vm100_vm4 = vweird.f32 %v72_v42  ;;  %vm80_vm5 = vweird.f32 %v70_v41 }
  0xf7   :  { %221 = vrsqrt.f32 %v72_v42 }
  0xf9   :  { %v65_v43 = vpop.xlane.xlu1 %64  ;;  %v59_v44 = vpop.xlane.xlu2 %58 }
  0xfa   :  { %v69_v45 = vmul.f32 %v65_v43, %v41_v14  ;;  %v67_v46 = vmul.f32 %v59_v44, %v41_v14 }
  0xfc   :  { %v220_v47 = vpop.eup %219  ;;  %v73_v48 = vadd.f32 1e-05, %v69_v45  ;;  %v71_v49 = vadd.f32 1e-05, %v67_v46 }
  0xfd   :  { %v222_v50 = vpop.eup %221  ;;  %v75_v51 = vmul.f32 %v220_v47, %v70_v41  ;;  %vm81_vm3 = vweird.f32 %v220_v47 }
  0xfe   :  { %v95_v52 = vmul.f32 %v222_v50, %v72_v42  ;;  %223 = vrsqrt.f32 %v73_v48  ;;  %vm101_vm2 = vweird.f32 %v222_v50  ;;  %vm82_vm7 = vmor %vm80_vm5, %vm81_vm3  ;;  %vm110_vm10 = vweird.f32 %v73_v48 }
  0xff   :  { %v76_v53 = vmul.f32 %v220_v47, %v75_v51  ;;  %225 = vrsqrt.f32 %v71_v49  ;;  %vm102_vm6 = vmor %vm100_vm4, %vm101_vm2  ;;  %vm90_vm12 = vweird.f32 %v71_v49 }
 0x100   :  { %v96_v54 = vmul.f32 %v222_v50, %v95_v52 }
 0x101   :  { %v77_v55 = vmul.f32 0.5, %v76_v53 }
 0x102   :  { %v97_v56 = vmul.f32 0.5, %v96_v54 }
 0x103   :  { %v78_v57 = vsub.f32 1.5, %v77_v55 }
 0x104   :  { %v224_v58 = vpop.eup %223  ;;  %v98_v59 = vsub.f32 1.5, %v97_v56 }
 0x105   :  { %v226_v60 = vpop.eup %225  ;;  %v105_v61 = vmul.f32 %v224_v58, %v73_v48  ;;  %v79_v62 = vmul.f32 %v220_v47, %v78_v57  ;;  %vm111_vm8 = vweird.f32 %v224_v58 }
 0x106   :  { %v99_v63 = vmul.f32 %v222_v50, %v98_v59  ;;  %v85_v0 = vmul.f32 %v226_v60, %v71_v49  ;;  %vm91_vm9 = vweird.f32 %v226_v60  ;;  %vm112_vm11 = vmor %vm110_vm10, %vm111_vm8 }
 0x107   :  { %v106_v1 = vmul.f32 %v224_v58, %v105_v61  ;;  %v83_v5 = vsel %vm82_vm7, %v220_v47, %v79_v62  ;;  %vm92_vm13 = vmor %vm90_vm12, %vm91_vm9 }
 0x108   :  { %v86_v2 = vmul.f32 %v226_v60, %v85_v0  ;;  %v103_v3 = vsel %vm102_vm6, %v222_v50, %v99_v63  ;;  %v114_v11 = vmul.f32 %v83_v5, %v271_v20 }
 0x109   :  { %v107_v4 = vmul.f32 0.5, %v106_v1  ;;  %v116_v8 = vmul.f32 %v103_v3, %v269_v19 }
 0x10a   :  { %v87_v6 = vmul.f32 0.5, %v86_v2  ;;  %v122_v21 = vmul.f32 %v215_v10, %v114_v11 }
 0x10b   :  { %v108_v7 = vsub.f32 1.5, %v107_v4  ;;  %v124_v18 = vmul.f32 %v215_v10, %v116_v8 }
 0x10c   :  { %v88_v9 = vsub.f32 1.5, %v87_v6  ;;  %v130_v25 = vadd.f32 %v216_v17, %v122_v21 }
 0x10d   :  { %v109_v12 = vmul.f32 %v224_v58, %v108_v7  ;;  %v132_v23 = vadd.f32 %v216_v17, %v124_v18 }
 0x10e   :  { %v89_v13 = vmul.f32 %v226_v60, %v88_v9 }
 0x10f   :  { %v113_v14 = vsel %vm112_vm11, %v224_v58, %v109_v12 }
 0x110   :  { %v117_v15 = vmul.f32 %v113_v14, %v279_v29  ;;  %v93_v16 = vsel %vm92_vm13, %v226_v60, %v89_v13 }
 0x111   :  { %v115_v19 = vmul.f32 %v93_v16, %v281_v30 }
 0x112   :  { %v125_v22 = vmul.f32 %v215_v10, %v117_v15 }
 0x113   :  { %v123_v20 = vmul.f32 %v215_v10, %v115_v19 }
 0x114   :  { %v133_v24 = vadd.f32 %v216_v17, %v125_v22 }
 0x115   :  { %v131_v26 = vadd.f32 %v216_v17, %v123_v20 }
 0x116   :  { %v135_v27 = vpack.c.bf16 %v133_v24, %v132_v23 }
 0x117   :  { %v134_v28 = vpack.c.bf16 %v131_v26, %v130_v25 }
 0x118   :  { %198 = vmatmul.msk.bf16.vlgmr.msra.gmra.mxu1 %vm22_vm0, %v135_v27 }
 0x119   :  { %197 = vmatmul.msk.bf16.vlgmr.msra.gmra.mxu0 %vm22_vm0, %v134_v28 }
 0x195   :  { %v172_v29 = vpop.f32.mrf.mxu1 }
 0x196   :  { %v167_v31 = vpop.f32.mrf.mxu0 }
 0x19d   :  { %v174_v32 = vpop.f32.mrf.mxu1 }
 0x19e   :  { %v169_v33 = vpop.f32.mrf.mxu0  ;;  %v209_v34 = vpack.c.bf16 %v174_v32, %v172_v29 }
 0x19f   :  { %v204_v35 = vpack.c.bf16 %v169_v33, %v167_v31 }
 0x1a0   :  { %211 = vst [vmem:[%s317_s4 + $0x8] sm:$0xff] %v209_v34  }
 0x1a1   :  { %205 = vst [vmem:[%s317_s4] sm:$0xff] %v204_v35  }

// kernel: vit_forward.24
= control target key start
LH: loop header
LB: loop body
LE: loop exit
PB: predicated region body
PF: predicated region fallthrough
CT: control target
= control target key end

     0   :  { %8 = vsyncpa [#allocation3], 0  ;;  %s850_s12 = smov 0   ;;  %s981_s0 = inlined_call_operand.vmem [shape: bf16[2,16,96], index: 0, kind: input, shape index: {}]   ;;  %s982_s1 = inlined_call_operand.vmem [shape: f32[4,16,16], index: 1, kind: input, shape index: {}]   ;;  %s983_s2 = inlined_call_operand.vmem [shape: f32[4], index: 2, kind: input, shape index: {}]   ;;  %s984_s3 = inlined_call_operand.vmem [shape: bf16[2,16,32], index: 3, kind: output, shape index: {}]  }
   0x1 LB: > { %s655_s13 = sadd.s32 4294967295, %s813_s12   ;;  %p657_p0 = scmp.ge.s32.totalorder %s813_s12, 1  ;;  %s813_s12 = sphi %s850_s12, %s14_s12  }
   0x2   : > { %p113_p1 = scmp.lt.s32.totalorder %s813_s12, 3  ;;  %s128_s16 = sshll.u32 %s983_s2, 4  ;;  %s129_s16 = int_to_ptr.vmem [resolvable:$true] %s128_s16 }
   0x3   : > { %p700_p3 = scmp.eq.s32.totalorder %s655_s13, 0  ;;  %s815_s17 = smov [#allocation2]  }
   0x4   : > { %p114_p2 = pnand %p657_p0, %p113_p1 }
   0x6   : > { %p696_p4 = pneg %p114_p2  ;;  %149 = sbr.rel (%p114_p2) target bundleno = 1495 (0x5d7), region = 32 }
   0x8   : > { %p697_p5 = pnand %p700_p3, %p696_p4 }
   0xa   : > { %699 = dma.vmem_to_smem (!%p697_p5), %s129_s16, 16, %s815_s17, [#allocation3]  }
   0xb   : > { %808 = dma.done.wait (%p700_p3), [#allocation3], 16  }
   0xc   : > { %810 = vsyncadd (%p700_p3), [#allocation3], 4294967280 }
   0xd   : > { %156 = sfence }
   0xe   : > { %p175_p6 = scmp.lt.s32.totalorder %s655_s13, 1  ;;  %s816_s22 = smov 96   ;;  %vm195_vm0 = vcmask 64512   ;;  %vm216_vm1 = vcmask 130048   ;;  %v244_v18 = vld [vmem:[%s982_s1] sm:$0xff]  ;;  %v245_v27 = vld [vmem:[%s982_s1 + $0x8] sm:$0xff] }
   0xf   : > { %s817_s23 = smov 88   ;;  %s818_s24 = smov 112   ;;  %vm580_vm2 = vcmask 195584   ;;  %vm585_vm3 = vcmask 257024  }
  0x10   : > { %s986_s13 = smov (!%p175_p6, %s655_s13), 1  ;;  %s819_s25 = smov 64  }
  0x11   : > { %s689_s18 = sshll.u32 %s986_s13, 3  ;;  %s820_s26 = smov 80  }
  0x12   : > { %s179_s21 = scalar_lea.vmem %s981_s0, %s689_s18  ;;  %s821_s27 = smov 72  }
  0x13   : > { %v869_v0 = vld [vmem:[%s179_s21] sm:$0xff]  ;;  %s822_s28 = smov 104   ;;  %s239_s29 = sld [smem:[#allocation2]] }
  0x14   : > { %193 = vrot.lane.b32.xlu0 %v869_v0, %s816_s22  ;;  %s823_s8 = smov 120   ;;  %s824_s9 = smov 56  }
  0x15   : > { %s673_s10 = sld [smem:[#allocation2 + $0x1]]  ;;  %s825_s4 = smov 48  }
  0x16   : > { %s927_s16 = sld [smem:[#allocation2 + $0x3]]  ;;  %s826_s5 = smov 40  }
  0x17   : > { %s936_s20 = sld [smem:[#allocation2 + $0x2]]  ;;  %s827_s6 = smov 8  }
  0x18   : > { %s828_s7 = smov 24  }
  0x19   : > { %s240_s30 = ssub.f32 1.0, %s239_s29  ;;  %v246_v19 = vstv %s239_s29 }
  0x1a   : > { %v247_v24 = vmul.f32 %v246_v19, %v244_v18  ;;  %v248_v31 = vmul.f32 %v246_v19, %v245_v27 }
  0x1b   : > { %v241_v21 = vstv %s240_s30  ;;  %s329_s11 = ssub.f32 1.0, %s673_s10 }
  0x1c   : > { %s509_s21 = ssub.f32 1.0, %s927_s16 }
  0x86   : > { %v194_v1 = vpop.permute.xlu0 %193 }
  0x87   : > { %v200_v2 = vsel %vm195_vm0, %v194_v1, 0 }
  0x88   : > { %209 = vmatpush.bf16.xpose.msra.mxu0 %v200_v2 }
  0x8f   : > { %670 = vmatmul.msk.bf16.vlgmr.msra.gmra.mxu0 %vm195_vm0, %v869_v0 }
 0x10c   : > { %v211_v3 = vpop.f32.mrf.mxu0 }
 0x10d   : > { %v217_v4 = vsel %vm216_vm1, %v211_v3, -inf }
 0x10e   : > { %218 = vmax.xlane.f32.xlu0 %v217_v4 }
 0x114   : > { %v213_v5 = vpop.f32.mrf.mxu0 }
 0x115   : > { %v220_v6 = vsel %vm216_vm1, %v213_v5, -inf }
 0x116   : > { %221 = vmax.xlane.f32.xlu1 %v220_v6 }
 0x122   : > { %372 = vrot.lane.b32.xlu0 %v869_v0, %s818_s24 }
 0x181   : > { %v219_v7 = vpop.xlane.xlu0 %218 }
 0x182   : > { %v223_v8 = vsub.f32 %v211_v3, %v219_v7 }
 0x184   : > { %v225_v9 = vmul.f32 1.442695, %v223_v8 }
 0x186   : > { %740 = vpow2.f32 %v225_v9 }
 0x189   : > { %v222_v10 = vpop.xlane.xlu1 %221 }
 0x18a   : > { %v224_v11 = vsub.f32 %v213_v5, %v222_v10 }
 0x18c   : > { %v741_v12 = vpop.eup %740  ;;  %v227_v13 = vmul.f32 1.442695, %v224_v11 }
 0x18d   : > { %v229_v14 = vsel %vm216_vm1, %v741_v12, 0.0 }
 0x18e   : > { %742 = vpow2.f32 %v227_v13  ;;  %230 = vadd.xlane.f32.xlu1 %v229_v14 }
 0x194   : > { %v743_v15 = vpop.eup %742  ;;  %v373_v51 = vpop.permute.xlu0 %372 }
 0x195   : > { %v232_v16 = vsel %vm216_vm1, %v743_v15, 0.0 }
 0x196   : > { %233 = vadd.xlane.f32.xlu2 %v232_v16 }
 0x1ae   : > { %284 = vrot.lane.b32.xlu2 %v869_v0, %s817_s23 }
 0x1b6   : > { %262 = vrot.lane.b32.xlu2 %v869_v0, %s819_s25 }
 0x1be   : > { %374 = vrot.lane.b32.xlu2 %v869_v0, %s820_s26  ;;  %s419_s26 = ssub.f32 1.0, %s936_s20 }
 0x1c6   : > { %464 = vrot.lane.b32.xlu2 %v869_v0, %s821_s27 }
 0x1ce   : > { %462 = vrot.lane.b32.xlu2 %v869_v0, %s822_s28 }
 0x201   : > { %v231_v17 = vpop.xlane.xlu1 %230 }
 0x202   : > { %744 = vrcp.f32 %v231_v17 }
 0x208   : > { %v745_v20 = vpop.eup %744 }
 0x209   : > { %v234_v22 = vpop.xlane.xlu2 %233  ;;  %v237_v23 = vmul.f32 %v745_v20, %v741_v12 }
 0x20a   : > { %746 = vrcp.f32 %v234_v22 }
 0x20b   : > { %v242_v25 = vmul.f32 %v241_v21, %v237_v23 }
 0x20d   : > { %v249_v26 = vadd.f32 %v247_v24, %v242_v25 }
 0x20f   : > { %v251_v28 = vsel %vm216_vm1, %v249_v26, 0.0 }
 0x210   : > { %v747_v29 = vpop.eup %746  ;;  %252 = vadd.xlane.f32.xlu1 %v251_v28 }
 0x211   : > { %v238_v30 = vmul.f32 %v747_v29, %v743_v15  ;;  %v285_v35 = vpop.permute.xlu2 %284 }
 0x212   : > { %v290_v37 = vsel %vm195_vm0, %v285_v35, 0  ;;  %v336_v35 = vstv %s673_s10 }
 0x213   : > { %v243_v32 = vmul.f32 %v241_v21, %v238_v30  ;;  %299 = vmatpush.bf16.xpose.msra.mxu2 %v290_v37  ;;  %v330_v37 = vstv %s329_s11  ;;  %s184_s11 = scalar_lea.vmem %s984_s3, %s689_s18 }
 0x215   : > { %v250_v33 = vadd.f32 %v248_v31, %v243_v32 }
 0x217   : > { %v254_v34 = vsel %vm216_vm1, %v250_v33, 0.0 }
 0x218   : > { %255 = vadd.xlane.f32.xlu1 %v254_v34  ;;  %v674_v34 = vld [vmem:[%s982_s1 + $0x10] sm:$0xff] }
 0x219   : > { %v263_v36 = vpop.permute.xlu2 %262 }
 0x21a   : > { %275 = vmatpush.bf16.msra.mxu1 %v263_v36 }
 0x221   : > { %v375_v38 = vpop.permute.xlu2 %374 }
 0x222   : > { %v380_v39 = vsel %vm195_vm0, %v375_v38, 0 }
 0x223   : > { %389 = vmatpush.bf16.xpose.msrb.mxu1 %v380_v39 }
 0x229   : > { %v465_v41 = vpop.permute.xlu2 %464 }
 0x22a   : > { %v470_v42 = vsel %vm195_vm0, %v465_v41, 0 }
 0x22b   : > { %479 = vmatpush.bf16.xpose.msrb.mxu0 %v470_v42 }
 0x231   : > { %282 = vrot.lane.b32.xlu1 %v869_v0, %s823_s8  ;;  %v463_v44 = vpop.permute.xlu2 %462  ;;  %s829_s8 = smov 16  }
 0x232   : > { %682 = vmatmul.msk.bf16.vlgmr.msrb.gmra.mxu0 %vm195_vm0, %v463_v44 }
 0x283   : > { %v253_v40 = vpop.xlane.xlu1 %252 }
 0x284   : > { %748 = vrcp.f32 %v253_v40  ;;  %v337_v40 = vmul.f32 %v674_v34, %v336_v35 }
 0x28a   : > { %v749_v45 = vpop.eup %748 }
 0x28b   : > { %v256_v43 = vpop.xlane.xlu1 %255  ;;  %v259_v47 = vmul.f32 %v749_v45, %v249_v26 }
 0x28c   : > { %750 = vrcp.f32 %v256_v43 }
 0x292   : > { %v751_v46 = vpop.eup %750 }
 0x293   : > { %v260_v48 = vmul.f32 %v751_v46, %v250_v33  ;;  %v675_v46 = vld [vmem:[%s982_s1 + $0x18] sm:$0xff] }
 0x295   : > { %v261_v49 = vpack.c.bf16 %v260_v48, %v259_v47 }
 0x297   : > { %671 = vmatmul.msk.bf16.vlgmr.msra.gmra.mxu1 %vm216_vm1, %v261_v49 }
 0x2a3   : > { %v283_v50 = vpop.permute.xlu1 %282 }
 0x2a4   : > { %672 = vmatmul.msk.bf16.vlgmr.msra.gmra.mxu2 %vm195_vm0, %v283_v50 }
 0x2a7   : > { %677 = vmatmul.msk.bf16.vlgmr.msrb.gmra.mxu1 %vm195_vm0, %v373_v51  ;;  %v338_v51 = vmul.f32 %v675_v46, %v336_v35 }
 0x2af   : > { %v481_v58 = vpop.f32.mrf.mxu0 }
 0x2b0   : > { %v486_v2 = vsel %vm216_vm1, %v481_v58, -inf }
 0x2b7   : > { %v483_v63 = vpop.f32.mrf.mxu0 }
 0x2b8   : > { %v489_v1 = vsel %vm216_vm1, %v483_v63, -inf }
 0x314   : > { %v901_v52 = vpop.f32.mrf.mxu1 }
 0x31c   : > { %v903_v53 = vpop.f32.mrf.mxu1 }
 0x324   : > { %v391_v54 = vpop.f32.mrf.mxu1 }
 0x325   : > { %v396_v55 = vsel %vm216_vm1, %v391_v54, -inf }
 0x326   : > { %397 = vmax.xlane.f32.xlu0 %v396_v55 }
 0x327   : > { %v301_v56 = vpop.f32.mrf.mxu2 }
 0x328   : > { %v306_v57 = vsel %vm216_vm1, %v301_v56, -inf }
 0x329   : > { %307 = vmax.xlane.f32.xlu1 %v306_v57  ;;  %v685_v57 = vld [vmem:[%s982_s1 + $0x38] sm:$0xff] }
 0x32c   : > { %v393_v59 = vpop.f32.mrf.mxu1 }
 0x32d   : > { %v399_v60 = vsel %vm216_vm1, %v393_v59, -inf }
 0x32f   : > { %v303_v61 = vpop.f32.mrf.mxu2 }
 0x330   : > { %v309_v62 = vsel %vm216_vm1, %v303_v61, -inf }
 0x331   : > { %400 = vmax.xlane.f32.xlu1 %v399_v60  ;;  %310 = vmax.xlane.f32.xlu2 %v309_v62  ;;  %v684_v60 = vld [vmem:[%s982_s1 + $0x30] sm:$0xff] }
 0x339   : > { %490 = vmax.xlane.f32.xlu1 %v489_v1  ;;  %487 = vmax.xlane.f32.xlu2 %v486_v2 }
 0x399   : > { %v398_v3 = vpop.xlane.xlu0 %397 }
 0x39a   : > { %v402_v4 = vsub.f32 %v391_v54, %v398_v3 }
 0x39c   : > { %v404_v5 = vmul.f32 1.442695, %v402_v4  ;;  %v308_v6 = vpop.xlane.xlu1 %307 }
 0x39d   : > { %v312_v7 = vsub.f32 %v301_v56, %v308_v6 }
 0x39e   : > { %752 = vpow2.f32 %v404_v5 }
 0x39f   : > { %v314_v8 = vmul.f32 1.442695, %v312_v7 }
 0x3a1   : > { %754 = vpow2.f32 %v314_v8 }
 0x3a4   : > { %v911_v9 = vpop.eup %752  ;;  %v401_v10 = vpop.xlane.xlu1 %400 }
 0x3a5   : > { %v311_v11 = vpop.xlane.xlu2 %310  ;;  %v403_v12 = vsub.f32 %v393_v59, %v401_v10  ;;  %v408_v14 = vsel %vm216_vm1, %v911_v9, 0.0  ;;  %v426_v10 = vstv %s936_s20 }
 0x3a6   : > { %v313_v13 = vsub.f32 %v303_v61, %v311_v11  ;;  %409 = vadd.xlane.f32.xlu1 %v408_v14  ;;  %v420_v14 = vstv %s419_s26 }
 0x3a7   : > { %v755_v15 = vpop.eup %754  ;;  %v406_v16 = vmul.f32 1.442695, %v403_v12  ;;  %v679_v12 = vld [vmem:[%s982_s1 + $0x20] sm:$0xff] }
 0x3a8   : > { %v316_v17 = vmul.f32 1.442695, %v313_v13  ;;  %v318_v18 = vsel %vm216_vm1, %v755_v15, 0.0 }
 0x3a9   : > { %756 = vpow2.f32 %v406_v16  ;;  %319 = vadd.xlane.f32.xlu0 %v318_v18  ;;  %v427_v18 = vmul.f32 %v679_v12, %v426_v10 }
 0x3aa   : > { %758 = vpow2.f32 %v316_v17 }
 0x3ac   : > { %v491_v19 = vpop.xlane.xlu1 %490 }
 0x3ad   : > { %v488_v20 = vpop.xlane.xlu2 %487  ;;  %v493_v21 = vsub.f32 %v483_v63, %v491_v19  ;;  %v510_v63 = vstv %s509_s21 }
 0x3ae   : > { %v492_v22 = vsub.f32 %v481_v58, %v488_v20  ;;  %v516_v58 = vstv %s927_s16 }
 0x3af   : > { %v916_v23 = vpop.eup %756  ;;  %v496_v24 = vmul.f32 1.442695, %v493_v21  ;;  %v518_v3 = vmul.f32 %v685_v57, %v516_v58  ;;  %v517_v5 = vmul.f32 %v684_v60, %v516_v58 }
 0x3b0   : > { %v494_v25 = vmul.f32 1.442695, %v492_v22  ;;  %v759_v26 = vpop.eup %758  ;;  %v411_v27 = vsel %vm216_vm1, %v916_v23, 0.0 }
 0x3b1   : > { %760 = vpow2.f32 %v496_v24  ;;  %412 = vadd.xlane.f32.xlu0 %v411_v27  ;;  %v321_v28 = vsel %vm216_vm1, %v759_v26, 0.0 }
 0x3b2   : > { %762 = vpow2.f32 %v494_v25  ;;  %322 = vadd.xlane.f32.xlu2 %v321_v28 }
 0x3b7   : > { %v761_v29 = vpop.eup %760 }
 0x3b8   : > { %v763_v30 = vpop.eup %762  ;;  %v501_v31 = vsel %vm216_vm1, %v761_v29, 0.0 }
 0x3b9   : > { %502 = vadd.xlane.f32.xlu1 %v501_v31  ;;  %v498_v32 = vsel %vm216_vm1, %v763_v30, 0.0 }
 0x3ba   : > { %499 = vadd.xlane.f32.xlu2 %v498_v32 }
 0x3d2   : > { %352 = vrot.lane.b32.xlu1 %v869_v0, %s824_s9 }
 0x419   : > { %v410_v38 = vpop.xlane.xlu1 %409 }
 0x41c   : > { %v320_v33 = vpop.xlane.xlu0 %319 }
 0x41d   : > { %764 = vrcp.f32 %v320_v33 }
 0x423   : > { %v765_v36 = vpop.eup %764 }
 0x424   : > { %v326_v39 = vmul.f32 %v765_v36, %v755_v15  ;;  %v413_v44 = vpop.xlane.xlu0 %412  ;;  %v680_v15 = vld [vmem:[%s982_s1 + $0x28] sm:$0xff] }
 0x425   : > { %v323_v41 = vpop.xlane.xlu2 %322  ;;  %v428_v21 = vmul.f32 %v680_v15, %v426_v10 }
 0x426   : > { %766 = vrcp.f32 %v323_v41  ;;  %v331_v42 = vmul.f32 %v330_v37, %v326_v39 }
 0x427   : > { %768 = vrcp.f32 %v410_v38 }
 0x428   : > { %v929_v43 = vadd.f32 %v337_v40, %v331_v42  ;;  %770 = vrcp.f32 %v413_v44 }
 0x42a   : > { %v341_v45 = vsel %vm216_vm1, %v929_v43, 0.0 }
 0x42b   : > { %342 = vadd.xlane.f32.xlu0 %v341_v45 }
 0x42c   : > { %v767_v47 = vpop.eup %766  ;;  %v503_v48 = vpop.xlane.xlu1 %502 }
 0x42d   : > { %772 = vrcp.f32 %v503_v48  ;;  %v500_v49 = vpop.xlane.xlu2 %499  ;;  %v327_v50 = vmul.f32 %v767_v47, %v759_v26  ;;  %v769_v55 = vpop.eup %768 }
 0x42e   : > { %774 = vrcp.f32 %v500_v49  ;;  %v771_v59 = vpop.eup %770  ;;  %v416_v11 = vmul.f32 %v769_v55, %v911_v9 }
 0x42f   : > { %v332_v54 = vmul.f32 %v330_v37, %v327_v50  ;;  %v417_v8 = vmul.f32 %v771_v59, %v916_v23 }
 0x430   : > { %v421_v22 = vmul.f32 %v420_v14, %v416_v11 }
 0x431   : > { %v340_v56 = vadd.f32 %v338_v51, %v332_v54  ;;  %v422_v20 = vmul.f32 %v420_v14, %v417_v8 }
 0x432   : > { %v429_v23 = vadd.f32 %v427_v18, %v421_v22 }
 0x433   : > { %v773_v61 = vpop.eup %772  ;;  %v344_v62 = vsel %vm216_vm1, %v340_v56, 0.0  ;;  %v430_v9 = vadd.f32 %v428_v21, %v422_v20 }
 0x434   : > { %v775_v1 = vpop.eup %774  ;;  %345 = vadd.xlane.f32.xlu2 %v344_v62  ;;  %v507_v2 = vmul.f32 %v773_v61, %v761_v29  ;;  %v431_v25 = vsel %vm216_vm1, %v429_v23, 0.0 }
 0x435   : > { %v506_v4 = vmul.f32 %v775_v1, %v763_v30  ;;  %v434_v24 = vsel %vm216_vm1, %v430_v9, 0.0 }
 0x436   : > { %v512_v6 = vmul.f32 %v510_v63, %v507_v2 }
 0x437   : > { %v511_v7 = vmul.f32 %v510_v63, %v506_v4 }
 0x438   : > { %v520_v13 = vadd.f32 %v518_v3, %v512_v6 }
 0x439   : > { %v519_v16 = vadd.f32 %v517_v5, %v511_v7 }
 0x43a   : > { %v524_v17 = vsel %vm216_vm1, %v520_v13, 0.0 }
 0x43b   : > { %v521_v19 = vsel %vm216_vm1, %v519_v16, 0.0 }
 0x43c   : > { %525 = vadd.xlane.f32.xlu2 %v524_v17  ;;  %522 = vadd.xlane.f32.xlu0 %v521_v19 }
 0x444   : > { %435 = vadd.xlane.f32.xlu2 %v434_v24  ;;  %432 = vadd.xlane.f32.xlu0 %v431_v25  ;;  %v353_v26 = vpop.permute.xlu1 %352 }
 0x445   : > { %365 = vmatpush.bf16.msra.mxu3 %v353_v26 }
 0x458   : > { %442 = vrot.lane.b32.xlu0 %v869_v0, %s825_s4 }
 0x45c   : > { %532 = vrot.lane.b32.xlu2 %v869_v0, %s826_s5 }
 0x49e   : > { %v343_v27 = vpop.xlane.xlu0 %342 }
 0x49f   : > { %776 = vrcp.f32 %v343_v27 }
 0x4a5   : > { %v777_v29 = vpop.eup %776 }
 0x4a6   : > { %v349_v32 = vmul.f32 %v777_v29, %v929_v43 }
 0x4a7   : > { %v346_v28 = vpop.xlane.xlu2 %345 }
 0x4a8   : > { %778 = vrcp.f32 %v346_v28 }
 0x4ae   : > { %v779_v30 = vpop.eup %778 }
 0x4af   : > { %v526_v31 = vpop.xlane.xlu2 %525  ;;  %v350_v33 = vmul.f32 %v779_v30, %v340_v56  ;;  %v523_v34 = vpop.xlane.xlu0 %522 }
 0x4b0   : > { %780 = vrcp.f32 %v523_v34 }
 0x4b1   : > { %v351_v35 = vpack.c.bf16 %v350_v33, %v349_v32  ;;  %782 = vrcp.f32 %v526_v31 }
 0x4b3   : > { %676 = vmatmul.msk.bf16.vlgmr.msra.gmra.mxu3 %vm216_vm1, %v351_v35 }
 0x4b6   : > { %v781_v0 = vpop.eup %780 }
 0x4b7   : > { %v436_v36 = vpop.xlane.xlu2 %435  ;;  %v783_v37 = vpop.eup %782  ;;  %v529_v39 = vmul.f32 %v781_v0, %v519_v16 }
 0x4b8   : > { %v433_v38 = vpop.xlane.xlu0 %432  ;;  %v530_v40 = vmul.f32 %v783_v37, %v520_v13 }
 0x4b9   : > { %784 = vrcp.f32 %v433_v38 }
 0x4ba   : > { %786 = vrcp.f32 %v436_v36  ;;  %v531_v42 = vpack.c.bf16 %v530_v40, %v529_v39 }
 0x4bf   : > { %v533_v41 = vpop.permute.xlu2 %532  ;;  %v785_v43 = vpop.eup %784 }
 0x4c0   : > { %545 = vmatpush.bf16.msrb.mxu2 %v533_v41  ;;  %v787_v44 = vpop.eup %786  ;;  %v439_v45 = vmul.f32 %v785_v43, %v429_v23 }
 0x4c1   : > { %v440_v46 = vmul.f32 %v787_v44, %v430_v9 }
 0x4c3   : > { %686 = vmatmul.msk.bf16.vlgmr.msrb.gmra.mxu2 %vm216_vm1, %v531_v42  ;;  %v441_v48 = vpack.c.bf16 %v440_v46, %v439_v45 }
 0x4ca   : > { %v443_v47 = vpop.permute.xlu0 %442 }
 0x4cb   : > { %455 = vmatpush.bf16.msrb.mxu3 %v443_v47 }
 0x4ce   : > { %681 = vmatmul.msk.bf16.vlgmr.msrb.gmra.mxu3 %vm216_vm1, %v441_v48 }
 0x536   : > { %v367_v49 = vpop.f32.mrf.mxu3 }
 0x53e   : > { %v369_v50 = vpop.f32.mrf.mxu3 }
 0x53f   : > { %v725_v51 = vpack.i.bf16 %v369_v50, %v367_v49 }
 0x541   : > { %726 = vrot.lane.b32.xlu1 %v725_v51, %s827_s6 }
 0x546   : > { %v547_v54 = vpop.f32.mrf.mxu2 }
 0x54e   : > { %v549_v55 = vpop.f32.mrf.mxu2 }
 0x54f   : > { %v735_v56 = vpack.i.bf16 %v549_v55, %v547_v54 }
 0x551   : > { %v457_v57 = vpop.f32.mrf.mxu3  ;;  %736 = vrot.lane.b32.xlu0 %v735_v56, %s828_s7 }
 0x559   : > { %v459_v58 = vpop.f32.mrf.mxu3 }
 0x55a   : > { %v730_v59 = vpack.i.bf16 %v459_v58, %v457_v57 }
 0x55c   : > { %731 = vrot.lane.b32.xlu1 %v730_v59, %s829_s8 }
 0x5b3   : > { %v727_v60 = vpop.permute.xlu1 %726 }
 0x5b4   : > { %v729_v61 = vunpack.i.h.bf16 %v727_v60  ;;  %v728_v62 = vunpack.i.l.bf16 %v727_v60 }
 0x5b6   : > { %v577_v4 = vsel %vm195_vm0, %v903_v53, %v729_v61  ;;  %v576_v5 = vsel %vm195_vm0, %v901_v52, %v728_v62 }
 0x5c3   : > { %v737_v63 = vpop.permute.xlu0 %736 }
 0x5c4   : > { %v739_v6 = vunpack.i.h.bf16 %v737_v63  ;;  %v738_v7 = vunpack.i.l.bf16 %v737_v63 }
 0x5ce   : > { %v732_v1 = vpop.permute.xlu1 %731 }
 0x5cf   : > { %v734_v2 = vunpack.i.h.bf16 %v732_v1  ;;  %v733_v3 = vunpack.i.l.bf16 %v732_v1 }
 0x5d1   : > { %v579_v8 = vsel %vm216_vm1, %v577_v4, %v734_v2  ;;  %v578_v10 = vsel %vm216_vm1, %v576_v5, %v733_v3 }
 0x5d2   : > { %v581_v11 = vsel %vm580_vm2, %v578_v10, %v738_v7  ;;  %v582_v12 = vsel %vm580_vm2, %v579_v8, %v739_v6 }
 0x5d3   : > { %v583_v13 = vpack.c.bf16 %v581_v11, %v581_v11  ;;  %v584_v14 = vpack.c.bf16 %v582_v12, %v582_v12 }
 0x5d5   : > { %586 = vst.msk [vmem:[%s184_s11] sm:$0xf] %vm585_vm3, %v583_v13 }
 0x5d6   : > { %587 = vst.msk [vmem:[%s184_s11 + $0x4] sm:$0xf] %vm585_vm3, %v584_v14 }
 0x5d7 PF: > { %s14_s12 = sadd.s32 1, %s813_s12  }
 0x5d8   : > { %p11_p7 = scmp.ge.s32.totalorder %s14_s12, 4  }
 0x5da   :  { %13 = sbr.rel (!%p11_p7) target bundleno = 1 (0x1), region = 70 }
 0x5df   :  { %609 = vsyncpa [#allocation3], 1 }
 0x5e0   :  { %611 = vsyncpa [#allocation3 + $0x1], 1 }

// kernel: vit_forward.27
= control target key start
LH: loop header
LB: loop body
LE: loop exit
PB: predicated region body
PF: predicated region fallthrough
CT: control target
= control target key end

     0   :  { %s277_s1 = inlined_call_operand.vmem [shape: bf16[128,128], index: 1, kind: input, shape index: {}]   ;;  %s278_s2 = inlined_call_operand.vmem [shape: f32[1,128], index: 2, kind: input, shape index: {}]   ;;  %s279_s0 = inlined_call_operand.vmem [shape: bf16[32,128], index: 0, kind: input, shape index: {}]   ;;  %s280_s3 = inlined_call_operand.vmem [shape: f32[32,128], index: 3, kind: input, shape index: {}]   ;;  %s281_s4 = inlined_call_operand.vmem [shape: f32[32,128], index: 4, kind: output, shape index: {}]  }
   0x1   :  { %v185_v0 = vld [vmem:[%s277_s1 + $0x38] sm:$0xff]  ;;  %v184_v1 = vld [vmem:[%s277_s1 + $0x30] sm:$0xff]  ;;  %v183_v2 = vld [vmem:[%s277_s1 + $0x28] sm:$0xff] }
   0x2   :  { %101 = vmatpush.bf16.msra.mxu0 %v185_v0  ;;  %186 = vmatpush.bf16.msra.mxu1 %v185_v0  ;;  %v182_v3 = vld [vmem:[%s277_s1 + $0x20] sm:$0xff]  ;;  %v181_v4 = vld [vmem:[%s277_s1 + $0x18] sm:$0xff]  ;;  %v180_v5 = vld [vmem:[%s277_s1 + $0x10] sm:$0xff] }
   0x3   :  { %v179_v6 = vld [vmem:[%s277_s1 + $0x8] sm:$0xff]  ;;  %v178_v7 = vld [vmem:[%s277_s1] sm:$0xff]  ;;  %v122_v14 = vld [vmem:[%s280_s3 + $0x10] sm:$0xff] }
   0x4   :  { %v176_v8 = vld [vmem:[%s279_s0] sm:$0xff]  ;;  %v177_v9 = vld [vmem:[%s279_s0 + $0x8] sm:$0xff]  ;;  %v123_v22 = vld [vmem:[%s280_s3 + $0x18] sm:$0xff] }
   0x5   :  { %v194_v10 = vld [vmem:[%s278_s2] ss:$0 sm:$0xff]  ;;  %v121_v20 = vld [vmem:[%s280_s3 + $0x8] sm:$0xff] }
   0x6   :  { %102 = vmatpush.bf16.msra.mxu0 %v184_v1  ;;  %187 = vmatpush.bf16.msra.mxu1 %v184_v1  ;;  %v120_v12 = vld [vmem:[%s280_s3] sm:$0xff] }
   0xa   :  { %103 = vmatpush.bf16.msra.mxu0 %v183_v2  ;;  %188 = vmatpush.bf16.msra.mxu1 %v183_v2 }
   0xe   :  { %104 = vmatpush.bf16.msra.mxu0 %v182_v3  ;;  %189 = vmatpush.bf16.msra.mxu1 %v182_v3 }
  0x12   :  { %105 = vmatpush.bf16.msra.mxu0 %v181_v4  ;;  %190 = vmatpush.bf16.msra.mxu1 %v181_v4 }
  0x16   :  { %106 = vmatpush.bf16.msra.mxu0 %v180_v5  ;;  %191 = vmatpush.bf16.msra.mxu1 %v180_v5 }
  0x1a   :  { %107 = vmatpush.bf16.msra.mxu0 %v179_v6  ;;  %192 = vmatpush.bf16.msra.mxu1 %v179_v6 }
  0x1e   :  { %108 = vmatpush.bf16.msra.mxu0 %v178_v7  ;;  %193 = vmatpush.bf16.msra.mxu1 %v178_v7 }
  0x21   :  { %109 = vmatmul.bf16.vlgmr.msra.gmra.mxu0 %v176_v8  ;;  %114 = vmatmul.bf16.vlgmr.msra.gmra.mxu1 %v177_v9 }
  0x9e   :  { %v110_v11 = vpop.f32.mrf.mxu0  ;;  %v115_v13 = vpop.f32.mrf.mxu1 }
  0x9f   :  { %v111_v15 = vadd.f32 %v194_v10, %v110_v11  ;;  %v116_v16 = vadd.f32 %v194_v10, %v115_v13 }
  0xa1   :  { %v124_v17 = vadd.f32 %v120_v12, %v111_v15  ;;  %v126_v18 = vadd.f32 %v122_v14, %v116_v16 }
  0xa3   :  { %128 = vst [vmem:[%s281_s4] sm:$0xff] %v124_v17 }
  0xa4   :  { %130 = vst [vmem:[%s281_s4 + $0x10] sm:$0xff] %v126_v18 }
  0xa6   :  { %v112_v19 = vpop.f32.mrf.mxu0  ;;  %v117_v21 = vpop.f32.mrf.mxu1 }
  0xa7   :  { %v113_v23 = vadd.f32 %v194_v10, %v112_v19  ;;  %v118_v24 = vadd.f32 %v194_v10, %v117_v21 }
  0xa9   :  { %v125_v25 = vadd.f32 %v121_v20, %v113_v23  ;;  %v127_v26 = vadd.f32 %v123_v22, %v118_v24 }
  0xab   :  { %129 = vst [vmem:[%s281_s4 + $0x8] sm:$0xff] %v125_v25 }
  0xac   :  { %131 = vst [vmem:[%s281_s4 + $0x18] sm:$0xff] %v127_v26 }

// kernel: vit_forward.26
= control target key start
LH: loop header
LB: loop body
LE: loop exit
PB: predicated region body
PF: predicated region fallthrough
CT: control target
= control target key end

     0   :  { %vm25_vm0 = vcmask 261120   ;;  %v423_v8 = vmov 32.0   ;;  %s621_s0 = inlined_call_operand.vmem [shape: f32[32,32], index: 0, kind: input, shape index: {}]   ;;  %s622_s3 = inlined_call_operand.vmem [shape: f32[1,32], index: 3, kind: input, shape index: {}]   ;;  %s623_s4 = inlined_call_operand.vmem [shape: f32[1,32], index: 4, kind: input, shape index: {}]   ;;  %s624_s2 = inlined_call_operand.vmem [shape: f32[1,128], index: 2, kind: input, shape index: {}]   ;;  %s625_s1 = inlined_call_operand.vmem [shape: bf16[32,128], index: 1, kind: input, shape index: {}]   ;;  %s626_s5 = inlined_call_operand.vmem [shape: bf16[32,128], index: 5, kind: output, shape index: {}]  }
   0x1   :  { %v23_v0 = vld [vmem:[%s621_s0 + $0x10] sm:$0xff]  ;;  %v21_v1 = vld [vmem:[%s621_s0] sm:$0xff]  ;;  %v24_v4 = vld [vmem:[%s621_s0 + $0x18] sm:$0xff]  ;;  %405 = vrcp.f32 %v423_v8 }
   0x2   :  { %v32_v2 = vsel %vm25_vm0, %v23_v0, 0.0  ;;  %v26_v3 = vsel %vm25_vm0, %v21_v1, 0.0  ;;  %v22_v5 = vld [vmem:[%s621_s0 + $0x8] sm:$0xff]  ;;  %v35_v6 = vsel %vm25_vm0, %v24_v4, 0.0  ;;  %v386_v40 = vld [vmem:[%s625_s1] sm:$0xff] }
   0x3   :  { %33 = vadd.xlane.f32.xlu1 %v32_v2  ;;  %27 = vadd.xlane.f32.xlu0 %v26_v3  ;;  %v29_v7 = vsel %vm25_vm0, %v22_v5, 0.0  ;;  %v387_v35 = vld [vmem:[%s625_s1 + $0x8] sm:$0xff] }
   0x4   :  { %171 = vmatpush.bf16.msra.mxu0 %v387_v35  ;;  %399 = vmatpush.bf16.msra.mxu1 %v387_v35 }
   0x7   :  { %v406_v9 = vpop.eup %405 }
   0x8   :  { %v39_v10 = vmul.f32 32.0, %v406_v9  ;;  %vm43_vm1 = vweird.f32 %v406_v9  ;;  %172 = vmatpush.bf16.msra.mxu0 %v386_v40  ;;  %400 = vmatpush.bf16.msra.mxu1 %v386_v40 }
   0xa   :  { %v40_v11 = vsub.f32 1.0, %v39_v10  ;;  %v402_v10 = vld [vmem:[%s622_s3] ss:$0 sm:$0xff] }
   0xb   :  { %36 = vadd.xlane.f32.xlu1 %v35_v6  ;;  %30 = vadd.xlane.f32.xlu0 %v29_v7 }
   0xc   :  { %v41_v12 = vmul.f32 %v406_v9, %v40_v11 }
   0xe   :  { %v42_v13 = vadd.f32 %v406_v9, %v41_v12 }
  0x10   :  { %v44_v14 = vsel %vm43_vm1, %v406_v9, %v42_v13 }
  0x76   :  { %v34_v15 = vpop.xlane.xlu1 %33  ;;  %v28_v16 = vpop.xlane.xlu0 %27 }
  0x77   :  { %v47_v17 = vmul.f32 %v44_v14, %v34_v15  ;;  %v45_v18 = vmul.f32 %v44_v14, %v28_v16 }
  0x79   :  { %v470_v19 = vsub.f32 %v23_v0, %v47_v17  ;;  %v472_v20 = vsub.f32 %v21_v1, %v45_v18  ;;  %v403_v17 = vld [vmem:[%s623_s4] ss:$0 sm:$0xff] }
  0x7b   :  { %v55_v21 = vmul.f32 %v470_v19, %v470_v19  ;;  %v53_v22 = vmul.f32 %v472_v20, %v472_v20 }
  0x7d   :  { %v63_v23 = vsel %vm25_vm0, %v55_v21, 0.0  ;;  %v57_v24 = vsel %vm25_vm0, %v53_v22, 0.0 }
  0x7e   :  { %v37_v25 = vpop.xlane.xlu1 %36  ;;  %64 = vadd.xlane.f32.xlu0 %v63_v23  ;;  %58 = vadd.xlane.f32.xlu2 %v57_v24  ;;  %v31_v26 = vpop.xlane.xlu0 %30 }
  0x7f   :  { %v48_v27 = vmul.f32 %v44_v14, %v37_v25  ;;  %v46_v28 = vmul.f32 %v44_v14, %v31_v26 }
  0x81   :  { %v480_v29 = vsub.f32 %v24_v4, %v48_v27  ;;  %v482_v30 = vsub.f32 %v22_v5, %v46_v28 }
  0x83   :  { %v56_v31 = vmul.f32 %v480_v29, %v480_v29  ;;  %v54_v32 = vmul.f32 %v482_v30, %v482_v30 }
  0x85   :  { %v66_v33 = vsel %vm25_vm0, %v56_v31, 0.0  ;;  %v60_v34 = vsel %vm25_vm0, %v54_v32, 0.0 }
  0x86   :  { %67 = vadd.xlane.f32.xlu1 %v66_v33  ;;  %61 = vadd.xlane.f32.xlu2 %v60_v34 }
  0xf1   :  { %v59_v36 = vpop.xlane.xlu2 %58  ;;  %v65_v37 = vpop.xlane.xlu0 %64 }
  0xf2   :  { %v69_v38 = vmul.f32 %v59_v36, %v44_v14  ;;  %v71_v39 = vmul.f32 %v65_v37, %v44_v14 }
  0xf4   :  { %v73_v41 = vadd.f32 1e-05, %v69_v38  ;;  %v75_v42 = vadd.f32 1e-05, %v71_v39 }
  0xf6   :  { %407 = vrsqrt.f32 %v73_v41  ;;  %vm103_vm4 = vweird.f32 %v75_v42  ;;  %vm83_vm5 = vweird.f32 %v73_v41 }
  0xf7   :  { %409 = vrsqrt.f32 %v75_v42 }
  0xf9   :  { %v68_v43 = vpop.xlane.xlu1 %67  ;;  %v62_v44 = vpop.xlane.xlu2 %61 }
  0xfa   :  { %v72_v45 = vmul.f32 %v68_v43, %v44_v14  ;;  %v70_v46 = vmul.f32 %v62_v44, %v44_v14 }
  0xfc   :  { %v408_v47 = vpop.eup %407  ;;  %v76_v48 = vadd.f32 1e-05, %v72_v45  ;;  %v74_v49 = vadd.f32 1e-05, %v70_v46 }
  0xfd   :  { %v410_v50 = vpop.eup %409  ;;  %v78_v51 = vmul.f32 %v408_v47, %v73_v41  ;;  %vm84_vm3 = vweird.f32 %v408_v47 }
  0xfe   :  { %v98_v52 = vmul.f32 %v410_v50, %v75_v42  ;;  %411 = vrsqrt.f32 %v76_v48  ;;  %vm104_vm2 = vweird.f32 %v410_v50  ;;  %vm85_vm7 = vmor %vm83_vm5, %vm84_vm3  ;;  %vm113_vm10 = vweird.f32 %v76_v48 }
  0xff   :  { %v79_v53 = vmul.f32 %v408_v47, %v78_v51  ;;  %413 = vrsqrt.f32 %v74_v49  ;;  %vm105_vm6 = vmor %vm103_vm4, %vm104_vm2  ;;  %vm93_vm12 = vweird.f32 %v74_v49 }
 0x100   :  { %v99_v54 = vmul.f32 %v410_v50, %v98_v52 }
 0x101   :  { %v80_v55 = vmul.f32 0.5, %v79_v53 }
 0x102   :  { %v100_v56 = vmul.f32 0.5, %v99_v54 }
 0x103   :  { %v81_v57 = vsub.f32 1.5, %v80_v55 }
 0x104   :  { %v412_v58 = vpop.eup %411  ;;  %v101_v59 = vsub.f32 1.5, %v100_v56 }
 0x105   :  { %v414_v60 = vpop.eup %413  ;;  %v108_v61 = vmul.f32 %v412_v58, %v76_v48  ;;  %v82_v62 = vmul.f32 %v408_v47, %v81_v57  ;;  %vm114_vm8 = vweird.f32 %v412_v58 }
 0x106   :  { %v102_v63 = vmul.f32 %v410_v50, %v101_v59  ;;  %v88_v0 = vmul.f32 %v414_v60, %v74_v49  ;;  %vm94_vm9 = vweird.f32 %v414_v60  ;;  %vm115_vm11 = vmor %vm113_vm10, %vm114_vm8 }
 0x107   :  { %v109_v1 = vmul.f32 %v412_v58, %v108_v61  ;;  %v86_v5 = vsel %vm85_vm7, %v408_v47, %v82_v62  ;;  %vm95_vm13 = vmor %vm93_vm12, %vm94_vm9 }
 0x108   :  { %v89_v2 = vmul.f32 %v414_v60, %v88_v0  ;;  %v106_v3 = vsel %vm105_vm6, %v410_v50, %v102_v63  ;;  %v117_v11 = vmul.f32 %v86_v5, %v472_v20 }
 0x109   :  { %v110_v4 = vmul.f32 0.5, %v109_v1  ;;  %v119_v8 = vmul.f32 %v106_v3, %v470_v19 }
 0x10a   :  { %v90_v6 = vmul.f32 0.5, %v89_v2  ;;  %v125_v21 = vmul.f32 %v402_v10, %v117_v11 }
 0x10b   :  { %v111_v7 = vsub.f32 1.5, %v110_v4  ;;  %v127_v18 = vmul.f32 %v402_v10, %v119_v8 }
 0x10c   :  { %v91_v9 = vsub.f32 1.5, %v90_v6  ;;  %v133_v25 = vadd.f32 %v403_v17, %v125_v21 }
 0x10d   :  { %v112_v12 = vmul.f32 %v412_v58, %v111_v7  ;;  %v135_v23 = vadd.f32 %v403_v17, %v127_v18 }
 0x10e   :  { %v92_v13 = vmul.f32 %v414_v60, %v91_v9 }
 0x10f   :  { %v116_v14 = vsel %vm115_vm11, %v412_v58, %v112_v12 }
 0x110   :  { %v120_v15 = vmul.f32 %v116_v14, %v480_v29  ;;  %v96_v16 = vsel %vm95_vm13, %v414_v60, %v92_v13  ;;  %v404_v29 = vld [vmem:[%s624_s2] ss:$0 sm:$0xff] }
 0x111   :  { %v118_v19 = vmul.f32 %v96_v16, %v482_v30 }
 0x112   :  { %v128_v22 = vmul.f32 %v402_v10, %v120_v15 }
 0x113   :  { %v126_v20 = vmul.f32 %v402_v10, %v118_v19 }
 0x114   :  { %v136_v24 = vadd.f32 %v403_v17, %v128_v22 }
 0x115   :  { %v134_v26 = vadd.f32 %v403_v17, %v126_v20 }
 0x116   :  { %v138_v27 = vpack.c.bf16 %v136_v24, %v135_v23 }
 0x117   :  { %v137_v28 = vpack.c.bf16 %v134_v26, %v133_v25 }
 0x118   :  { %381 = vmatmul.msk.bf16.vlgmr.msra.gmra.mxu1 %vm25_vm0, %v138_v27 }
 0x119   :  { %380 = vmatmul.msk.bf16.vlgmr.msra.gmra.mxu0 %vm25_vm0, %v137_v28 }
 0x195   :  { %v179_v31 = vpop.f32.mrf.mxu1 }
 0x196   :  { %v174_v32 = vpop.f32.mrf.mxu0  ;;  %v511_v30 = vadd.f32 %v404_v29, %v179_v31 }
 0x197   :  { %v513_v33 = vadd.f32 %v404_v29, %v174_v32 }
 0x198   :  { %v516_v34 = vmul.f32 0.70710677, %v511_v30 }
 0x199   :  { %v519_v35 = vmul.f32 0.70710677, %v513_v33 }
 0x19a   :  { %v272_v36 = vmul.f32 %v516_v34, %v516_v34 }
 0x19b   :  { %v192_v37 = vmul.f32 %v519_v35, %v519_v35 }
 0x19c   :  { %v525_v38 = vmin.f32 %v272_v36, 16.0 }
 0x19d   :  { %v527_v39 = vmin.f32 %v192_v37, 16.0  ;;  %v181_v40 = vpop.f32.mrf.mxu1 }
 0x19e   :  { %v285_v41 = vmul.f32 3.8918573e-05, %v525_v38  ;;  %v176_v42 = vpop.f32.mrf.mxu0  ;;  %v530_v43 = vadd.f32 %v404_v29, %v181_v40  ;;  %v274_v49 = vmul.f32 2.1237322e-06, %v525_v38 }
 0x19f   :  { %v194_v44 = vmul.f32 2.1237322e-06, %v527_v39  ;;  %v205_v45 = vmul.f32 3.8918573e-05, %v527_v39  ;;  %v534_v46 = vadd.f32 %v404_v29, %v176_v42 }
 0x1a0   :  { %v286_v47 = vadd.f32 0.001143296, %v285_v41  ;;  %v542_v53 = vmul.f32 0.70710677, %v530_v43  ;;  %v275_v59 = vadd.f32 0.00028619796, %v274_v49 }
 0x1a1   :  { %v206_v48 = vadd.f32 0.001143296, %v205_v45  ;;  %v195_v50 = vadd.f32 0.00028619796, %v194_v44  ;;  %v539_v52 = vmul.f32 0.70710677, %v534_v46 }
 0x1a2   :  { %v287_v51 = vmul.f32 %v286_v47, %v525_v38  ;;  %v312_v57 = vmul.f32 %v542_v53, %v542_v53  ;;  %v276_v4 = vmul.f32 %v275_v59, %v525_v38 }
 0x1a3   :  { %v207_v54 = vmul.f32 %v206_v48, %v527_v39  ;;  %v232_v56 = vmul.f32 %v539_v52, %v539_v52  ;;  %v196_v60 = vmul.f32 %v195_v50, %v527_v39 }
 0x1a4   :  { %v288_v55 = vadd.f32 0.014752088, %v287_v51  ;;  %v553_v63 = vmin.f32 %v312_v57, 16.0  ;;  %v277_v17 = vadd.f32 0.0036580483, %v276_v4 }
 0x1a5   :  { %v208_v58 = vadd.f32 0.014752088, %v207_v54  ;;  %v551_v62 = vmin.f32 %v232_v56, 16.0  ;;  %v197_v6 = vadd.f32 0.0036580483, %v196_v60 }
 0x1a6   :  { %v289_v61 = vmul.f32 %v288_v55, %v525_v38  ;;  %v314_v9 = vmul.f32 2.1237322e-06, %v553_v63  ;;  %v325_v12 = vmul.f32 3.8918573e-05, %v553_v63  ;;  %v278_v29 = vmul.f32 %v277_v17, %v525_v38 }
 0x1a7   :  { %v209_v0 = vmul.f32 %v208_v58, %v527_v39  ;;  %v234_v2 = vmul.f32 2.1237322e-06, %v551_v62  ;;  %v245_v5 = vmul.f32 3.8918573e-05, %v551_v62  ;;  %v198_v21 = vmul.f32 %v197_v6, %v527_v39 }
 0x1a8   :  { %v290_v1 = vadd.f32 0.112945676, %v289_v61  ;;  %v315_v15 = vadd.f32 0.00028619796, %v314_v9  ;;  %v326_v19 = vadd.f32 0.001143296, %v325_v12 }
 0x1a9   :  { %v210_v3 = vadd.f32 0.112945676, %v209_v0  ;;  %v235_v8 = vadd.f32 0.00028619796, %v234_v2  ;;  %v246_v11 = vadd.f32 0.001143296, %v245_v5 }
 0x1aa   :  { %v291_v7 = vmul.f32 %v290_v1, %v525_v38  ;;  %v327_v25 = vmul.f32 %v326_v19, %v553_v63  ;;  %v316_v27 = vmul.f32 %v315_v15, %v553_v63  ;;  %v199_v36 = vadd.f32 0.05243302, %v198_v21 }
 0x1ab   :  { %v211_v10 = vmul.f32 %v210_v3, %v527_v39  ;;  %v236_v14 = vmul.f32 %v235_v8, %v551_v62  ;;  %v247_v18 = vmul.f32 %v246_v11, %v551_v62  ;;  %v279_v41 = vadd.f32 0.05243302, %v278_v29 }
 0x1ac   :  { %v292_v13 = vadd.f32 0.4994258, %v291_v7  ;;  %v328_v32 = vadd.f32 0.014752088, %v327_v25  ;;  %v317_v40 = vadd.f32 0.0036580483, %v316_v27  ;;  %v200_v45 = vmul.f32 %v199_v36, %v527_v39 }
 0x1ad   :  { %v212_v16 = vadd.f32 0.4994258, %v211_v10  ;;  %v237_v23 = vadd.f32 0.0036580483, %v236_v14  ;;  %v248_v24 = vadd.f32 0.014752088, %v247_v18  ;;  %v280_v55 = vmul.f32 %v279_v41, %v525_v38 }
 0x1ae   :  { %v293_v22 = vmul.f32 %v292_v13, %v525_v38  ;;  %v329_v44 = vmul.f32 %v328_v32, %v553_v63  ;;  %v318_v51 = vmul.f32 %v317_v40, %v553_v63  ;;  %v201_v60 = vadd.f32 0.18741608, %v200_v45 }
 0x1af   :  { %v213_v20 = vmul.f32 %v212_v16, %v527_v39  ;;  %v249_v31 = vmul.f32 %v248_v24, %v551_v62  ;;  %v238_v37 = vmul.f32 %v237_v23, %v551_v62  ;;  %v281_v5 = vadd.f32 0.18741608, %v280_v55 }
 0x1b0   :  { %v569_v26 = vadd.f32 1.0, %v293_v22  ;;  %v330_v49 = vadd.f32 0.112945676, %v329_v44  ;;  %v319_v3 = vadd.f32 0.05243302, %v318_v51  ;;  %v202_v10 = vmul.f32 %v201_v60, %v527_v39 }
 0x1b1   :  { %v214_v28 = vadd.f32 1.0, %v213_v20  ;;  %v250_v42 = vadd.f32 0.112945676, %v249_v31  ;;  %v239_v47 = vadd.f32 0.05243302, %v238_v37  ;;  %v282_v16 = vmul.f32 %v281_v5, %v525_v38 }
 0x1b2   :  { %415 = vrcp.f32 %v569_v26  ;;  %v331_v59 = vmul.f32 %v330_v49, %v553_v63  ;;  %v320_v13 = vmul.f32 %v319_v3, %v553_v63  ;;  %v203_v19 = vadd.f32 1.1283791, %v202_v10 }
 0x1b3   :  { %417 = vrcp.f32 %v214_v28  ;;  %v251_v48 = vmul.f32 %v250_v42, %v551_v62  ;;  %v240_v0 = vmul.f32 %v239_v47, %v551_v62  ;;  %v226_v15 = vand.u32 2147483648, %v214_v28 }
 0x1b4   :  { %v332_v4 = vadd.f32 0.4994258, %v331_v59  ;;  %vm220_vm15 = vweird.f32 %v214_v28  ;;  %v224_v17 = vand.u32 2147483647, %v214_v28  ;;  %v306_v39 = vand.u32 2147483648, %v569_v26 }
 0x1b5   :  { %v252_v57 = vadd.f32 0.4994258, %v251_v48  ;;  %v241_v11 = vadd.f32 0.18741608, %v240_v0  ;;  %vm300_vm2 = vweird.f32 %v569_v26  ;;  %v304_v38 = vand.u32 2147483647, %v569_v26 }
 0x1b6   :  { %v333_v9 = vmul.f32 %v332_v4, %v553_v63  ;;  %v321_v23 = vadd.f32 0.18741608, %v320_v13  ;;  %v227_v25 = vor.u32 1.1754944e-38, %v226_v15  ;;  %vm225_vm4 = vcmp.eq.f32.partialorder %v224_v17, 8.507059e+37 }
 0x1b7   :  { %v253_v1 = vmul.f32 %v252_v57, %v551_v62  ;;  %v242_v22 = vmul.f32 %v241_v11, %v551_v62  ;;  %v283_v27 = vadd.f32 1.1283791, %v282_v16  ;;  %v204_v31 = vmul.f32 %v203_v19, %v519_v35 }
 0x1b8   :  { %v416_v50 = vpop.eup %415  ;;  %v588_v14 = vadd.f32 1.0, %v333_v9  ;;  %v307_v32 = vor.u32 1.1754944e-38, %v306_v39  ;;  %vm305_vm5 = vcmp.eq.f32.partialorder %v304_v38, 8.507059e+37  ;;  %v322_v41 = vmul.f32 %v321_v23, %v553_v63 }
 0x1b9   :  { %v418_v54 = vpop.eup %417  ;;  %v296_v56 = vmul.f32 %v416_v50, %v569_v26  ;;  %v254_v6 = vadd.f32 1.0, %v253_v1  ;;  %vm301_vm0 = vweird.f32 %v416_v50  ;;  %v243_v36 = vadd.f32 1.1283791, %v242_v22 }
 0x1ba   :  { %v216_v58 = vmul.f32 %v418_v54, %v214_v28  ;;  %vm221_vm14 = vweird.f32 %v418_v54  ;;  %vm302_vm3 = vmor %vm300_vm2, %vm301_vm0  ;;  %v284_v49 = vmul.f32 %v283_v27, %v516_v34  ;;  %v323_v51 = vadd.f32 1.1283791, %v322_v41 }
 0x1bb   :  { %v297_v61 = vsub.f32 1.0, %v296_v56  ;;  %419 = vrcp.f32 %v254_v6  ;;  %vm591_vm1 = vmor %vm220_vm15, %vm221_vm14  ;;  %v264_v40 = vand.u32 2147483647, %v254_v6  ;;  %v266_v44 = vand.u32 2147483648, %v254_v6 }
 0x1bc   :  { %v217_v2 = vsub.f32 1.0, %v216_v58  ;;  %421 = vrcp.f32 %v588_v14  ;;  %v244_v35 = vmul.f32 %v243_v36, %v539_v52  ;;  %vm260_vm7 = vweird.f32 %v254_v6 }
 0x1bd   :  { %v298_v8 = vmul.f32 %v416_v50, %v297_v61  ;;  %vm265_vm8 = vcmp.eq.f32.partialorder %v264_v40, 8.507059e+37  ;;  %v267_v63 = vor.u32 1.1754944e-38, %v266_v44  ;;  %v344_v56 = vand.u32 2147483647, %v588_v14 }
 0x1be   :  { %v218_v7 = vmul.f32 %v418_v54, %v217_v2  ;;  %v346_v57 = vand.u32 2147483648, %v588_v14  ;;  %vm340_vm11 = vweird.f32 %v588_v14  ;;  %v324_v1 = vmul.f32 %v323_v51, %v542_v53 }
 0x1bf   :  { %v299_v18 = vadd.f32 %v416_v50, %v298_v8  ;;  %vm345_vm13 = vcmp.eq.f32.partialorder %v344_v56, 8.507059e+37  ;;  %v185_v8 = vmul.f32 0.5, %v534_v46  ;;  %v186_v15 = vmul.f32 0.5, %v511_v30 }
 0x1c0   :  { %v219_v12 = vadd.f32 %v418_v54, %v218_v7  ;;  %v347_v2 = vor.u32 1.1754944e-38, %v346_v57  ;;  %v184_v7 = vmul.f32 0.5, %v513_v33  ;;  %v187_v16 = vmul.f32 0.5, %v530_v43 }
 0x1c1   :  { %v420_v24 = vpop.eup %419  ;;  %v303_v28 = vsel %vm302_vm3, %v416_v50, %v299_v18 }
 0x1c2   :  { %v223_v20 = vsel %vm591_vm1, %v418_v54, %v219_v12  ;;  %v256_v29 = vmul.f32 %v420_v24, %v254_v6  ;;  %v422_v42 = vpop.eup %421  ;;  %v308_v26 = vsel %vm305_vm5, %v307_v32, %v303_v28  ;;  %vm261_vm6 = vweird.f32 %v420_v24 }
 0x1c3   :  { %v228_v62 = vsel %vm225_vm4, %v227_v25, %v223_v20  ;;  %v336_v48 = vmul.f32 %v422_v42, %v588_v14  ;;  %v309_v55 = vmul.f32 %v308_v26, %v284_v49  ;;  %vm262_vm9 = vmor %vm260_vm7, %vm261_vm6  ;;  %vm341_vm10 = vweird.f32 %v422_v42 }
 0x1c4   :  { %v257_v37 = vsub.f32 1.0, %v256_v29  ;;  %v229_v45 = vmul.f32 %v228_v62, %v204_v31  ;;  %vm342_vm12 = vmor %vm340_vm11, %vm341_vm10 }
 0x1c5   :  { %v337_v54 = vsub.f32 1.0, %v336_v48  ;;  %v384_v52 = vclamps-f32 %v309_v55, 1.0 }
 0x1c6   :  { %v258_v47 = vmul.f32 %v420_v24, %v257_v37  ;;  %v382_v58 = vclamps-f32 %v229_v45, 1.0 }
 0x1c7   :  { %v338_v60 = vmul.f32 %v422_v42, %v337_v54  ;;  %v354_v12 = vadd.f32 1.0, %v384_v52 }
 0x1c8   :  { %v259_v50 = vadd.f32 %v420_v24, %v258_v47  ;;  %v352_v3 = vadd.f32 1.0, %v382_v58 }
 0x1c9   :  { %v339_v0 = vadd.f32 %v422_v42, %v338_v60  ;;  %v358_v18 = vmul.f32 %v354_v12, %v186_v15 }
 0x1ca   :  { %v263_v59 = vsel %vm262_vm9, %v420_v24, %v259_v50  ;;  %v356_v11 = vmul.f32 %v352_v3, %v184_v7 }
 0x1cb   :  { %v268_v61 = vsel %vm265_vm8, %v267_v63, %v263_v59  ;;  %v343_v5 = vsel %vm342_vm12, %v422_v42, %v339_v0 }
 0x1cc   :  { %v269_v34 = vmul.f32 %v268_v61, %v244_v35  ;;  %v348_v6 = vsel %vm345_vm13, %v347_v2, %v343_v5 }
 0x1cd   :  { %v349_v10 = vmul.f32 %v348_v6, %v324_v1 }
 0x1ce   :  { %v383_v4 = vclamps-f32 %v269_v34, 1.0 }
 0x1cf   :  { %v385_v14 = vclamps-f32 %v349_v10, 1.0 }
 0x1d0   :  { %v353_v9 = vadd.f32 1.0, %v383_v4 }
 0x1d1   :  { %v355_v17 = vadd.f32 1.0, %v385_v14 }
 0x1d2   :  { %v357_v13 = vmul.f32 %v353_v9, %v185_v8 }
 0x1d3   :  { %v359_v33 = vmul.f32 %v355_v17, %v187_v16 }
 0x1d4   :  { %v391_v53 = vpack.c.bf16 %v357_v13, %v356_v11 }
 0x1d5   :  { %v396_v19 = vpack.c.bf16 %v359_v33, %v358_v18 }
 0x1d6   :  { %392 = vst [vmem:[%s626_s5] sm:$0xff] %v391_v53  }
 0x1d7   :  { %398 = vst [vmem:[%s626_s5 + $0x8] sm:$0xff] %v396_v19  }

// kernel: vit_forward.33
= control target key start
LH: loop header
LB: loop body
LE: loop exit
PB: predicated region body
PF: predicated region fallthrough
CT: control target
= control target key end

     0   :  { %vm36_vm0 = vcmask 254976   ;;  %vm23_vm1 = vcmask 261120   ;;  %v268_v10 = vmov 32.0   ;;  %s380_s0 = inlined_call_operand.vmem [shape: f32[34,32], index: 0, kind: input, shape index: {}]   ;;  %s381_s2 = inlined_call_operand.vmem [shape: f32[1,32], index: 2, kind: input, shape index: {}]   ;;  %s382_s3 = inlined_call_operand.vmem [shape: f32[1,32], index: 3, kind: input, shape index: {}]   ;;  %s383_s1 = inlined_call_operand.vmem [shape: bf16[32,128], index: 1, kind: input, shape index: {}]   ;;  %s384_s4 = inlined_call_operand.vmem [shape: bf16[34,128], index: 4, kind: output, shape index: {}]  }
   0x1   :  { %v22_v0 = vld [vmem:[%s380_s0 + $0x20] sm:$0x3]  ;;  %v19_v1 = vld [vmem:[%s380_s0 + $0x8] sm:$0xff]  ;;  %v21_v4 = vld [vmem:[%s380_s0 + $0x18] sm:$0xff]  ;;  %256 = vrcp.f32 %v268_v10 }
   0x2   :  { %v37_v2 = vsel %vm36_vm0, %v22_v0, 0.0  ;;  %v27_v3 = vsel %vm23_vm1, %v19_v1, 0.0  ;;  %v33_v5 = vsel %vm23_vm1, %v21_v4, 0.0  ;;  %v20_v6 = vld [vmem:[%s380_s0 + $0x10] sm:$0xff]  ;;  %v18_v7 = vld [vmem:[%s380_s0] sm:$0xff]  ;;  %v237_v42 = vld [vmem:[%s383_s1 + $0x8] sm:$0xff] }
   0x3   :  { %38 = vadd.xlane.f32.xlu0 %v37_v2  ;;  %28 = vadd.xlane.f32.xlu1 %v27_v3  ;;  %v30_v8 = vsel %vm23_vm1, %v20_v6, 0.0  ;;  %v24_v9 = vsel %vm23_vm1, %v18_v7, 0.0  ;;  %v236_v43 = vld [vmem:[%s383_s1] sm:$0xff] }
   0x4   :  { %34 = vadd.xlane.f32.xlu2 %v33_v5  ;;  %250 = vmatpush.bf16.msra.mxu2 %v237_v42 }
   0x5   :  { %194 = vmatpush.bf16.msra.mxu0 %v237_v42  ;;  %249 = vmatpush.bf16.msra.mxu1 %v237_v42 }
   0x7   :  { %v257_v11 = vpop.eup %256 }
   0x8   :  { %v41_v12 = vmul.f32 32.0, %v257_v11  ;;  %vm45_vm2 = vweird.f32 %v257_v11  ;;  %252 = vmatpush.bf16.msra.mxu2 %v236_v43 }
   0x9   :  { %195 = vmatpush.bf16.msra.mxu0 %v236_v43  ;;  %251 = vmatpush.bf16.msra.mxu1 %v236_v43 }
   0xa   :  { %v42_v13 = vsub.f32 1.0, %v41_v12 }
   0xb   :  { %31 = vadd.xlane.f32.xlu1 %v30_v8  ;;  %25 = vadd.xlane.f32.xlu0 %v24_v9 }
   0xc   :  { %v43_v14 = vmul.f32 %v257_v11, %v42_v13 }
   0xe   :  { %v44_v15 = vadd.f32 %v257_v11, %v43_v14 }
  0x10   :  { %v314_v16 = vsel %vm45_vm2, %v257_v11, %v44_v15  ;;  %v254_v11 = vld [vmem:[%s381_s2] ss:$0 sm:$0xff] }
  0x76   :  { %v39_v17 = vpop.xlane.xlu0 %38  ;;  %v29_v18 = vpop.xlane.xlu1 %28 }
  0x77   :  { %v51_v19 = vmul.f32 %v314_v16, %v39_v17  ;;  %v48_v20 = vmul.f32 %v314_v16, %v29_v18  ;;  %v35_v25 = vpop.xlane.xlu2 %34 }
  0x78   :  { %v50_v32 = vmul.f32 %v314_v16, %v35_v25 }
  0x79   :  { %v318_v21 = vsub.f32 %v22_v0, %v51_v19  ;;  %v320_v22 = vsub.f32 %v19_v1, %v48_v20 }
  0x7a   :  { %v335_v35 = vsub.f32 %v21_v4, %v50_v32 }
  0x7b   :  { %v61_v23 = vmul.f32 %v318_v21, %v318_v21  ;;  %v58_v24 = vmul.f32 %v320_v22, %v320_v22 }
  0x7c   :  { %v60_v40 = vmul.f32 %v335_v35, %v335_v35 }
  0x7d   :  { %v74_v26 = vsel %vm36_vm0, %v61_v23, 0.0  ;;  %v65_v27 = vsel %vm23_vm1, %v58_v24, 0.0 }
  0x7e   :  { %75 = vadd.xlane.f32.xlu2 %v74_v26  ;;  %66 = vadd.xlane.f32.xlu1 %v65_v27  ;;  %v32_v28 = vpop.xlane.xlu1 %31  ;;  %v26_v29 = vpop.xlane.xlu0 %25  ;;  %v71_v41 = vsel %vm23_vm1, %v60_v40, 0.0 }
  0x7f   :  { %v49_v30 = vmul.f32 %v314_v16, %v32_v28  ;;  %v47_v31 = vmul.f32 %v314_v16, %v26_v29 }
  0x81   :  { %v331_v33 = vsub.f32 %v20_v6, %v49_v30  ;;  %v333_v34 = vsub.f32 %v18_v7, %v47_v31 }
  0x83   :  { %v59_v36 = vmul.f32 %v331_v33, %v331_v33  ;;  %v57_v37 = vmul.f32 %v333_v34, %v333_v34 }
  0x85   :  { %v68_v38 = vsel %vm23_vm1, %v59_v36, 0.0  ;;  %v62_v39 = vsel %vm23_vm1, %v57_v37, 0.0 }
  0x86   :  { %69 = vadd.xlane.f32.xlu2 %v68_v38  ;;  %63 = vadd.xlane.f32.xlu0 %v62_v39 }
  0x8e   :  { %72 = vadd.xlane.f32.xlu0 %v71_v41 }
  0xf1   :  { %v76_v44 = vpop.xlane.xlu2 %75  ;;  %v67_v45 = vpop.xlane.xlu1 %66 }
  0xf2   :  { %v81_v46 = vmul.f32 %v76_v44, %v314_v16  ;;  %v78_v47 = vmul.f32 %v67_v45, %v314_v16 }
  0xf4   :  { %v86_v48 = vadd.f32 1e-05, %v81_v46  ;;  %v83_v49 = vadd.f32 1e-05, %v78_v47 }
  0xf6   :  { %258 = vrsqrt.f32 %v86_v48  ;;  %vm133_vm4 = vweird.f32 %v86_v48  ;;  %vm103_vm5 = vweird.f32 %v83_v49 }
  0xf7   :  { %260 = vrsqrt.f32 %v83_v49 }
  0xf9   :  { %v70_v50 = vpop.xlane.xlu2 %69  ;;  %v64_v51 = vpop.xlane.xlu0 %63 }
  0xfa   :  { %v79_v52 = vmul.f32 %v70_v50, %v314_v16  ;;  %v77_v53 = vmul.f32 %v64_v51, %v314_v16 }
  0xfc   :  { %v259_v54 = vpop.eup %258  ;;  %v84_v55 = vadd.f32 1e-05, %v79_v52  ;;  %v82_v56 = vadd.f32 1e-05, %v77_v53 }
  0xfd   :  { %v261_v57 = vpop.eup %260  ;;  %v128_v58 = vmul.f32 %v259_v54, %v86_v48  ;;  %vm134_vm3 = vweird.f32 %v259_v54 }
  0xfe   :  { %v98_v59 = vmul.f32 %v261_v57, %v83_v49  ;;  %262 = vrsqrt.f32 %v84_v55  ;;  %vm135_vm6 = vmor %vm133_vm4, %vm134_vm3  ;;  %vm104_vm7 = vweird.f32 %v261_v57  ;;  %vm113_vm9 = vweird.f32 %v84_v55 }
  0xff   :  { %v129_v60 = vmul.f32 %v259_v54, %v128_v58  ;;  %264 = vrsqrt.f32 %v82_v56  ;;  %vm105_vm8 = vmor %vm103_vm5, %vm104_vm7  ;;  %vm93_vm12 = vweird.f32 %v82_v56 }
 0x100   :  { %v99_v61 = vmul.f32 %v261_v57, %v98_v59 }
 0x101   :  { %v130_v62 = vmul.f32 0.5, %v129_v60  ;;  %v73_v63 = vpop.xlane.xlu0 %72 }
 0x102   :  { %v100_v0 = vmul.f32 0.5, %v99_v61  ;;  %v80_v1 = vmul.f32 %v73_v63, %v314_v16  ;;  %v255_v16 = vld [vmem:[%s382_s3] ss:$0 sm:$0xff] }
 0x103   :  { %v131_v2 = vsub.f32 1.5, %v130_v62 }
 0x104   :  { %v263_v3 = vpop.eup %262  ;;  %v101_v4 = vsub.f32 1.5, %v100_v0  ;;  %v85_v5 = vadd.f32 1e-05, %v80_v1 }
 0x105   :  { %v265_v6 = vpop.eup %264  ;;  %v132_v7 = vmul.f32 %v259_v54, %v131_v2  ;;  %v108_v8 = vmul.f32 %v263_v3, %v84_v55  ;;  %vm114_vm11 = vweird.f32 %v263_v3 }
 0x106   :  { %v102_v9 = vmul.f32 %v261_v57, %v101_v4  ;;  %v88_v10 = vmul.f32 %v265_v6, %v82_v56  ;;  %266 = vrsqrt.f32 %v85_v5  ;;  %vm94_vm10 = vweird.f32 %v265_v6  ;;  %vm115_vm14 = vmor %vm113_vm9, %vm114_vm11 }
 0x107   :  { %v136_v12 = vsel %vm135_vm6, %v259_v54, %v132_v7  ;;  %v109_v13 = vmul.f32 %v263_v3, %v108_v8  ;;  %vm95_vm13 = vmor %vm93_vm12, %vm94_vm10  ;;  %vm123_vm0 = vweird.f32 %v85_v5 }
 0x108   :  { %v89_v14 = vmul.f32 %v265_v6, %v88_v10  ;;  %v141_v15 = vmul.f32 %v136_v12, %v318_v21  ;;  %v106_v18 = vsel %vm105_vm8, %v261_v57, %v102_v9 }
 0x109   :  { %v110_v17 = vmul.f32 0.5, %v109_v13  ;;  %v138_v27 = vmul.f32 %v106_v18, %v320_v22 }
 0x10a   :  { %v90_v19 = vmul.f32 0.5, %v89_v14  ;;  %v150_v20 = vmul.f32 %v254_v11, %v141_v15 }
 0x10b   :  { %v111_v23 = vsub.f32 1.5, %v110_v17  ;;  %v147_v39 = vmul.f32 %v254_v11, %v138_v27 }
 0x10c   :  { %v267_v24 = vpop.eup %266  ;;  %v91_v25 = vsub.f32 1.5, %v90_v19  ;;  %v159_v26 = vadd.f32 %v255_v16, %v150_v20 }
 0x10d   :  { %v112_v28 = vmul.f32 %v263_v3, %v111_v23  ;;  %v118_v21 = vmul.f32 %v267_v24, %v85_v5  ;;  %vm124_vm15 = vweird.f32 %v267_v24  ;;  %v156_v44 = vadd.f32 %v255_v16, %v147_v39 }
 0x10e   :  { %v92_v29 = vmul.f32 %v265_v6, %v91_v25  ;;  %v162_v30 = vpack.c.bf16 %v159_v26, %v159_v26  ;;  %vm125_vm2 = vmor %vm123_vm0, %vm124_vm15 }
 0x10f   :  { %v119_v31 = vmul.f32 %v267_v24, %v118_v21  ;;  %v116_v36 = vsel %vm115_vm14, %v263_v3, %v112_v28 }
 0x110   :  { %v96_v32 = vsel %vm95_vm13, %v265_v6, %v92_v29  ;;  %235 = vmatmul.msk.bf16.vlgmr.msra.gmra.mxu2 %vm23_vm1, %v162_v30  ;;  %v139_v41 = vmul.f32 %v116_v36, %v331_v33 }
 0x111   :  { %v137_v37 = vmul.f32 %v96_v32, %v333_v34  ;;  %v120_v38 = vmul.f32 0.5, %v119_v31 }
 0x112   :  { %v148_v48 = vmul.f32 %v254_v11, %v139_v41 }
 0x113   :  { %v121_v40 = vsub.f32 1.5, %v120_v38  ;;  %v146_v22 = vmul.f32 %v254_v11, %v137_v37 }
 0x114   :  { %v157_v49 = vadd.f32 %v255_v16, %v148_v48 }
 0x115   :  { %v122_v42 = vmul.f32 %v267_v24, %v121_v40  ;;  %v155_v43 = vadd.f32 %v255_v16, %v146_v22 }
 0x117   :  { %v126_v45 = vsel %vm125_vm2, %v267_v24, %v122_v42  ;;  %v160_v46 = vpack.c.bf16 %v156_v44, %v155_v43 }
 0x118   :  { %v140_v47 = vmul.f32 %v126_v45, %v335_v35 }
 0x119   :  { %233 = vmatmul.msk.bf16.vlgmr.msra.gmra.mxu0 %vm23_vm1, %v160_v46 }
 0x11a   :  { %v149_v34 = vmul.f32 %v254_v11, %v140_v47 }
 0x11c   :  { %v158_v50 = vadd.f32 %v255_v16, %v149_v34 }
 0x11e   :  { %v161_v51 = vpack.c.bf16 %v158_v50, %v157_v49 }
 0x120   :  { %234 = vmatmul.msk.bf16.vlgmr.msra.gmra.mxu1 %vm23_vm1, %v161_v51 }
 0x193   :  { %v207_v52 = vpop.f32.mrf.mxu2 }
 0x194   :  { %v215_v33 = vpack.c.bf16 %v207_v52, %v207_v52 }
 0x196   :  { %220 = vst [vmem:[%s384_s4 + $0x10] sm:$0x1] %v215_v33  ;;  %v197_v53 = vpop.f32.mrf.mxu0 }
 0x19b   :  { %v209_v54 = vpop.f32.mrf.mxu2 }
 0x19d   :  { %v202_v55 = vpop.f32.mrf.mxu1 }
 0x19e   :  { %v199_v56 = vpop.f32.mrf.mxu0 }
 0x19f   :  { %v241_v35 = vpack.c.bf16 %v199_v56, %v197_v53 }
 0x1a1   :  { %242 = vst [vmem:[%s384_s4] sm:$0xff] %v241_v35  }
 0x1a5   :  { %v204_v57 = vpop.f32.mrf.mxu1 }
 0x1a6   :  { %v246_v58 = vpack.c.bf16 %v204_v57, %v202_v55 }
 0x1a8   :  { %248 = vst [vmem:[%s384_s4 + $0x8] sm:$0xff] %v246_v58  }

// kernel: vit_forward.35
= control target key start
LH: loop header
LB: loop body
LE: loop exit
PB: predicated region body
PF: predicated region fallthrough
CT: control target
= control target key end

     0   :  { %vm56_vm0 = vcmask 261120   ;;  %s209_s1 = inlined_call_operand.vmem [shape: bf16[32,128], index: 1, kind: input, shape index: {}]   ;;  %s210_s0 = inlined_call_operand.vmem [shape: bf16[34,32], index: 0, kind: input, shape index: {}]   ;;  %s211_s2 = inlined_call_operand.vmem [shape: f32[1,128], index: 2, kind: input, shape index: {}]   ;;  %s212_s3 = inlined_call_operand.vmem [shape: f32[34,128], index: 3, kind: input, shape index: {}]   ;;  %s213_s4 = inlined_call_operand.vmem [shape: f32[34,128], index: 4, kind: output, shape index: {}]  }
   0x1   :  { %v130_v0 = vld [vmem:[%s209_s1 + $0x8] sm:$0xff]  ;;  %v22_v1 = vld [vmem:[%s210_s0 + $0x10] sm:$0x1]  ;;  %v129_v2 = vld [vmem:[%s209_s1] sm:$0xff] }
   0x2   :  { %72 = vmatpush.bf16.msra.mxu0 %v130_v0  ;;  %131 = vmatpush.bf16.msra.mxu1 %v130_v0  ;;  %v40_v3 = vunpack.c.l.b16 %v22_v1  ;;  %v127_v4 = vld [vmem:[%s210_s0] sm:$0xff]  ;;  %v128_v5 = vld [vmem:[%s210_s0 + $0x8] sm:$0xff]  ;;  %v91_v11 = vld [vmem:[%s212_s3 + $0x10] sm:$0xff] }
   0x3   :  { %132 = vmatpush.bf16.msra.mxu2 %v130_v0  ;;  %v135_v7 = vld [vmem:[%s211_s2] ss:$0 sm:$0xff]  ;;  %v90_v20 = vld [vmem:[%s212_s3 + $0x8] sm:$0xff]  ;;  %v92_v22 = vld [vmem:[%s212_s3 + $0x18] sm:$0xff] }
   0x4   :  { %v43_v6 = vpack.c.b16 %v40_v3, %v40_v3  ;;  %v89_v9 = vld [vmem:[%s212_s3] sm:$0xff] }
   0x5   :  { %v93_v17 = vld [vmem:[%s212_s3 + $0x20] sm:$0x3] }
   0x6   :  { %73 = vmatpush.bf16.msra.mxu0 %v129_v2  ;;  %133 = vmatpush.bf16.msra.mxu1 %v129_v2 }
   0x7   :  { %134 = vmatpush.bf16.msra.mxu2 %v129_v2 }
   0x9   :  { %124 = vmatmul.msk.bf16.vlgmr.msra.gmra.mxu0 %vm56_vm0, %v127_v4  ;;  %125 = vmatmul.msk.bf16.vlgmr.msra.gmra.mxu1 %vm56_vm0, %v128_v5 }
   0xa   :  { %126 = vmatmul.msk.bf16.vlgmr.msra.gmra.mxu2 %vm56_vm0, %v43_v6 }
  0x86   :  { %v75_v8 = vpop.f32.mrf.mxu0  ;;  %v80_v10 = vpop.f32.mrf.mxu1 }
  0x87   :  { %v76_v12 = vadd.f32 %v135_v7, %v75_v8  ;;  %v81_v13 = vadd.f32 %v135_v7, %v80_v10 }
  0x89   :  { %v94_v14 = vadd.f32 %v89_v9, %v76_v12  ;;  %v96_v15 = vadd.f32 %v91_v11, %v81_v13 }
  0x8b   :  { %99 = vst [vmem:[%s213_s4] sm:$0xff] %v94_v14 }
  0x8c   :  { %101 = vst [vmem:[%s213_s4 + $0x10] sm:$0xff] %v96_v15 }
  0x8d   :  { %v85_v16 = vpop.f32.mrf.mxu2 }
  0x8e   :  { %v86_v18 = vadd.f32 %v135_v7, %v85_v16  ;;  %v77_v19 = vpop.f32.mrf.mxu0  ;;  %v82_v21 = vpop.f32.mrf.mxu1 }
  0x8f   :  { %v78_v23 = vadd.f32 %v135_v7, %v77_v19  ;;  %v83_v24 = vadd.f32 %v135_v7, %v82_v21 }
  0x90   :  { %v98_v25 = vadd.f32 %v93_v17, %v86_v18 }
  0x91   :  { %v95_v26 = vadd.f32 %v90_v20, %v78_v23  ;;  %v97_v27 = vadd.f32 %v92_v22, %v83_v24 }
  0x92   :  { %103 = vst [vmem:[%s213_s4 + $0x20] sm:$0x3] %v98_v25 }
  0x93   :  { %100 = vst [vmem:[%s213_s4 + $0x8] sm:$0xff] %v95_v26 }
  0x94   :  { %102 = vst [vmem:[%s213_s4 + $0x18] sm:$0xff] %v97_v27 }
  0x95   :  { %v87_v28 = vpop.f32.mrf.mxu2 }

// kernel: vit_forward.34
= control target key start
LH: loop header
LB: loop body
LE: loop exit
PB: predicated region body
PF: predicated region fallthrough
CT: control target
= control target key end

     0   :  { %s815_s6 = smov 0   ;;  %s981_s0 = inlined_call_operand.vmem [shape: bf16[2,17,96], index: 0, kind: input, shape index: {}]   ;;  %s982_s1 = inlined_call_operand.vmem [shape: bf16[2,17,32], index: 1, kind: output, shape index: {}]  }
   0x1 LB: > { %s665_s7 = sadd.s32 4294967295, %s788_s6   ;;  %p669_p0 = scmp.ge.s32.totalorder %s788_s6, 1  ;;  %s788_s6 = sphi %s815_s6, %s11_s6  }
   0x2   : > { %p87_p1 = scmp.lt.s32.totalorder %s788_s6, 3 }
   0x4   : > { %p88_p2 = pnand %p669_p0, %p87_p1 }
   0x5   : > { %p107_p3 = scmp.lt.s32.totalorder (!%p88_p2), %s665_s7, 1  ;;  %s790_s12 = smov (!%p88_p2), 96  }
   0x6   : > { %91 = sbr.rel (%p88_p2) target bundleno = 1388 (0x56c), region = 24  ;;  %s791_s13 = smov (!%p88_p2), 88  }
   0x7   : > { %s792_s14 = smov (!%p88_p2), 120   ;;  %s793_s15 = smov (!%p88_p2), 64  }
   0x8   : > { %s794_s16 = smov (!%p88_p2), 80   ;;  %s795_s17 = smov (!%p88_p2), 72  }
   0x9   : > { %s797_s18 = smov (!%p88_p2), 104   ;;  %s798_s19 = smov (!%p88_p2), 112  }
   0xa   : > { %s799_s20 = smov (!%p88_p2), 56   ;;  %s800_s21 = smov (!%p88_p2), 48  }
   0xb   : > { %s984_s7 = smov (!%p107_p3, %s665_s7), 1  ;;  %vm133_vm0 = vcmask 64512   ;;  %vm164_vm1 = vcmask 138240   ;;  %vm171_vm2 = vcmask 131072   ;;  %vm212_vm3 = vcmask 1040384   ;;  %s801_s22 = smov 40  }
   0xc   : > { %s695_s8 = smul.u32 12, %s984_s7  ;;  %v796_v36 = vmov 0   ;;  %s802_s23 = smov 8   ;;  %vm590_vm4 = vcmask 130048   ;;  %vm594_vm5 = vcmask 195584   ;;  %vm601_vm6 = vcmask 257024  }
   0xd   : > { %v861_v37 = vsel %vm212_vm3, 65535, %v796_v36  ;;  %s803_s24 = smov 24   ;;  %s804_s25 = smov 16   ;;  %vm604_vm7 = vcmask 253952   ;;  %vm605_vm8 = vsmask.f32 256 }
   0xe   : > { %s111_s11 = scalar_lea.vmem %s981_s0, %s695_s8  ;;  %s116_s28 = scalar_lea.vmem %s982_s1, %s695_s8  ;;  %vm606_vm9 = vmand %vm604_vm7, %vm605_vm8 }
   0xf   : > { %v120_v0 = vld [vmem:[%s111_s11 + $0x8] sm:$0x1]  ;;  %v834_v3 = vld [vmem:[%s111_s11] sm:$0xff] }
  0x10   : > { %v126_v1 = vunpack.c.l.b16 %v120_v0 }
  0x12   : > { %v831_v2 = vpack.c.b16 %v126_v1, %v126_v1 }
  0x14   : > { %131 = vrot.lane.b32.xlu0 %v831_v2, %s790_s12  ;;  %242 = vrot.lane.b32.xlu2 %v831_v2, %s791_s13 }
  0x1c   : > { %129 = vrot.lane.b32.xlu0 %v834_v3, %s790_s12  ;;  %236 = vrot.lane.b32.xlu2 %v834_v3, %s792_s14 }
  0x24   : > { %240 = vrot.lane.b32.xlu0 %v834_v3, %s791_s13 }
  0x6e   : > { %v243_v8 = vpop.permute.xlu2 %242 }
  0x6f   : > { %v254_v9 = vsel %vm133_vm0, %v243_v8, 0 }
  0x70   : > { %262 = vmatpush.bf16.xpose.msra.mxu2 %v254_v9 }
  0x76   : > { %v237_v13 = vpop.permute.xlu2 %236 }
  0x86   : > { %v132_v4 = vpop.permute.xlu0 %131 }
  0x87   : > { %v144_v5 = vsel %vm133_vm0, %v132_v4, 0 }
  0x88   : > { %152 = vmatpush.bf16.xpose.msra.mxu0 %v144_v5 }
  0x8e   : > { %v130_v6 = vpop.permute.xlu0 %129 }
  0x8f   : > { %v141_v7 = vsel %vm133_vm0, %v130_v6, 0 }
  0x90   : > { %153 = vmatpush.bf16.xpose.msra.mxu0 %v141_v7 }
  0x96   : > { %v241_v10 = vpop.permute.xlu0 %240 }
  0x97   : > { %676 = vmatmul.msk.bf16.vlgmr.msra.gmra.mxu0 %vm133_vm0, %v834_v3  ;;  %v251_v11 = vsel %vm133_vm0, %v241_v10, 0 }
  0x98   : > { %263 = vmatpush.bf16.xpose.msra.mxu2 %v251_v11 }
  0x9f   : > { %680 = vmatmul.msk.bf16.vlgmr.msra.gmra.mxu2 %vm133_vm0, %v237_v13 }
  0xa7   : > { %677 = vmatmul.msk.bf16.gmra.mxu0 %vm133_vm0, %v831_v2 }
 0x114   : > { %v155_v12 = vpop.f32.mrf.mxu0 }
 0x115   : > { %v165_v14 = vsel %vm164_vm1, %v155_v12, -inf }
 0x116   : > { %166 = vmax.xlane.f32.xlu1 %v165_v14 }
 0x11c   : > { %v157_v15 = vpop.f32.mrf.mxu0 }
 0x11d   : > { %v168_v16 = vsel %vm164_vm1, %v157_v15, -inf }
 0x11e   : > { %169 = vmax.xlane.f32.xlu1 %v168_v16 }
 0x122   : > { %v871_v39 = vpop.f32.mrf.mxu2 }
 0x123   : > { %v274_v40 = vsel %vm164_vm1, %v871_v39, -inf }
 0x124   : > { %v160_v17 = vpop.f32.mrf.mxu0 }
 0x125   : > { %v172_v18 = vsel %vm171_vm2, %v160_v17, -inf }
 0x126   : > { %173 = vmax.xlane.f32.xlu2 %v172_v18 }
 0x12a   : > { %v267_v42 = vpop.f32.mrf.mxu2 }
 0x12b   : > { %v277_v43 = vsel %vm164_vm1, %v267_v42, -inf }
 0x12c   : > { %v162_v19 = vpop.f32.mrf.mxu0 }
 0x137   : > { %203 = vrot.lane.b32.xlu1 %v831_v2, %s793_s15 }
 0x13e   : > { %201 = vrot.lane.b32.xlu2 %v834_v3, %s793_s15 }
 0x189   : > { %v167_v20 = vpop.xlane.xlu1 %166 }
 0x18a   : > { %v175_v21 = vsub.f32 %v155_v12, %v167_v20 }
 0x18c   : > { %v178_v22 = vmul.f32 1.442695, %v175_v21 }
 0x18e   : > { %734 = vpow2.f32 %v178_v22 }
 0x191   : > { %v170_v23 = vpop.xlane.xlu1 %169 }
 0x192   : > { %v176_v24 = vsub.f32 %v157_v15, %v170_v23 }
 0x194   : > { %v735_v25 = vpop.eup %734  ;;  %v180_v26 = vmul.f32 1.442695, %v176_v24 }
 0x195   : > { %v184_v27 = vsel %vm164_vm1, %v735_v25, 0.0 }
 0x196   : > { %736 = vpow2.f32 %v180_v26  ;;  %185 = vadd.xlane.f32.xlu1 %v184_v27 }
 0x199   : > { %v174_v28 = vpop.xlane.xlu2 %173 }
 0x19a   : > { %v177_v29 = vsub.f32 %v160_v17, %v174_v28 }
 0x19c   : > { %v737_v30 = vpop.eup %736  ;;  %v182_v31 = vmul.f32 1.442695, %v177_v29 }
 0x19d   : > { %v187_v32 = vsel %vm164_vm1, %v737_v30, 0.0 }
 0x19e   : > { %738 = vpow2.f32 %v182_v31  ;;  %188 = vadd.xlane.f32.xlu0 %v187_v32 }
 0x1a1   : > { %v202_v41 = vpop.permute.xlu2 %201 }
 0x1a4   : > { %v739_v33 = vpop.eup %738 }
 0x1a5   : > { %v190_v34 = vsel %vm171_vm2, %v739_v33, 0.0 }
 0x1a6   : > { %191 = vadd.xlane.f32.xlu2 %v190_v34 }
 0x1a9   : > { %v204_v35 = vpop.permute.xlu1 %203 }
 0x1aa   : > { %v216_v38 = vand.u32 %v861_v37, %v204_v35 }
 0x1ac   : > { %224 = vmatpush.bf16.msra.mxu1 %v216_v38 }
 0x1af   : > { %347 = vrot.lane.b32.xlu1 %v831_v2, %s794_s16 }
 0x1b0   : > { %225 = vmatpush.bf16.msra.mxu1 %v202_v41 }
 0x1b2   : > { %345 = vrot.lane.b32.xlu0 %v834_v3, %s794_s16 }
 0x1b7   : > { %452 = vrot.lane.b32.xlu1 %v831_v2, %s795_s17 }
 0x1ba   : > { %446 = vrot.lane.b32.xlu0 %v834_v3, %s797_s18 }
 0x1be   : > { %448 = vrot.lane.b32.xlu2 %v831_v2, %s797_s18 }
 0x1bf   : > { %238 = vrot.lane.b32.xlu1 %v831_v2, %s792_s14 }
 0x1c7   : > { %450 = vrot.lane.b32.xlu1 %v834_v3, %s795_s17 }
 0x1cf   : > { %341 = vrot.lane.b32.xlu1 %v834_v3, %s798_s19 }
 0x1d7   : > { %343 = vrot.lane.b32.xlu1 %v831_v2, %s798_s19 }
 0x1e4   : > { %275 = vmax.xlane.f32.xlu0 %v274_v40 }
 0x201   : > { %278 = vmax.xlane.f32.xlu1 %v277_v43 }
 0x209   : > { %v186_v44 = vpop.xlane.xlu1 %185 }
 0x20a   : > { %740 = vrcp.f32 %v186_v44 }
 0x210   : > { %v741_v46 = vpop.eup %740 }
 0x211   : > { %v189_v45 = vpop.xlane.xlu0 %188  ;;  %v196_v48 = vmul.f32 %v741_v46, %v735_v25 }
 0x212   : > { %742 = vrcp.f32 %v189_v45 }
 0x218   : > { %v743_v47 = vpop.eup %742 }
 0x219   : > { %v197_v49 = vmul.f32 %v743_v47, %v737_v30  ;;  %v192_v50 = vpop.xlane.xlu2 %191 }
 0x21a   : > { %744 = vrcp.f32 %v192_v50 }
 0x21b   : > { %v199_v51 = vpack.c.bf16 %v197_v49, %v196_v48 }
 0x21d   : > { %678 = vmatmul.msk.bf16.vlgmr.msra.gmra.mxu1 %vm164_vm1, %v199_v51 }
 0x220   : > { %v745_v54 = vpop.eup %744 }
 0x221   : > { %v348_v52 = vpop.permute.xlu1 %347  ;;  %v198_v55 = vmul.f32 %v745_v54, %v739_v33  ;;  %v449_v4 = vpop.permute.xlu2 %448 }
 0x222   : > { %v359_v53 = vsel %vm133_vm0, %v348_v52, 0 }
 0x223   : > { %367 = vmatpush.bf16.xpose.msrb.mxu1 %v359_v53  ;;  %v200_v60 = vpack.c.bf16 %v198_v55, %v198_v55 }
 0x224   : > { %v346_v56 = vpop.permute.xlu0 %345 }
 0x225   : > { %v356_v57 = vsel %vm133_vm0, %v346_v56, 0 }
 0x229   : > { %v453_v58 = vpop.permute.xlu1 %452 }
 0x22a   : > { %v464_v59 = vsel %vm133_vm0, %v453_v58, 0 }
 0x22b   : > { %472 = vmatpush.bf16.xpose.msrb.mxu0 %v464_v59  ;;  %368 = vmatpush.bf16.xpose.msrb.mxu1 %v356_v57 }
 0x22c   : > { %v447_v0 = vpop.permute.xlu0 %446 }
 0x22d   : > { %679 = vmatmul.msk.bf16.gmra.mxu1 %vm164_vm1, %v200_v60 }
 0x231   : > { %v239_v61 = vpop.permute.xlu1 %238 }
 0x232   : > { %681 = vmatmul.msk.bf16.gmra.mxu2 %vm133_vm0, %v239_v61 }
 0x239   : > { %v451_v62 = vpop.permute.xlu1 %450 }
 0x23a   : > { %v461_v63 = vsel %vm133_vm0, %v451_v62, 0 }
 0x23b   : > { %473 = vmatpush.bf16.xpose.msrb.mxu0 %v461_v63 }
 0x241   : > { %v342_v1 = vpop.permute.xlu1 %341 }
 0x242   : > { %688 = vmatmul.msk.bf16.vlgmr.msrb.gmra.mxu0 %vm133_vm0, %v447_v0  ;;  %684 = vmatmul.msk.bf16.vlgmr.msrb.gmra.mxu1 %vm133_vm0, %v342_v1 }
 0x249   : > { %v344_v5 = vpop.permute.xlu1 %343 }
 0x252   : > { %689 = vmatmul.msk.bf16.gmra.mxu0 %vm133_vm0, %v449_v4  ;;  %685 = vmatmul.msk.bf16.gmra.mxu1 %vm133_vm0, %v344_v5 }
 0x257   : > { %v276_v15 = vpop.xlane.xlu0 %275 }
 0x258   : > { %v283_v18 = vsub.f32 %v871_v39, %v276_v15 }
 0x25a   : > { %v286_v20 = vmul.f32 1.442695, %v283_v18 }
 0x274   : > { %v279_v10 = vpop.xlane.xlu1 %278 }
 0x275   : > { %v284_v13 = vsub.f32 %v267_v42, %v279_v10 }
 0x277   : > { %v288_v14 = vmul.f32 1.442695, %v284_v13 }
 0x279   : > { %746 = vpow2.f32 %v288_v14 }
 0x27a   : > { %748 = vpow2.f32 %v286_v20 }
 0x27f   : > { %v896_v21 = vpop.eup %746 }
 0x280   : > { %v295_v23 = vsel %vm164_vm1, %v896_v21, 0.0  ;;  %v749_v26 = vpop.eup %748 }
 0x281   : > { %v292_v30 = vsel %vm164_vm1, %v749_v26, 0.0 }
 0x29a   : > { %v887_v6 = vpop.f32.mrf.mxu1 }
 0x2a2   : > { %v889_v7 = vpop.f32.mrf.mxu1 }
 0x2aa   : > { %v891_v8 = vpop.f32.mrf.mxu1 }
 0x2b2   : > { %v234_v9 = vpop.f32.mrf.mxu1 }
 0x2b5   : > { %v270_v11 = vpop.f32.mrf.mxu2 }
 0x2b6   : > { %v280_v12 = vsel %vm171_vm2, %v270_v11, -inf }
 0x2b7   : > { %281 = vmax.xlane.f32.xlu2 %v280_v12 }
 0x2bd   : > { %v272_v16 = vpop.f32.mrf.mxu2 }
 0x2bf   : > { %v475_v17 = vpop.f32.mrf.mxu0  ;;  %v901_v25 = vpop.f32.mrf.mxu1 }
 0x2c0   : > { %v484_v19 = vsel %vm164_vm1, %v475_v17, -inf  ;;  %v379_v27 = vsel %vm164_vm1, %v901_v25, -inf }
 0x2c1   : > { %485 = vmax.xlane.f32.xlu0 %v484_v19 }
 0x2c7   : > { %v477_v22 = vpop.f32.mrf.mxu0  ;;  %v907_v31 = vpop.f32.mrf.mxu1 }
 0x2c8   : > { %v487_v24 = vsel %vm164_vm1, %v477_v22, -inf  ;;  %v382_v32 = vsel %vm164_vm1, %v907_v31, -inf }
 0x2c9   : > { %296 = vadd.xlane.f32.xlu0 %v295_v23  ;;  %488 = vmax.xlane.f32.xlu1 %v487_v24 }
 0x2cf   : > { %v480_v28 = vpop.f32.mrf.mxu0  ;;  %v921_v50 = vpop.f32.mrf.mxu1 }
 0x2d0   : > { %v490_v29 = vsel %vm171_vm2, %v480_v28, -inf  ;;  %v385_v12 = vsel %vm171_vm2, %v921_v50, -inf }
 0x2d1   : > { %380 = vmax.xlane.f32.xlu0 %v379_v27  ;;  %491 = vmax.xlane.f32.xlu2 %v490_v29 }
 0x2d2   : > { %293 = vadd.xlane.f32.xlu1 %v292_v30 }
 0x2d7   : > { %v482_v33 = vpop.f32.mrf.mxu0  ;;  %v377_v56 = vpop.f32.mrf.mxu1 }
 0x2da   : > { %383 = vmax.xlane.f32.xlu1 %v382_v32 }
 0x2e9   : > { %311 = vrot.lane.b32.xlu2 %v831_v2, %s799_s20 }
 0x2f3   : > { %309 = vrot.lane.b32.xlu1 %v834_v3, %s799_s20 }
 0x32a   : > { %v282_v34 = vpop.xlane.xlu2 %281 }
 0x32b   : > { %v285_v35 = vsub.f32 %v270_v11, %v282_v34 }
 0x32d   : > { %v290_v36 = vmul.f32 1.442695, %v285_v35 }
 0x32f   : > { %750 = vpow2.f32 %v290_v36 }
 0x334   : > { %v486_v38 = vpop.xlane.xlu0 %485 }
 0x335   : > { %v913_v39 = vpop.eup %750  ;;  %v493_v40 = vsub.f32 %v475_v17, %v486_v38 }
 0x336   : > { %v298_v41 = vsel %vm171_vm2, %v913_v39, 0.0 }
 0x337   : > { %v496_v42 = vmul.f32 1.442695, %v493_v40  ;;  %299 = vadd.xlane.f32.xlu0 %v298_v41 }
 0x339   : > { %752 = vpow2.f32 %v496_v42 }
 0x33c   : > { %v489_v43 = vpop.xlane.xlu1 %488  ;;  %v297_v60 = vpop.xlane.xlu0 %296 }
 0x33d   : > { %v494_v44 = vsub.f32 %v477_v22, %v489_v43 }
 0x33f   : > { %v917_v45 = vpop.eup %752  ;;  %v498_v46 = vmul.f32 1.442695, %v494_v44 }
 0x340   : > { %v502_v47 = vsel %vm164_vm1, %v917_v45, 0.0 }
 0x341   : > { %754 = vpow2.f32 %v498_v46  ;;  %503 = vadd.xlane.f32.xlu2 %v502_v47 }
 0x344   : > { %v492_v48 = vpop.xlane.xlu2 %491  ;;  %v381_v9 = vpop.xlane.xlu0 %380 }
 0x345   : > { %v495_v49 = vsub.f32 %v480_v28, %v492_v48  ;;  %v294_v59 = vpop.xlane.xlu1 %293  ;;  %v388_v10 = vsub.f32 %v901_v25, %v381_v9 }
 0x347   : > { %v923_v51 = vpop.eup %754  ;;  %v500_v52 = vmul.f32 1.442695, %v495_v49 }
 0x348   : > { %v505_v53 = vsel %vm164_vm1, %v923_v51, 0.0 }
 0x349   : > { %756 = vpow2.f32 %v500_v52  ;;  %506 = vadd.xlane.f32.xlu1 %v505_v53 }
 0x34a   : > { %758 = vrcp.f32 %v294_v59 }
 0x34b   : > { %416 = vrot.lane.b32.xlu0 %v831_v2, %s800_s21  ;;  %760 = vrcp.f32 %v297_v60 }
 0x34c   : > { %v312_v54 = vpop.permute.xlu2 %311 }
 0x34d   : > { %v321_v55 = vand.u32 %v312_v54, %v861_v37  ;;  %v384_v61 = vpop.xlane.xlu1 %383 }
 0x34e   : > { %v389_v11 = vsub.f32 %v907_v31, %v384_v61 }
 0x34f   : > { %v930_v57 = vpop.eup %756  ;;  %329 = vmatpush.bf16.msra.mxu3 %v321_v55 }
 0x350   : > { %v508_v58 = vsel %vm171_vm2, %v930_v57, 0.0  ;;  %v759_v62 = vpop.eup %758  ;;  %v393_v13 = vmul.f32 1.442695, %v389_v11 }
 0x351   : > { %509 = vadd.xlane.f32.xlu1 %v508_v58  ;;  %v761_v63 = vpop.eup %760  ;;  %v304_v0 = vmul.f32 %v759_v62, %v749_v26 }
 0x352   : > { %v305_v4 = vmul.f32 %v761_v63, %v896_v21 }
 0x353   : > { %521 = vrot.lane.b32.xlu0 %v831_v2, %s801_s22  ;;  %v391_v2 = vmul.f32 1.442695, %v388_v10 }
 0x354   : > { %v307_v5 = vpack.c.bf16 %v305_v4, %v304_v0 }
 0x355   : > { %762 = vpow2.f32 %v391_v2 }
 0x356   : > { %764 = vpow2.f32 %v393_v13 }
 0x359   : > { %519 = vrot.lane.b32.xlu2 %v834_v3, %s801_s22 }
 0x35b   : > { %v763_v14 = vpop.eup %762 }
 0x35c   : > { %v397_v15 = vsel %vm164_vm1, %v763_v14, 0.0  ;;  %v765_v16 = vpop.eup %764 }
 0x35d   : > { %v400_v17 = vsel %vm164_vm1, %v765_v16, 0.0 }
 0x365   : > { %v310_v1 = vpop.permute.xlu1 %309 }
 0x366   : > { %330 = vmatpush.bf16.msra.mxu3 %v310_v1 }
 0x369   : > { %682 = vmatmul.msk.bf16.vlgmr.msra.gmra.mxu3 %vm164_vm1, %v307_v5 }
 0x37d   : > { %386 = vmax.xlane.f32.xlu0 %v385_v12 }
 0x385   : > { %398 = vadd.xlane.f32.xlu0 %v397_v15 }
 0x38d   : > { %401 = vadd.xlane.f32.xlu0 %v400_v17 }
 0x3a1   : > { %414 = vrot.lane.b32.xlu0 %v834_v3, %s800_s21 }
 0x3aa   : > { %v300_v18 = vpop.xlane.xlu0 %299 }
 0x3ab   : > { %766 = vrcp.f32 %v300_v18 }
 0x3b1   : > { %v767_v19 = vpop.eup %766 }
 0x3b2   : > { %v306_v20 = vmul.f32 %v767_v19, %v913_v39 }
 0x3b4   : > { %v308_v21 = vpack.c.bf16 %v306_v20, %v306_v20  ;;  %v504_v25 = vpop.xlane.xlu2 %503 }
 0x3b6   : > { %683 = vmatmul.msk.bf16.gmra.mxu3 %vm164_vm1, %v308_v21 }
 0x3bc   : > { %v507_v22 = vpop.xlane.xlu1 %506  ;;  %v520_v30 = vpop.permute.xlu2 %519 }
 0x3bd   : > { %v417_v23 = vpop.permute.xlu0 %416  ;;  %768 = vrcp.f32 %v507_v22 }
 0x3be   : > { %v426_v24 = vand.u32 %v417_v23, %v861_v37  ;;  %770 = vrcp.f32 %v504_v25 }
 0x3c0   : > { %434 = vmatpush.bf16.msrb.mxu3 %v426_v24 }
 0x3c3   : > { %v769_v27 = vpop.eup %768 }
 0x3c4   : > { %v771_v28 = vpop.eup %770  ;;  %v515_v29 = vmul.f32 %v769_v27, %v923_v51  ;;  %v510_v32 = vpop.xlane.xlu1 %509 }
 0x3c5   : > { %v522_v26 = vpop.permute.xlu0 %521  ;;  %v514_v31 = vmul.f32 %v771_v28, %v917_v45  ;;  %772 = vrcp.f32 %v510_v32 }
 0x3c6   : > { %v531_v3 = vand.u32 %v522_v26, %v861_v37 }
 0x3c7   : > { %v517_v33 = vpack.c.bf16 %v515_v29, %v514_v31 }
 0x3c8   : > { %539 = vmatpush.bf16.msrb.mxu2 %v531_v3  ;;  %v607_v3 = vld [vmem:[%s116_s28 + $0x8] sm:$0x1] }
 0x3cb   : > { %v773_v34 = vpop.eup %772 }
 0x3cc   : > { %540 = vmatpush.bf16.msrb.mxu2 %v520_v30  ;;  %v516_v35 = vmul.f32 %v773_v34, %v930_v57 }
 0x3ce   : > { %v518_v36 = vpack.c.bf16 %v516_v35, %v516_v35 }
 0x3cf   : > { %690 = vmatmul.msk.bf16.vlgmr.msrb.gmra.mxu2 %vm164_vm1, %v517_v33 }
 0x3df   : > { %691 = vmatmul.msk.bf16.gmra.mxu2 %vm164_vm1, %v518_v36 }
 0x3ec   : > { %v332_v37 = vpop.f32.mrf.mxu3 }
 0x3f0   : > { %v387_v38 = vpop.xlane.xlu0 %386 }
 0x3f1   : > { %v390_v39 = vsub.f32 %v921_v50, %v387_v38 }
 0x3f3   : > { %v395_v40 = vmul.f32 1.442695, %v390_v39 }
 0x3f4   : > { %v334_v41 = vpop.f32.mrf.mxu3 }
 0x3f5   : > { %774 = vpow2.f32 %v395_v40  ;;  %556 = vrot.lane.b32.xlu2 %v334_v41, %s802_s23 }
 0x3f8   : > { %v399_v43 = vpop.xlane.xlu0 %398 }
 0x3fb   : > { %v775_v42 = vpop.eup %774 }
 0x3fc   : > { %v403_v44 = vsel %vm171_vm2, %v775_v42, 0.0 }
 0x3fd   : > { %404 = vadd.xlane.f32.xlu0 %v403_v44 }
 0x400   : > { %v402_v45 = vpop.xlane.xlu0 %401 }
 0x401   : > { %776 = vrcp.f32 %v402_v45 }
 0x402   : > { %778 = vrcp.f32 %v399_v43 }
 0x407   : > { %v777_v46 = vpop.eup %776 }
 0x408   : > { %v779_v47 = vpop.eup %778  ;;  %v410_v48 = vmul.f32 %v777_v46, %v765_v16 }
 0x409   : > { %v409_v49 = vmul.f32 %v779_v47, %v763_v14 }
 0x40b   : > { %v412_v50 = vpack.c.bf16 %v410_v48, %v409_v49 }
 0x413   : > { %v415_v51 = vpop.permute.xlu0 %414 }
 0x414   : > { %435 = vmatpush.bf16.msrb.mxu3 %v415_v51 }
 0x417   : > { %686 = vmatmul.msk.bf16.vlgmr.msrb.gmra.mxu3 %vm164_vm1, %v412_v50 }
 0x439   : > { %v337_v52 = vpop.f32.mrf.mxu3 }
 0x43a   : > { %v719_v53 = vpack.i.bf16 %v332_v37, %v337_v52 }
 0x43c   : > { %720 = vrot.lane.b32.xlu1 %v719_v53, %s802_s23 }
 0x441   : > { %v339_v54 = vpop.f32.mrf.mxu3 }
 0x44f   : > { %v557_v2 = vpop.permute.xlu2 %556 }
 0x450   : > { %v588_v11 = vsel %vm133_vm0, %v889_v7, %v557_v2 }
 0x452   : > { %v542_v55 = vpop.f32.mrf.mxu2 }
 0x45a   : > { %v544_v56 = vpop.f32.mrf.mxu2 }
 0x45b   : > { %580 = vrot.lane.b32.xlu0 %v544_v56, %s803_s24 }
 0x462   : > { %v547_v57 = vpop.f32.mrf.mxu2 }
 0x463   : > { %v729_v58 = vpack.i.bf16 %v542_v55, %v547_v57 }
 0x46a   : > { %v549_v59 = vpop.f32.mrf.mxu2 }
 0x470   : > { %v405_v60 = vpop.xlane.xlu0 %404 }
 0x471   : > { %780 = vrcp.f32 %v405_v60 }
 0x477   : > { %v781_v61 = vpop.eup %780 }
 0x478   : > { %v411_v62 = vmul.f32 %v781_v61, %v775_v42 }
 0x47a   : > { %v413_v63 = vpack.c.bf16 %v411_v62, %v411_v62 }
 0x47c   : > { %687 = vmatmul.msk.bf16.gmra.mxu3 %vm164_vm1, %v413_v63 }
 0x49a   : > { %v437_v0 = vpop.f32.mrf.mxu3 }
 0x4a2   : > { %v439_v1 = vpop.f32.mrf.mxu3 }
 0x4a3   : > { %568 = vrot.lane.b32.xlu1 %v439_v1, %s804_s25 }
 0x4ae   : > { %v721_v10 = vpop.permute.xlu1 %720 }
 0x4af   : > { %v723_v18 = vunpack.i.h.bf16 %v721_v10  ;;  %v722_v19 = vunpack.i.l.bf16 %v721_v10 }
 0x4b1   : > { %v587_v22 = vsel %vm133_vm0, %v887_v6, %v723_v18  ;;  %v589_v23 = vsel %vm133_vm0, %v891_v8, %v722_v19 }
 0x4cd   : > { %v581_v13 = vpop.permute.xlu0 %580 }
 0x4ff   : > { %v442_v4 = vpop.f32.mrf.mxu3 }
 0x500   : > { %v724_v5 = vpack.i.bf16 %v437_v0, %v442_v4 }
 0x502   : > { %725 = vrot.lane.b32.xlu2 %v724_v5, %s804_s25 }
 0x507   : > { %v444_v9 = vpop.f32.mrf.mxu3 }
 0x50a   : > { %730 = vrot.lane.b32.xlu2 %v729_v58, %s803_s24 }
 0x515   : > { %v569_v12 = vpop.permute.xlu1 %568 }
 0x516   : > { %v592_v14 = vsel %vm590_vm4, %v588_v11, %v569_v12 }
 0x517   : > { %v596_v15 = vsel %vm594_vm5, %v592_v14, %v581_v13 }
 0x518   : > { %v599_v16 = vpack.c.bf16 %v596_v15, %v596_v15 }
 0x51a   : > { %603 = vst.msk [vmem:[%s116_s28 + $0x4] sm:$0xf] %vm601_vm6, %v599_v16 }
 0x55c   : > { %v726_v17 = vpop.permute.xlu2 %725 }
 0x55d   : > { %v728_v20 = vunpack.i.h.bf16 %v726_v17  ;;  %v727_v7 = vunpack.i.l.bf16 %v726_v17 }
 0x55f   : > { %v591_v26 = vsel %vm590_vm4, %v587_v22, %v728_v20  ;;  %v593_v27 = vsel %vm590_vm4, %v589_v23, %v727_v7 }
 0x564   : > { %v731_v21 = vpop.permute.xlu2 %730 }
 0x565   : > { %v733_v24 = vunpack.i.h.bf16 %v731_v21  ;;  %v732_v25 = vunpack.i.l.bf16 %v731_v21 }
 0x567   : > { %v595_v28 = vsel %vm594_vm5, %v591_v26, %v733_v24  ;;  %v597_v29 = vsel %vm594_vm5, %v593_v27, %v732_v25 }
 0x568   : > { %v598_v30 = vpack.c.bf16 %v595_v28, %v595_v28  ;;  %v600_v31 = vpack.c.bf16 %v597_v29, %v597_v29 }
 0x56a   : > { %602 = vst.msk [vmem:[%s116_s28] sm:$0xf] %vm601_vm6, %v598_v30  ;;  %v608_v6 = vsel %vm606_vm9, %v600_v31, %v607_v3 }
 0x56b   : > { %609 = vst [vmem:[%s116_s28 + $0x8] sm:$0x1] %v608_v6 }
 0x56c PF: > { %s11_s6 = sadd.s32 1, %s788_s6  }
 0x56d   : > { %p8_p4 = scmp.ge.s32.totalorder %s11_s6, 4  }
 0x56f   :  { %10 = sbr.rel (!%p8_p4) target bundleno = 1 (0x1), region = 54 }

// kernel: vit_forward.37
= control target key start
LH: loop header
LB: loop body
LE: loop exit
PB: predicated region body
PF: predicated region fallthrough
CT: control target
= control target key end

     0   :  { %s306_s1 = inlined_call_operand.vmem [shape: bf16[128,128], index: 1, kind: input, shape index: {}]   ;;  %s307_s2 = inlined_call_operand.vmem [shape: f32[1,128], index: 2, kind: input, shape index: {}]   ;;  %s308_s0 = inlined_call_operand.vmem [shape: bf16[34,128], index: 0, kind: input, shape index: {}]   ;;  %s309_s3 = inlined_call_operand.vmem [shape: f32[34,128], index: 3, kind: input, shape index: {}]   ;;  %s310_s4 = inlined_call_operand.vmem [shape: f32[34,128], index: 4, kind: output, shape index: {}]  }
   0x1   :  { %v197_v0 = vld [vmem:[%s306_s1 + $0x38] sm:$0xff]  ;;  %v196_v1 = vld [vmem:[%s306_s1 + $0x30] sm:$0xff]  ;;  %v195_v2 = vld [vmem:[%s306_s1 + $0x28] sm:$0xff] }
   0x2   :  { %106 = vmatpush.bf16.msra.mxu0 %v197_v0  ;;  %198 = vmatpush.bf16.msra.mxu1 %v197_v0  ;;  %v194_v3 = vld [vmem:[%s306_s1 + $0x20] sm:$0xff]  ;;  %v193_v4 = vld [vmem:[%s306_s1 + $0x18] sm:$0xff]  ;;  %v192_v5 = vld [vmem:[%s306_s1 + $0x10] sm:$0xff] }
   0x3   :  { %199 = vmatpush.bf16.msra.mxu2 %v197_v0  ;;  %v191_v6 = vld [vmem:[%s306_s1 + $0x8] sm:$0xff]  ;;  %v21_v7 = vld [vmem:[%s308_s0 + $0x10] sm:$0x1]  ;;  %v190_v8 = vld [vmem:[%s306_s1] sm:$0xff] }
   0x4   :  { %v51_v9 = vunpack.c.l.b16 %v21_v7  ;;  %v188_v10 = vld [vmem:[%s308_s0] sm:$0xff]  ;;  %v189_v11 = vld [vmem:[%s308_s0 + $0x8] sm:$0xff]  ;;  %v131_v17 = vld [vmem:[%s309_s3 + $0x10] sm:$0xff] }
   0x5   :  { %v214_v13 = vld [vmem:[%s307_s2] ss:$0 sm:$0xff]  ;;  %v130_v26 = vld [vmem:[%s309_s3 + $0x8] sm:$0xff]  ;;  %v132_v28 = vld [vmem:[%s309_s3 + $0x18] sm:$0xff] }
   0x6   :  { %107 = vmatpush.bf16.msra.mxu0 %v196_v1  ;;  %200 = vmatpush.bf16.msra.mxu1 %v196_v1  ;;  %v54_v12 = vpack.c.b16 %v51_v9, %v51_v9  ;;  %v129_v15 = vld [vmem:[%s309_s3] sm:$0xff] }
   0x7   :  { %201 = vmatpush.bf16.msra.mxu2 %v196_v1  ;;  %v133_v23 = vld [vmem:[%s309_s3 + $0x20] sm:$0x3] }
   0xa   :  { %108 = vmatpush.bf16.msra.mxu0 %v195_v2  ;;  %202 = vmatpush.bf16.msra.mxu1 %v195_v2 }
   0xb   :  { %203 = vmatpush.bf16.msra.mxu2 %v195_v2 }
   0xe   :  { %109 = vmatpush.bf16.msra.mxu0 %v194_v3  ;;  %204 = vmatpush.bf16.msra.mxu1 %v194_v3 }
   0xf   :  { %205 = vmatpush.bf16.msra.mxu2 %v194_v3 }
  0x12   :  { %110 = vmatpush.bf16.msra.mxu0 %v193_v4  ;;  %206 = vmatpush.bf16.msra.mxu1 %v193_v4 }
  0x13   :  { %207 = vmatpush.bf16.msra.mxu2 %v193_v4 }
  0x16   :  { %111 = vmatpush.bf16.msra.mxu0 %v192_v5  ;;  %208 = vmatpush.bf16.msra.mxu1 %v192_v5 }
  0x17   :  { %209 = vmatpush.bf16.msra.mxu2 %v192_v5 }
  0x1a   :  { %112 = vmatpush.bf16.msra.mxu0 %v191_v6  ;;  %210 = vmatpush.bf16.msra.mxu1 %v191_v6 }
  0x1b   :  { %211 = vmatpush.bf16.msra.mxu2 %v191_v6 }
  0x1e   :  { %113 = vmatpush.bf16.msra.mxu0 %v190_v8  ;;  %212 = vmatpush.bf16.msra.mxu1 %v190_v8 }
  0x1f   :  { %213 = vmatpush.bf16.msra.mxu2 %v190_v8 }
  0x21   :  { %114 = vmatmul.bf16.vlgmr.msra.gmra.mxu0 %v188_v10  ;;  %119 = vmatmul.bf16.vlgmr.msra.gmra.mxu1 %v189_v11 }
  0x22   :  { %124 = vmatmul.bf16.vlgmr.msra.gmra.mxu2 %v54_v12 }
  0x9e   :  { %v115_v14 = vpop.f32.mrf.mxu0  ;;  %v120_v16 = vpop.f32.mrf.mxu1 }
  0x9f   :  { %v116_v18 = vadd.f32 %v214_v13, %v115_v14  ;;  %v121_v19 = vadd.f32 %v214_v13, %v120_v16 }
  0xa1   :  { %v134_v20 = vadd.f32 %v129_v15, %v116_v18  ;;  %v136_v21 = vadd.f32 %v131_v17, %v121_v19 }
  0xa3   :  { %139 = vst [vmem:[%s310_s4] sm:$0xff] %v134_v20 }
  0xa4   :  { %141 = vst [vmem:[%s310_s4 + $0x10] sm:$0xff] %v136_v21 }
  0xa5   :  { %v125_v22 = vpop.f32.mrf.mxu2 }
  0xa6   :  { %v126_v24 = vadd.f32 %v214_v13, %v125_v22  ;;  %v117_v25 = vpop.f32.mrf.mxu0  ;;  %v122_v27 = vpop.f32.mrf.mxu1 }
  0xa7   :  { %v118_v29 = vadd.f32 %v214_v13, %v117_v25  ;;  %v123_v30 = vadd.f32 %v214_v13, %v122_v27 }
  0xa8   :  { %v138_v31 = vadd.f32 %v133_v23, %v126_v24 }
  0xa9   :  { %v135_v32 = vadd.f32 %v130_v26, %v118_v29  ;;  %v137_v33 = vadd.f32 %v132_v28, %v123_v30 }
  0xaa   :  { %143 = vst [vmem:[%s310_s4 + $0x20] sm:$0x3] %v138_v31 }
  0xab   :  { %140 = vst [vmem:[%s310_s4 + $0x8] sm:$0xff] %v135_v32 }
  0xac   :  { %142 = vst [vmem:[%s310_s4 + $0x18] sm:$0xff] %v137_v33 }
  0xad   :  { %v127_v34 = vpop.f32.mrf.mxu2 }

// kernel: vit_forward.36
= control target key start
LH: loop header
LB: loop body
LE: loop exit
PB: predicated region body
PF: predicated region fallthrough
CT: control target
= control target key end

     0   :  { %vm26_vm0 = vcmask 261120   ;;  %vm39_vm1 = vcmask 254976   ;;  %v511_v10 = vmov 32.0   ;;  %s789_s0 = inlined_call_operand.vmem [shape: f32[34,32], index: 0, kind: input, shape index: {}]   ;;  %s790_s3 = inlined_call_operand.vmem [shape: f32[1,32], index: 3, kind: input, shape index: {}]   ;;  %s791_s4 = inlined_call_operand.vmem [shape: f32[1,32], index: 4, kind: input, shape index: {}]   ;;  %s792_s2 = inlined_call_operand.vmem [shape: f32[1,128], index: 2, kind: input, shape index: {}]   ;;  %s793_s1 = inlined_call_operand.vmem [shape: bf16[32,128], index: 1, kind: input, shape index: {}]   ;;  %s794_s5 = inlined_call_operand.vmem [shape: bf16[34,128], index: 5, kind: output, shape index: {}]  }
   0x1   :  { %v23_v0 = vld [vmem:[%s789_s0 + $0x10] sm:$0xff]  ;;  %v21_v1 = vld [vmem:[%s789_s0] sm:$0xff]  ;;  %v24_v6 = vld [vmem:[%s789_s0 + $0x18] sm:$0xff]  ;;  %489 = vrcp.f32 %v511_v10 }
   0x2   :  { %v33_v2 = vsel %vm26_vm0, %v23_v0, 0.0  ;;  %v27_v3 = vsel %vm26_vm0, %v21_v1, 0.0  ;;  %v25_v4 = vld [vmem:[%s789_s0 + $0x20] sm:$0x3]  ;;  %v22_v7 = vld [vmem:[%s789_s0 + $0x8] sm:$0xff]  ;;  %v36_v8 = vsel %vm26_vm0, %v24_v6, 0.0 }
   0x3   :  { %34 = vadd.xlane.f32.xlu1 %v33_v2  ;;  %28 = vadd.xlane.f32.xlu0 %v27_v3  ;;  %v40_v5 = vsel %vm39_vm1, %v25_v4, 0.0  ;;  %v30_v9 = vsel %vm26_vm0, %v22_v7, 0.0  ;;  %v469_v42 = vld [vmem:[%s793_s1 + $0x8] sm:$0xff]  ;;  %v468_v49 = vld [vmem:[%s793_s1] sm:$0xff] }
   0x4   :  { %41 = vadd.xlane.f32.xlu2 %v40_v5  ;;  %201 = vmatpush.bf16.msra.mxu0 %v469_v42 }
   0x5   :  { %481 = vmatpush.bf16.msra.mxu1 %v469_v42  ;;  %482 = vmatpush.bf16.msra.mxu2 %v469_v42 }
   0x7   :  { %v490_v11 = vpop.eup %489 }
   0x8   :  { %v44_v12 = vmul.f32 32.0, %v490_v11  ;;  %vm48_vm2 = vweird.f32 %v490_v11  ;;  %202 = vmatpush.bf16.msra.mxu0 %v468_v49 }
   0x9   :  { %483 = vmatpush.bf16.msra.mxu1 %v468_v49  ;;  %484 = vmatpush.bf16.msra.mxu2 %v468_v49 }
   0xa   :  { %v45_v13 = vsub.f32 1.0, %v44_v12 }
   0xb   :  { %37 = vadd.xlane.f32.xlu1 %v36_v8  ;;  %31 = vadd.xlane.f32.xlu0 %v30_v9 }
   0xc   :  { %v46_v14 = vmul.f32 %v490_v11, %v45_v13 }
   0xe   :  { %v47_v15 = vadd.f32 %v490_v11, %v46_v14 }
  0x10   :  { %v562_v16 = vsel %vm48_vm2, %v490_v11, %v47_v15 }
  0x76   :  { %v35_v17 = vpop.xlane.xlu1 %34  ;;  %v29_v18 = vpop.xlane.xlu0 %28 }
  0x77   :  { %v52_v19 = vmul.f32 %v562_v16, %v35_v17  ;;  %v50_v20 = vmul.f32 %v562_v16, %v29_v18  ;;  %v42_v25 = vpop.xlane.xlu2 %41 }
  0x78   :  { %v54_v32 = vmul.f32 %v562_v16, %v42_v25 }
  0x79   :  { %v566_v21 = vsub.f32 %v23_v0, %v52_v19  ;;  %v568_v22 = vsub.f32 %v21_v1, %v50_v20 }
  0x7a   :  { %v583_v35 = vsub.f32 %v25_v4, %v54_v32 }
  0x7b   :  { %v62_v23 = vmul.f32 %v566_v21, %v566_v21  ;;  %v60_v24 = vmul.f32 %v568_v22, %v568_v22 }
  0x7c   :  { %v64_v40 = vmul.f32 %v583_v35, %v583_v35 }
  0x7d   :  { %v71_v26 = vsel %vm26_vm0, %v62_v23, 0.0  ;;  %v65_v27 = vsel %vm26_vm0, %v60_v24, 0.0  ;;  %v486_v23 = vld [vmem:[%s790_s3] ss:$0 sm:$0xff] }
  0x7e   :  { %72 = vadd.xlane.f32.xlu1 %v71_v26  ;;  %v38_v28 = vpop.xlane.xlu1 %37  ;;  %66 = vadd.xlane.f32.xlu2 %v65_v27  ;;  %v32_v29 = vpop.xlane.xlu0 %31  ;;  %v77_v41 = vsel %vm39_vm1, %v64_v40, 0.0 }
  0x7f   :  { %v53_v30 = vmul.f32 %v562_v16, %v38_v28  ;;  %v51_v31 = vmul.f32 %v562_v16, %v32_v29 }
  0x81   :  { %v579_v33 = vsub.f32 %v24_v6, %v53_v30  ;;  %v581_v34 = vsub.f32 %v22_v7, %v51_v31 }
  0x83   :  { %v63_v36 = vmul.f32 %v579_v33, %v579_v33  ;;  %v61_v37 = vmul.f32 %v581_v34, %v581_v34 }
  0x85   :  { %v74_v38 = vsel %vm26_vm0, %v63_v36, 0.0  ;;  %v68_v39 = vsel %vm26_vm0, %v61_v37, 0.0 }
  0x86   :  { %75 = vadd.xlane.f32.xlu2 %v74_v38  ;;  %69 = vadd.xlane.f32.xlu0 %v68_v39 }
  0x8e   :  { %78 = vadd.xlane.f32.xlu0 %v77_v41 }
  0xf1   :  { %v73_v43 = vpop.xlane.xlu1 %72  ;;  %v67_v44 = vpop.xlane.xlu2 %66 }
  0xf2   :  { %v82_v45 = vmul.f32 %v73_v43, %v562_v16  ;;  %v80_v46 = vmul.f32 %v67_v44, %v562_v16 }
  0xf4   :  { %v87_v47 = vadd.f32 1e-05, %v82_v45  ;;  %v85_v48 = vadd.f32 1e-05, %v80_v46 }
  0xf6   :  { %491 = vrsqrt.f32 %v87_v47  ;;  %vm116_vm3 = vweird.f32 %v87_v47  ;;  %vm96_vm7 = vweird.f32 %v85_v48 }
  0xf7   :  { %493 = vrsqrt.f32 %v85_v48 }
  0xf9   :  { %v76_v50 = vpop.xlane.xlu2 %75  ;;  %v70_v51 = vpop.xlane.xlu0 %69 }
  0xfa   :  { %v83_v52 = vmul.f32 %v76_v50, %v562_v16  ;;  %v81_v53 = vmul.f32 %v70_v51, %v562_v16  ;;  %v488_v51 = vld [vmem:[%s792_s2] ss:$0 sm:$0xff] }
  0xfc   :  { %v492_v54 = vpop.eup %491  ;;  %v88_v55 = vadd.f32 1e-05, %v83_v52  ;;  %v86_v56 = vadd.f32 1e-05, %v81_v53 }
  0xfd   :  { %v494_v57 = vpop.eup %493  ;;  %v111_v58 = vmul.f32 %v492_v54, %v87_v47  ;;  %vm117_vm4 = vweird.f32 %v492_v54 }
  0xfe   :  { %v91_v59 = vmul.f32 %v494_v57, %v85_v48  ;;  %495 = vrsqrt.f32 %v88_v55  ;;  %vm97_vm5 = vweird.f32 %v494_v57  ;;  %vm118_vm6 = vmor %vm116_vm3, %vm117_vm4  ;;  %vm126_vm9 = vweird.f32 %v88_v55 }
  0xff   :  { %v112_v60 = vmul.f32 %v492_v54, %v111_v58  ;;  %497 = vrsqrt.f32 %v86_v56  ;;  %vm98_vm8 = vmor %vm96_vm7, %vm97_vm5  ;;  %vm106_vm13 = vweird.f32 %v86_v56 }
 0x100   :  { %v92_v61 = vmul.f32 %v494_v57, %v91_v59 }
 0x101   :  { %v113_v62 = vmul.f32 0.5, %v112_v60  ;;  %v79_v63 = vpop.xlane.xlu0 %78 }
 0x102   :  { %v93_v0 = vmul.f32 0.5, %v92_v61  ;;  %v84_v1 = vmul.f32 %v79_v63, %v562_v16 }
 0x103   :  { %v114_v2 = vsub.f32 1.5, %v113_v62 }
 0x104   :  { %v496_v3 = vpop.eup %495  ;;  %v94_v4 = vsub.f32 1.5, %v93_v0  ;;  %v89_v5 = vadd.f32 1e-05, %v84_v1 }
 0x105   :  { %v498_v6 = vpop.eup %497  ;;  %v115_v7 = vmul.f32 %v492_v54, %v114_v2  ;;  %v121_v8 = vmul.f32 %v496_v3, %v88_v55  ;;  %vm127_vm10 = vweird.f32 %v496_v3 }
 0x106   :  { %v95_v9 = vmul.f32 %v494_v57, %v94_v4  ;;  %v101_v10 = vmul.f32 %v498_v6, %v86_v56  ;;  %499 = vrsqrt.f32 %v89_v5  ;;  %vm107_vm11 = vweird.f32 %v498_v6  ;;  %vm128_vm12 = vmor %vm126_vm9, %vm127_vm10 }
 0x107   :  { %v122_v11 = vmul.f32 %v496_v3, %v121_v8  ;;  %v119_v13 = vsel %vm118_vm6, %v492_v54, %v115_v7  ;;  %vm108_vm14 = vmor %vm106_vm13, %vm107_vm11  ;;  %vm136_vm1 = vweird.f32 %v89_v5 }
 0x108   :  { %v102_v12 = vmul.f32 %v498_v6, %v101_v10  ;;  %v99_v15 = vsel %vm98_vm8, %v494_v57, %v95_v9  ;;  %v142_v19 = vmul.f32 %v119_v13, %v566_v21  ;;  %v487_v21 = vld [vmem:[%s791_s4] ss:$0 sm:$0xff] }
 0x109   :  { %v123_v14 = vmul.f32 0.5, %v122_v11  ;;  %v140_v24 = vmul.f32 %v99_v15, %v568_v22 }
 0x10a   :  { %v103_v16 = vmul.f32 0.5, %v102_v12  ;;  %v151_v32 = vmul.f32 %v486_v23, %v142_v19 }
 0x10b   :  { %v124_v17 = vsub.f32 1.5, %v123_v14  ;;  %v149_v22 = vmul.f32 %v486_v23, %v140_v24 }
 0x10c   :  { %v500_v18 = vpop.eup %499  ;;  %v104_v20 = vsub.f32 1.5, %v103_v16  ;;  %v160_v41 = vadd.f32 %v487_v21, %v151_v32 }
 0x10d   :  { %v125_v25 = vmul.f32 %v496_v3, %v124_v17  ;;  %v131_v26 = vmul.f32 %v500_v18, %v89_v5  ;;  %vm137_vm15 = vweird.f32 %v500_v18  ;;  %v158_v44 = vadd.f32 %v487_v21, %v149_v22 }
 0x10e   :  { %v105_v27 = vmul.f32 %v498_v6, %v104_v20  ;;  %vm138_vm2 = vmor %vm136_vm1, %vm137_vm15 }
 0x10f   :  { %v129_v28 = vsel %vm128_vm12, %v496_v3, %v125_v25  ;;  %v132_v29 = vmul.f32 %v500_v18, %v131_v26 }
 0x110   :  { %v143_v30 = vmul.f32 %v129_v28, %v579_v33  ;;  %v109_v31 = vsel %vm108_vm14, %v498_v6, %v105_v27 }
 0x111   :  { %v141_v36 = vmul.f32 %v109_v31, %v581_v34  ;;  %v133_v37 = vmul.f32 0.5, %v132_v29 }
 0x112   :  { %v152_v38 = vmul.f32 %v486_v23, %v143_v30 }
 0x113   :  { %v134_v39 = vsub.f32 1.5, %v133_v37  ;;  %v150_v40 = vmul.f32 %v486_v23, %v141_v36 }
 0x114   :  { %v161_v42 = vadd.f32 %v487_v21, %v152_v38 }
 0x115   :  { %v135_v43 = vmul.f32 %v500_v18, %v134_v39  ;;  %v159_v33 = vadd.f32 %v487_v21, %v150_v40 }
 0x116   :  { %v164_v45 = vpack.c.bf16 %v161_v42, %v160_v41 }
 0x117   :  { %v139_v46 = vsel %vm138_vm2, %v500_v18, %v135_v43  ;;  %v163_v47 = vpack.c.bf16 %v159_v33, %v158_v44 }
 0x118   :  { %461 = vmatmul.msk.bf16.vlgmr.msra.gmra.mxu1 %vm26_vm0, %v164_v45  ;;  %v144_v34 = vmul.f32 %v139_v46, %v583_v35 }
 0x119   :  { %460 = vmatmul.msk.bf16.vlgmr.msra.gmra.mxu0 %vm26_vm0, %v163_v47 }
 0x11a   :  { %v153_v48 = vmul.f32 %v486_v23, %v144_v34 }
 0x11c   :  { %v162_v49 = vadd.f32 %v487_v21, %v153_v48 }
 0x11e   :  { %v165_v50 = vpack.c.bf16 %v162_v49, %v162_v49 }
 0x120   :  { %462 = vmatmul.msk.bf16.vlgmr.msra.gmra.mxu2 %vm26_vm0, %v165_v50 }
 0x195   :  { %v209_v52 = vpop.f32.mrf.mxu1 }
 0x196   :  { %v204_v53 = vpop.f32.mrf.mxu0  ;;  %v622_v54 = vadd.f32 %v488_v51, %v209_v52 }
 0x197   :  { %v624_v55 = vadd.f32 %v488_v51, %v204_v53 }
 0x198   :  { %v627_v56 = vmul.f32 0.70710677, %v622_v54 }
 0x199   :  { %v630_v35 = vmul.f32 0.70710677, %v624_v55 }
 0x19a   :  { %v308_v57 = vmul.f32 %v627_v56, %v627_v56 }
 0x19b   :  { %v228_v58 = vmul.f32 %v630_v35, %v630_v35 }
 0x19c   :  { %v636_v59 = vmin.f32 %v308_v57, 16.0 }
 0x19d   :  { %v638_v60 = vmin.f32 %v228_v58, 16.0  ;;  %v211_v61 = vpop.f32.mrf.mxu1 }
 0x19e   :  { %v310_v62 = vmul.f32 2.1237322e-06, %v636_v59  ;;  %v321_v63 = vmul.f32 3.8918573e-05, %v636_v59  ;;  %v206_v0 = vpop.f32.mrf.mxu0  ;;  %v642_v1 = vadd.f32 %v488_v51, %v211_v61 }
 0x19f   :  { %v230_v2 = vmul.f32 2.1237322e-06, %v638_v60  ;;  %v241_v3 = vmul.f32 3.8918573e-05, %v638_v60  ;;  %v646_v4 = vadd.f32 %v488_v51, %v206_v0 }
 0x1a0   :  { %v322_v5 = vadd.f32 0.001143296, %v321_v63  ;;  %v311_v8 = vadd.f32 0.00028619796, %v310_v62  ;;  %v653_v11 = vmul.f32 0.70710677, %v642_v1 }
 0x1a1   :  { %v231_v6 = vadd.f32 0.00028619796, %v230_v2  ;;  %v242_v7 = vadd.f32 0.001143296, %v241_v3  ;;  %v650_v10 = vmul.f32 0.70710677, %v646_v4 }
 0x1a2   :  { %v323_v9 = vmul.f32 %v322_v5, %v636_v59  ;;  %v348_v17 = vmul.f32 %v653_v11, %v653_v11  ;;  %v312_v19 = vmul.f32 %v311_v8, %v636_v59 }
 0x1a3   :  { %v243_v12 = vmul.f32 %v242_v7, %v638_v60  ;;  %v214_v13 = vpop.f32.mrf.mxu2  ;;  %v232_v14 = vmul.f32 %v231_v6, %v638_v60  ;;  %v268_v16 = vmul.f32 %v650_v10, %v650_v10 }
 0x1a4   :  { %v324_v15 = vadd.f32 0.014752088, %v323_v9  ;;  %v665_v24 = vmin.f32 %v348_v17, 16.0  ;;  %v313_v30 = vadd.f32 0.0036580483, %v312_v19  ;;  %v672_v37 = vadd.f32 %v488_v51, %v214_v13 }
 0x1a5   :  { %v244_v18 = vadd.f32 0.014752088, %v243_v12  ;;  %v663_v23 = vmin.f32 %v268_v16, 16.0  ;;  %v233_v26 = vadd.f32 0.0036580483, %v232_v14 }
 0x1a6   :  { %v325_v20 = vmul.f32 %v324_v15, %v636_v59  ;;  %v350_v36 = vmul.f32 2.1237322e-06, %v665_v24  ;;  %v361_v39 = vmul.f32 3.8918573e-05, %v665_v24  ;;  %v314_v47 = vmul.f32 %v313_v30, %v636_v59 }
 0x1a7   :  { %v245_v25 = vmul.f32 %v244_v18, %v638_v60  ;;  %v270_v28 = vmul.f32 2.1237322e-06, %v663_v23  ;;  %v281_v31 = vmul.f32 3.8918573e-05, %v663_v23  ;;  %v234_v41 = vmul.f32 %v233_v26, %v638_v60 }
 0x1a8   :  { %v326_v27 = vadd.f32 0.112945676, %v325_v20  ;;  %v351_v44 = vadd.f32 0.00028619796, %v350_v36  ;;  %v362_v46 = vadd.f32 0.001143296, %v361_v39 }
 0x1a9   :  { %v246_v29 = vadd.f32 0.112945676, %v245_v25  ;;  %v271_v32 = vadd.f32 0.00028619796, %v270_v28  ;;  %v282_v38 = vadd.f32 0.001143296, %v281_v31 }
 0x1aa   :  { %v327_v21 = vmul.f32 %v326_v27, %v636_v59  ;;  %v682_v49 = vmul.f32 0.70710677, %v672_v37  ;;  %v352_v52 = vmul.f32 %v351_v44, %v665_v24  ;;  %v363_v53 = vmul.f32 %v362_v46, %v665_v24 }
 0x1ab   :  { %v247_v22 = vmul.f32 %v246_v29, %v638_v60  ;;  %v216_v40 = vpop.f32.mrf.mxu2  ;;  %v272_v43 = vmul.f32 %v271_v32, %v663_v23  ;;  %v283_v45 = vmul.f32 %v282_v38, %v663_v23  ;;  %v235_v57 = vadd.f32 0.05243302, %v234_v41 }
 0x1ac   :  { %v328_v42 = vadd.f32 0.4994258, %v327_v21  ;;  %v364_v0 = vadd.f32 0.014752088, %v363_v53  ;;  %v388_v2 = vmul.f32 %v682_v49, %v682_v49  ;;  %v315_v3 = vadd.f32 0.05243302, %v314_v47 }
 0x1ad   :  { %v248_v33 = vadd.f32 0.4994258, %v247_v22  ;;  %v273_v48 = vadd.f32 0.0036580483, %v272_v43  ;;  %v284_v51 = vadd.f32 0.014752088, %v283_v45  ;;  %v236_v6 = vmul.f32 %v235_v57, %v638_v60 }
 0x1ae   :  { %v329_v34 = vmul.f32 %v328_v42, %v636_v59  ;;  %v353_v5 = vadd.f32 0.0036580483, %v352_v52  ;;  %v365_v9 = vmul.f32 %v364_v0, %v665_v24  ;;  %v699_v12 = vmin.f32 %v388_v2, 16.0 }
 0x1af   :  { %v249_v50 = vmul.f32 %v248_v33, %v638_v60  ;;  %v274_v62 = vmul.f32 %v273_v48, %v663_v23  ;;  %v285_v63 = vmul.f32 %v284_v51, %v663_v23  ;;  %v316_v13 = vmul.f32 %v315_v3, %v636_v59 }
 0x1b0   :  { %v687_v58 = vadd.f32 1.0, %v329_v34  ;;  %v354_v15 = vmul.f32 %v353_v5, %v665_v24  ;;  %v366_v16 = vadd.f32 0.112945676, %v365_v9  ;;  %v237_v18 = vadd.f32 0.18741608, %v236_v6 }
 0x1b1   :  { %v689_v61 = vadd.f32 1.0, %v249_v50  ;;  %v275_v7 = vadd.f32 0.05243302, %v274_v62  ;;  %v286_v8 = vadd.f32 0.112945676, %v285_v63 }
 0x1b2   :  { %501 = vrcp.f32 %v687_v58  ;;  %v390_v27 = vmul.f32 2.1237322e-06, %v699_v12  ;;  %v367_v29 = vmul.f32 %v366_v16, %v665_v24  ;;  %v401_v30 = vmul.f32 3.8918573e-05, %v699_v12 }
 0x1b3   :  { %503 = vrcp.f32 %v689_v61  ;;  %v287_v14 = vmul.f32 %v286_v8, %v663_v23  ;;  %v276_v25 = vmul.f32 %v275_v7, %v663_v23  ;;  %v317_v31 = vadd.f32 0.18741608, %v316_v13 }
 0x1b4   :  { %v355_v36 = vadd.f32 0.05243302, %v354_v15  ;;  %v238_v22 = vmul.f32 %v237_v18, %v638_v60  ;;  %v368_v39 = vadd.f32 0.4994258, %v367_v29  ;;  %v391_v42 = vadd.f32 0.00028619796, %v390_v27 }
 0x1b5   :  { %v288_v26 = vadd.f32 0.4994258, %v287_v14  ;;  %v277_v40 = vadd.f32 0.18741608, %v276_v25  ;;  %v402_v45 = vadd.f32 0.001143296, %v401_v30  ;;  %v318_v46 = vmul.f32 %v317_v31, %v636_v59 }
 0x1b6   :  { %v369_v33 = vmul.f32 %v368_v39, %v665_v24  ;;  %v356_v47 = vmul.f32 %v355_v36, %v665_v24  ;;  %v239_v60 = vadd.f32 1.1283791, %v238_v22  ;;  %v262_v48 = vand.u32 2147483648, %v689_v61 }
 0x1b7   :  { %v289_v32 = vmul.f32 %v288_v26, %v663_v23  ;;  %vm256_vm3 = vweird.f32 %v689_v61  ;;  %v260_v51 = vand.u32 2147483647, %v689_v61  ;;  %v278_v52 = vmul.f32 %v277_v40, %v663_v23 }
 0x1b8   :  { %v704_v17 = vpop.eup %501  ;;  %v723_v50 = vadd.f32 1.0, %v369_v33  ;;  %v403_v53 = vmul.f32 %v402_v45, %v699_v12  ;;  %v392_v62 = vmul.f32 %v391_v42, %v699_v12  ;;  %v342_v0 = vand.u32 2147483648, %v687_v58 }
 0x1b9   :  { %v504_v19 = vpop.eup %503  ;;  %v332_v20 = vmul.f32 %v704_v17, %v687_v58  ;;  %v715_v41 = vadd.f32 1.0, %v289_v32  ;;  %vm337_vm5 = vweird.f32 %v704_v17  ;;  %v263_v23 = vor.u32 1.1754944e-38, %v262_v48 }
 0x1ba   :  { %v252_v28 = vmul.f32 %v504_v19, %v689_v61  ;;  %vm257_vm0 = vweird.f32 %v504_v19  ;;  %v357_v61 = vadd.f32 0.18741608, %v356_v47  ;;  %v319_v2 = vadd.f32 1.1283791, %v318_v46 }
 0x1bb   :  { %v333_v21 = vsub.f32 1.0, %v332_v20  ;;  %505 = vrcp.f32 %v715_v41  ;;  %vm729_vm4 = vmor %vm256_vm3, %vm257_vm0  ;;  %vm336_vm6 = vweird.f32 %v687_v58  ;;  %v340_v3 = vand.u32 2147483647, %v687_v58 }
 0x1bc   :  { %v253_v38 = vsub.f32 1.0, %v252_v28  ;;  %507 = vrcp.f32 %v723_v50  ;;  %v240_v6 = vmul.f32 %v239_v60, %v630_v35  ;;  %vm261_vm7 = vcmp.eq.f32.partialorder %v260_v51, 8.507059e+37  ;;  %vm743_vm8 = vmor %vm336_vm6, %vm337_vm5 }
 0x1bd   :  { %v334_v44 = vmul.f32 %v704_v17, %v333_v21  ;;  %v279_v8 = vadd.f32 1.1283791, %v278_v52  ;;  %v404_v9 = vadd.f32 0.014752088, %v403_v53  ;;  %v393_v16 = vadd.f32 0.0036580483, %v392_v62 }
 0x1be   :  { %v254_v43 = vmul.f32 %v504_v19, %v253_v38  ;;  %v343_v18 = vor.u32 1.1754944e-38, %v342_v0  ;;  %v300_v58 = vand.u32 2147483647, %v715_v41  ;;  %v358_v35 = vmul.f32 %v357_v61, %v665_v24 }
 0x1bf   :  { %v335_v57 = vadd.f32 %v704_v17, %v334_v44  ;;  %v320_v20 = vmul.f32 %v319_v2, %v627_v56  ;;  %vm341_vm9 = vcmp.eq.f32.partialorder %v340_v3, 8.507059e+37  ;;  %v302_v26 = vand.u32 2147483648, %v715_v41 }
 0x1c0   :  { %v255_v34 = vadd.f32 %v504_v19, %v254_v43  ;;  %v394_v24 = vmul.f32 %v393_v16, %v699_v12  ;;  %vm296_vm11 = vweird.f32 %v715_v41  ;;  %vm760_vm12 = vcmp.eq.f32.partialorder %v300_v58, 8.507059e+37 }
 0x1c1   :  { %v506_v5 = vpop.eup %505  ;;  %v339_v14 = vsel %vm743_vm8, %v704_v17, %v335_v57  ;;  %v280_v17 = vmul.f32 %v279_v8, %v650_v10  ;;  %v359_v32 = vadd.f32 1.1283791, %v358_v35  ;;  %v303_v39 = vor.u32 1.1754944e-38, %v302_v26 }
 0x1c2   :  { %v259_v63 = vsel %vm729_vm4, %v504_v19, %v255_v34  ;;  %v292_v15 = vmul.f32 %v506_v5, %v715_v41  ;;  %v405_v19 = vmul.f32 %v404_v9, %v699_v12  ;;  %v508_v27 = vpop.eup %507  ;;  %v344_v29 = vsel %vm341_vm9, %v343_v18, %v339_v14 }
 0x1c3   :  { %v264_v13 = vsel %vm261_vm7, %v263_v23, %v259_v63  ;;  %vm297_vm10 = vweird.f32 %v506_v5  ;;  %v372_v21 = vmul.f32 %v508_v27, %v723_v50  ;;  %v345_v22 = vmul.f32 %v344_v29, %v320_v20 }
 0x1c4   :  { %v293_v25 = vsub.f32 1.0, %v292_v15  ;;  %v265_v28 = vmul.f32 %v264_v13, %v240_v6  ;;  %v406_v30 = vadd.f32 0.112945676, %v405_v19  ;;  %vm298_vm13 = vmor %vm296_vm11, %vm297_vm10  ;;  %v380_v42 = vand.u32 2147483647, %v723_v50 }
 0x1c5   :  { %v373_v10 = vsub.f32 1.0, %v372_v21  ;;  %v382_v43 = vand.u32 2147483648, %v723_v50  ;;  %vm377_vm14 = vweird.f32 %v508_v27  ;;  %v395_v45 = vadd.f32 0.05243302, %v394_v24 }
 0x1c6   :  { %v294_v31 = vmul.f32 %v506_v5, %v293_v25  ;;  %v407_v36 = vmul.f32 %v406_v30, %v699_v12  ;;  %v463_v40 = vclamps-f32 %v265_v28, 1.0  ;;  %v360_v34 = vmul.f32 %v359_v32, %v653_v11 }
 0x1c7   :  { %v374_v41 = vmul.f32 %v508_v27, %v373_v10  ;;  %vm376_vm15 = vweird.f32 %v723_v50  ;;  %v465_v51 = vclamps-f32 %v345_v22, 1.0  ;;  %vm381_vm2 = vcmp.eq.f32.partialorder %v380_v42, 8.507059e+37 }
 0x1c8   :  { %v295_v38 = vadd.f32 %v506_v5, %v294_v31  ;;  %v408_v44 = vadd.f32 0.4994258, %v407_v36  ;;  %vm378_vm1 = vmor %vm376_vm15, %vm377_vm14  ;;  %v383_v52 = vor.u32 1.1754944e-38, %v382_v43  ;;  %v428_v59 = vadd.f32 1.0, %v463_v40 }
 0x1c9   :  { %v375_v48 = vadd.f32 %v508_v27, %v374_v41  ;;  %v396_v63 = vmul.f32 %v395_v45, %v699_v12  ;;  %v218_v61 = vmul.f32 0.5, %v624_v55  ;;  %v219_v23 = vmul.f32 0.5, %v646_v4 }
 0x1ca   :  { %v299_v33 = vsel %vm298_vm13, %v506_v5, %v295_v38  ;;  %v409_v47 = vmul.f32 %v408_v44, %v699_v12  ;;  %v430_v3 = vadd.f32 1.0, %v465_v51  ;;  %v220_v8 = vmul.f32 0.5, %v622_v54 }
 0x1cb   :  { %v304_v46 = vsel %vm760_vm12, %v303_v39, %v299_v33  ;;  %v379_v62 = vsel %vm378_vm1, %v508_v27, %v375_v48  ;;  %v433_v50 = vmul.f32 %v428_v59, %v218_v61  ;;  %v397_v7 = vadd.f32 0.18741608, %v396_v63 }
 0x1cc   :  { %v305_v60 = vmul.f32 %v304_v46, %v280_v17  ;;  %v410_v53 = vadd.f32 1.0, %v409_v47  ;;  %v384_v0 = vsel %vm381_vm2, %v383_v52, %v379_v62  ;;  %v221_v13 = vmul.f32 0.5, %v642_v1 }
 0x1cd   :  { %v385_v2 = vmul.f32 %v384_v0, %v360_v34  ;;  %v435_v16 = vmul.f32 %v430_v3, %v220_v8  ;;  %v398_v4 = vmul.f32 %v397_v7, %v699_v12  ;;  %v222_v30 = vmul.f32 0.5, %v672_v37 }
 0x1ce   :  { %v464_v57 = vclamps-f32 %v305_v60, 1.0  ;;  %509 = vrcp.f32 %v410_v53  ;;  %v422_v19 = vand.u32 2147483648, %v410_v53  ;;  %v420_v20 = vand.u32 2147483647, %v410_v53 }
 0x1cf   :  { %v466_v6 = vclamps-f32 %v385_v2, 1.0  ;;  %v399_v54 = vadd.f32 1.1283791, %v398_v4  ;;  %vm416_vm3 = vweird.f32 %v410_v53 }
 0x1d0   :  { %v429_v11 = vadd.f32 1.0, %v464_v57  ;;  %v423_v26 = vor.u32 1.1754944e-38, %v422_v19  ;;  %vm421_vm5 = vcmp.eq.f32.partialorder %v420_v20, 8.507059e+37 }
 0x1d1   :  { %v431_v14 = vadd.f32 1.0, %v466_v6  ;;  %v400_v27 = vmul.f32 %v399_v54, %v682_v49 }
 0x1d2   :  { %v434_v5 = vmul.f32 %v429_v11, %v219_v23 }
 0x1d3   :  { %v436_v55 = vmul.f32 %v431_v14, %v221_v13 }
 0x1d4   :  { %v473_v9 = vpack.c.bf16 %v434_v5, %v433_v50  ;;  %v510_v15 = vpop.eup %509 }
 0x1d5   :  { %v412_v18 = vmul.f32 %v510_v15, %v410_v53  ;;  %v478_v58 = vpack.c.bf16 %v436_v55, %v435_v16  ;;  %vm417_vm0 = vweird.f32 %v510_v15 }
 0x1d6   :  { %474 = vst [vmem:[%s794_s5] sm:$0xff] %v473_v9   ;;  %vm418_vm4 = vmor %vm416_vm3, %vm417_vm0 }
 0x1d7   :  { %v413_v35 = vsub.f32 1.0, %v412_v18  ;;  %480 = vst [vmem:[%s794_s5 + $0x8] sm:$0xff] %v478_v58  }
 0x1d9   :  { %v414_v1 = vmul.f32 %v510_v15, %v413_v35 }
 0x1db   :  { %v415_v25 = vadd.f32 %v510_v15, %v414_v1 }
 0x1dd   :  { %v419_v28 = vsel %vm418_vm4, %v510_v15, %v415_v25 }
 0x1de   :  { %v424_v12 = vsel %vm421_vm5, %v423_v26, %v419_v28 }
 0x1df   :  { %v425_v29 = vmul.f32 %v424_v12, %v400_v27 }
 0x1e1   :  { %v467_v17 = vclamps-f32 %v425_v29, 1.0 }
 0x1e3   :  { %v432_v31 = vadd.f32 1.0, %v467_v17 }
 0x1e5   :  { %v437_v21 = vmul.f32 %v432_v31, %v222_v30 }
 0x1e7   :  { %v442_v24 = vpack.c.bf16 %v437_v21, %v437_v21 }
 0x1e9   :  { %447 = vst [vmem:[%s794_s5 + $0x10] sm:$0x1] %v442_v24 }

// kernel: vit_forward.43
= control target key start
LH: loop header
LB: loop body
LE: loop exit
PB: predicated region body
PF: predicated region fallthrough
CT: control target
= control target key end

     0   :  { %vm23_vm0 = vcmask 254976   ;;  %s219_s0 = inlined_call_operand.vmem [shape: f32[2,32], index: 0, kind: input, shape index: {}]   ;;  %s220_s1 = inlined_call_operand.vmem [shape: bf16[32,128], index: 1, kind: input, shape index: {}]   ;;  %s221_s2 = inlined_call_operand.vmem [shape: f32[1,128], index: 2, kind: input, shape index: {}]   ;;  %s222_s3 = inlined_call_operand.vmem [shape: f32[1,32], index: 3, kind: input, shape index: {}]   ;;  %s223_s4 = inlined_call_operand.vmem [shape: f32[1,32], index: 4, kind: input, shape index: {}]   ;;  %s224_s5 = inlined_call_operand.hbm [shape: f32[2,128], index: 5, kind: output, shape index: {}]  }
   0x1   :  { %v22_v0 = vld [vmem:[%s219_s0] sm:$0x3] }
   0x2   :  { %v24_v1 = vsel %vm23_vm0, %v22_v0, 0.0 }
   0x3   :  { %25 = vadd.xlane.f32.xlu0 %v24_v1 }
   0x4   :  { %10 = vsyncpa [#allocation3], 0  ;;  %v164_v2 = vmov 32.0   ;;  %v128_v14 = vld [vmem:[%s220_s1 + $0x8] sm:$0xff]  ;;  %v127_v15 = vld [vmem:[%s220_s1] sm:$0xff]  ;;  %vm84_vm5 = vcmask 261120  }
   0x5   :  { %134 = vrcp.f32 %v164_v2  ;;  %94 = vmatpush.bf16.msra.mxu0 %v128_v14  ;;  %v131_v25 = vld [vmem:[%s222_s3] ss:$0 sm:$0xff]  ;;  %s165_s28 = smov [#allocation2]   ;;  %s109_s3 = sshll.u32 %s224_s5, 4  ;;  %s110_s3 = int_to_ptr.hbm [resolvable:$true] %s109_s3 }
   0x6   :  { %v132_v28 = vld [vmem:[%s223_s4] ss:$0 sm:$0xff]  ;;  %s107_s29 = sshll.u32 %s165_s28, 4  ;;  %s108_s29 = int_to_ptr.vmem [resolvable:$true] %s107_s29 }
   0x7   :  { %v133_v32 = vld [vmem:[%s221_s2] ss:$0 sm:$0xff] }
   0x9   :  { %95 = vmatpush.bf16.msra.mxu0 %v127_v15 }
   0xb   :  { %v135_v3 = vpop.eup %134 }
   0xc   :  { %v28_v4 = vmul.f32 32.0, %v135_v3  ;;  %vm32_vm1 = vweird.f32 %v135_v3 }
   0xe   :  { %v29_v5 = vsub.f32 1.0, %v28_v4 }
  0x10   :  { %v30_v6 = vmul.f32 %v135_v3, %v29_v5 }
  0x12   :  { %v31_v7 = vadd.f32 %v135_v3, %v30_v6 }
  0x14   :  { %v33_v8 = vsel %vm32_vm1, %v135_v3, %v31_v7 }
  0x76   :  { %v26_v9 = vpop.xlane.xlu0 %25 }
  0x77   :  { %v34_v10 = vmul.f32 %v33_v8, %v26_v9 }
  0x79   :  { %v35_v11 = vsub.f32 %v22_v0, %v34_v10 }
  0x7b   :  { %v36_v12 = vmul.f32 %v35_v11, %v35_v11 }
  0x7d   :  { %v37_v13 = vsel %vm23_vm0, %v36_v12, 0.0 }
  0x7e   :  { %38 = vadd.xlane.f32.xlu0 %v37_v13 }
  0xf1   :  { %v39_v16 = vpop.xlane.xlu0 %38 }
  0xf2   :  { %v40_v17 = vmul.f32 %v39_v16, %v33_v8 }
  0xf4   :  { %v41_v18 = vadd.f32 1e-05, %v40_v17 }
  0xf6   :  { %136 = vrsqrt.f32 %v41_v18  ;;  %vm48_vm3 = vweird.f32 %v41_v18 }
  0xfc   :  { %v137_v19 = vpop.eup %136 }
  0xfd   :  { %v43_v20 = vmul.f32 %v137_v19, %v41_v18  ;;  %vm49_vm2 = vweird.f32 %v137_v19 }
  0xfe   :  { %vm50_vm4 = vmor %vm48_vm3, %vm49_vm2 }
  0xff   :  { %v44_v21 = vmul.f32 %v137_v19, %v43_v20 }
 0x101   :  { %v45_v22 = vmul.f32 0.5, %v44_v21 }
 0x103   :  { %v46_v23 = vsub.f32 1.5, %v45_v22 }
 0x105   :  { %v47_v24 = vmul.f32 %v137_v19, %v46_v23 }
 0x107   :  { %v51_v26 = vsel %vm50_vm4, %v137_v19, %v47_v24 }
 0x108   :  { %v52_v27 = vmul.f32 %v51_v26, %v35_v11 }
 0x10a   :  { %v57_v29 = vmul.f32 %v131_v25, %v52_v27 }
 0x10c   :  { %v62_v30 = vadd.f32 %v132_v28, %v57_v29 }
 0x10e   :  { %v63_v31 = vpack.c.bf16 %v62_v30, %v62_v30 }
 0x110   :  { %126 = vmatmul.msk.bf16.vlgmr.msra.gmra.mxu0 %vm84_vm5, %v63_v31 }
 0x18d   :  { %v97_v33 = vpop.f32.mrf.mxu0 }
 0x18e   :  { %v98_v34 = vadd.f32 %v133_v32, %v97_v33 }
 0x190   :  { %101 = vst [vmem:[#allocation2] sm:$0x3] %v98_v34 }
 0x191   :  { %112 = dma.vmem_to_hbm [thread:$0]  %s108_s29, 32, %s110_s3, [#allocation3]  }
 0x195   :  { %v99_v35 = vpop.f32.mrf.mxu0 }
 0x196   :  { %162 = dma.done.wait [#allocation3], 32  }
 0x197   :  { %163 = vsyncadd [#allocation3], 4294967264 }
 0x198   :  { %117 = vsyncpa [#allocation3], 1 }

</bundles_post_ra>
